<compile_context>
chip_gen: v7x
topology: tpu7x:2x2x1
jax: 0.10.0
libtpu: 0.0.40
codegen_flags: <defaults>
</compile_context>

<pallas_src>
import functools

import jax
import jax.numpy as jnp
from jax import lax
from jax.experimental import pallas as pl
from jax.experimental.pallas import tpu as pltpu

KSIZE = 3
LANE = 128
BN_EPS = 1e-5


def _bridge_kernel(x_ref, w1_ref, w2_ref, sb1_ref, sb2_ref, o_ref,
                   buf1_ref, buf2_ref, *, tm):
    """Fused Bridge for one batch element and one Cout tile.

    x_ref   : (1, H, W, Cin_p)        bf16 input tile
    w1_ref  : (3, 3*Cin_p,  Cmid_p)   bf16 weights, rows = [dx-major, cin-minor]
    w2_ref  : (3, 3*Cmid_p, TN)       bf16 weights (Cout tile)
    sb*_ref : (2, C)                  f32 folded BN (row0 = scale, row1 = bias)
    o_ref   : (1, H, W, TN)           bf16 output tile (lane-dense)
    buf*_ref: (H+2, W, 3*C) bf16      im2col-on-W staging (halo on H only)
    """
    H, W = o_ref.shape[1], o_ref.shape[2]
    tn = o_ref.shape[3]
    cin = x_ref.shape[3]
    cmid = buf2_ref.shape[2] // 3
    n_strips = H // tm
    unroll = n_strips <= 4
    j = pl.program_id(1)                              # Cout-tile index

    # Edge masks along W, hoisted (built once per kernel invocation).
    col = lax.broadcasted_iota(jnp.int32, (1, W, 1), 1)
    lmask = (col > 0).astype(jnp.float32)             # zero the w == 0 column
    rmask = (col < (W - 1)).astype(jnp.float32)       # zero the w == W-1 column

    def fill_bands(dst_ref, r0, v, c):
        """Store strip v:(tm, W, c) f32 into dst rows [r0+1, r0+1+tm) as the
        three dx bands [x(w-1) | x(w) | x(w+1)].  Rolls are done in f32
        (32-bit sublane rotate) and masked at the image edge; all stores are
        lane/sublane aligned (channel offsets are multiples of 128, full W)."""
        left = pltpu.roll(v, shift=1, axis=1) * lmask
        right = pltpu.roll(v, shift=W - 1, axis=1) * rmask
        dst_ref[pl.ds(r0 + 1, tm), :, 0:c] = left.astype(dst_ref.dtype)
        dst_ref[pl.ds(r0 + 1, tm), :, c:2 * c] = v.astype(dst_ref.dtype)
        dst_ref[pl.ds(r0 + 1, tm), :, 2 * c:3 * c] = right.astype(dst_ref.dtype)

    def conv_stage(src_ref, w_ref, sb_ref, c_out, emit):
        """3x3 conv + folded BN + ReLU, processed in row strips of TM rows."""
        scale = sb_ref[0:1, :]                        # (1, c_out) f32
        bias = sb_ref[1:2, :]

        def strip(s, carry):
            r0 = pl.multiple_of(s * tm, tm)
            # Accumulator initialized with the dy=0 dot; 3 fat-K (K=3*C) dots.
            acc = jnp.dot(src_ref[pl.ds(r0, tm)].reshape(tm * W, -1),
                          w_ref[0], preferred_element_type=jnp.float32)
            acc += jnp.dot(src_ref[pl.ds(r0 + 1, tm)].reshape(tm * W, -1),
                           w_ref[1], preferred_element_type=jnp.float32)
            acc += jnp.dot(src_ref[pl.ds(r0 + 2, tm)].reshape(tm * W, -1),
                           w_ref[2], preferred_element_type=jnp.float32)
            y = jnp.maximum(acc * scale + bias, 0.0)  # folded BN + ReLU (f32)
            emit(r0, y.reshape(tm, W, c_out))
            return carry

        lax.fori_loop(0, n_strips, strip, 0, unroll=unroll)

    # ---- Halo init: only the 2 H-halo rows of each staging buffer (interior
    # is fully rewritten every step).  Done per (n, j == 0), so it is safe when
    # the batch axis is split across TensorCores. ----
    @pl.when(j == 0)
    def _zero_halo():
        buf1_ref[0:1] = jnp.zeros((1, W, 3 * cin), buf1_ref.dtype)
        buf1_ref[H + 1:H + 2] = jnp.zeros((1, W, 3 * cin), buf1_ref.dtype)
        buf2_ref[0:1] = jnp.zeros((1, W, 3 * cmid), buf2_ref.dtype)
        buf2_ref[H + 1:H + 2] = jnp.zeros((1, W, 3 * cmid), buf2_ref.dtype)

    # ---- Stage 1: only for the first Cout tile; its output (already staged in
    # im2col band form) persists in buf2 across the remaining Cout tiles. ----
    @pl.when(j == 0)
    def _stage1():
        def fill_in(s, carry):
            r0 = pl.multiple_of(s * tm, tm)
            v = x_ref[0, pl.ds(r0, tm), :, :].astype(jnp.float32)
            fill_bands(buf1_ref, r0, v, cin)
            return carry
        lax.fori_loop(0, n_strips, fill_in, 0, unroll=unroll)

        def emit1(r0, y):                              # y: (tm, W, cmid) f32
            fill_bands(buf2_ref, r0, y, cmid)
        conv_stage(buf1_ref, w1_ref, sb1_ref, cmid, emit1)

    # ---- Stage 2: runs for every Cout tile; lane-dense bf16 store. ----
    def emit2(r0, y):                                  # y: (tm, W, tn) f32
        o_ref[0, pl.ds(r0, tm), :, :] = y.astype(o_ref.dtype)
    conv_stage(buf2_ref, w2_ref, sb2_ref, tn, emit2)


def _round_up(x, m):
    return ((x + m - 1) // m) * m


def _pad_last(a, target):
    return jnp.pad(a, [(0, 0)] * (a.ndim - 1) + [(0, target - a.shape[-1])])


def _fold_bn(conv_bias, gamma, beta, running_mean, running_var):
    """Fold conv bias + eval-mode BatchNorm into per-channel scale/bias."""
    inv_std = 1.0 / jnp.sqrt(running_var + BN_EPS)
    scale = gamma * inv_std
    bias = beta + (conv_bias - running_mean) * scale
    return scale, bias


def _prep_weight(w_hwio, cin_p, cout_p):
    """(3,3,Cin,Cout) -> bf16 (3, 3*Cin_p, Cout_p), zero channel padding."""
    kh, kw, cin, cout = w_hwio.shape
    w = jnp.pad(w_hwio, ((0, 0), (0, 0), (0, cin_p - cin), (0, cout_p - cout)))
    return w.reshape(kh, kw * cin_p, cout_p).astype(jnp.bfloat16)


def _pick_tm(H, W):
    """Largest row-strip height dividing H with TM*W <= 256 (bounded acc)."""
    best = 1
    for tm in range(1, H + 1):
        if H % tm == 0 and tm * W <= 256:
            best = tm
    return best


def _vmem_limit_bytes(H, W, cin_p, cout_p, tn):
    """Scoped-VMEM budget from the actual buffer set (+50% headroom)."""
    bf = 2
    blocks = (H * W * cin_p * bf                          # x block
              + KSIZE * KSIZE * cin_p * cout_p * bf       # w1 (resident)
              + KSIZE * KSIZE * cout_p * tn * bf          # w2 Cout tile
              + 2 * cout_p * 4 + 2 * tn * 4               # sb1, sb2
              + H * W * tn * bf)                          # bf16 output block
    scratch = (H + 2) * W * 3 * (cin_p + cout_p) * bf     # im2col staging
    total = 2 * blocks + scratch                          # inputs/out 2x-buffered
    return int(min(max(1.5 * total + (4 << 20), 32 << 20), 112 << 20))


def bridge_forward(x_nchw, params):
    """Bridge forward pass (eval-mode BN). Input/output NCHW like PyTorch."""
    N, Cin, H, W = x_nchw.shape
    Cout = params["w0"].shape[-1]
    cin_p = _round_up(Cin, LANE)
    cout_p = _round_up(Cout, LANE)
    tn = 256 if cout_p % 256 == 0 else LANE            # Cout tile width
    n_j = cout_p // tn
    tm = _pick_tm(H, W)

    # Wrapper glue: NCHW -> NHWC, lane-pad channels, bf16 cast.
    x = jnp.transpose(x_nchw, (0, 2, 3, 1))
    x = _pad_last(x, cin_p).astype(jnp.bfloat16)

    w1 = _prep_weight(params["w0"], cin_p, cout_p)
    w2 = _prep_weight(params["w1"], cout_p, cout_p)

    sbs = []
    for blk in range(2):
        scale, bias = _fold_bn(
            params[f"b{blk}"], params[f"gamma{blk}"], params[f"beta{blk}"],
            params[f"mean{blk}"], params[f"var{blk}"])
        sbs.append(jnp.stack([_pad_last(scale, cout_p),
                              _pad_last(bias, cout_p)]).astype(jnp.float32))
    sb1, sb2 = sbs

    out_p = pl.pallas_call(
        functools.partial(_bridge_kernel, tm=tm),
        out_shape=jax.ShapeDtypeStruct((N, H, W, cout_p), jnp.bfloat16),
        grid=(N, n_j),
        in_specs=[
            pl.BlockSpec((1, H, W, cin_p), lambda n, j: (n, 0, 0, 0)),
            pl.BlockSpec((KSIZE, KSIZE * cin_p, cout_p), lambda n, j: (0, 0, 0)),
            pl.BlockSpec((KSIZE, KSIZE * cout_p, tn), lambda n, j: (0, 0, j)),
            pl.BlockSpec((2, cout_p), lambda n, j: (0, 0)),
            pl.BlockSpec((2, tn), lambda n, j: (0, j)),
        ],
        out_specs=pl.BlockSpec((1, H, W, tn), lambda n, j: (n, 0, 0, j)),
        scratch_shapes=[
            pltpu.VMEM((H + 2, W, 3 * cin_p), jnp.bfloat16),
            pltpu.VMEM((H + 2, W, 3 * cout_p), jnp.bfloat16),
        ],
        compiler_params=pltpu.CompilerParams(
            dimension_semantics=("parallel", "arbitrary"),
            vmem_limit_bytes=_vmem_limit_bytes(H, W, cin_p, cout_p, tn)),
    )(x, w1, w2, sb1, sb2)

    # TODO(synk): a fused consumer could keep the padded bf16 NHWC output and
    # skip this slice / transpose / upcast HBM round trip.
    out = out_p[..., :Cout].astype(jnp.float32)
    return jnp.transpose(out, (0, 3, 1, 2))             # NHWC -> NCHW


def make_bridge_params(key, in_channels, out_channels):
    """Deterministic synthetic params for Bridge (two ConvBlocks)."""
    ks = jax.random.split(key, 12)
    params = {}
    chans = [(in_channels, out_channels), (out_channels, out_channels)]
    i = 0
    for blk, (cin, cout) in enumerate(chans):
        fan_in = cin * KSIZE * KSIZE
        bound = 1.0 / jnp.sqrt(fan_in)
        params[f"w{blk}"] = jax.random.uniform(
            ks[i], (KSIZE, KSIZE, cin, cout), jnp.float32, -bound, bound); i += 1
        params[f"b{blk}"] = jax.random.uniform(
            ks[i], (cout,), jnp.float32, -bound, bound); i += 1
        params[f"gamma{blk}"] = jax.random.uniform(
            ks[i], (cout,), jnp.float32, 0.5, 1.5); i += 1
        params[f"beta{blk}"] = jax.random.uniform(
            ks[i], (cout,), jnp.float32, -0.5, 0.5); i += 1
        params[f"mean{blk}"] = jax.random.uniform(
            ks[i], (cout,), jnp.float32, -0.5, 0.5); i += 1
        params[f"var{blk}"] = jax.random.uniform(
            ks[i], (cout,), jnp.float32, 0.5, 1.5); i += 1
    return params


def bridge_reference(x_nchw, params):
    """Pure-JAX reference (lax.conv), mirroring the kernel's bf16 discipline."""
    x = jnp.transpose(x_nchw, (0, 2, 3, 1))
    for blk in range(2):
        y = lax.conv_general_dilated(
            x.astype(jnp.bfloat16), params[f"w{blk}"].astype(jnp.bfloat16),
            window_strides=(1, 1), padding="SAME",
            dimension_numbers=("NHWC", "HWIO", "NHWC"),
            preferred_element_type=jnp.float32,
        ) + params[f"b{blk}"]
        inv_std = 1.0 / jnp.sqrt(params[f"var{blk}"] + BN_EPS)
        y = (y - params[f"mean{blk}"]) * inv_std * params[f"gamma{blk}"] \
            + params[f"beta{blk}"]
        x = jnp.maximum(y, 0.0)
    return jnp.transpose(x, (0, 3, 1, 2))


if __name__ == "__main__":
    key = jax.random.PRNGKey(0)
    k_x, k_p = jax.random.split(key)

    N, Cin, Cout, HW = 2, 4, 8, 16
    x = jax.random.normal(k_x, (N, Cin, HW, HW), jnp.float32)   # NCHW
    params = make_bridge_params(k_p, Cin, Cout)

    out = jax.block_until_ready(bridge_forward(x, params))
    ref = bridge_reference(x, params)

    assert out.shape == (N, Cout, HW, HW), out.shape
    max_err = float(jnp.max(jnp.abs(out - ref)))
    # Kernel output is bf16 (halves HBM writeback); tolerance covers the final
    # bf16 rounding on top of the f32/bf16-mixed reference.
    assert jnp.allclose(out, ref, atol=5e-2, rtol=5e-2), max_err
    print("KERNEL_OK")
</pallas_src>

<mosaic_0001>
module attributes {stable_mosaic.version = 11 : i64} {
  func.func @_bridge_kernel(%arg0: i32, %arg1: i32, %arg2: memref<1x16x16x128xbf16, #tpu.memory_space<vmem>>, %arg3: memref<3x384x128xbf16, #tpu.memory_space<vmem>>, %arg4: memref<3x384x128xbf16, #tpu.memory_space<vmem>>, %arg5: memref<2x128xf32, #tpu.memory_space<vmem>>, %arg6: memref<2x128xf32, #tpu.memory_space<vmem>>, %arg7: memref<1x16x16x128xbf16, #tpu.memory_space<vmem>>, %arg8: memref<18x16x384xbf16, #tpu.memory_space<vmem>>, %arg9: memref<18x16x384xbf16, #tpu.memory_space<vmem>>) attributes {dimension_semantics = [#tpu.dimension_semantics<parallel>, #tpu.dimension_semantics<arbitrary>], iteration_bounds = array<i64: 2, 1>, scalar_prefetch = 0 : i64, scratch_operands = 2 : i64, tpu.core_type = #tpu.core_type<tc>, window_params = [{transform_indices = @transform_0, window_bounds = array<i64: 1, 16, 16, 128>}, {pipeline_mode = #tpu.pipeline_mode<synchronous>, transform_indices = @transform_1, window_bounds = array<i64: 3, 384, 128>}, {transform_indices = @transform_2, window_bounds = array<i64: 3, 384, 128>}, {pipeline_mode = #tpu.pipeline_mode<synchronous>, transform_indices = @transform_3, window_bounds = array<i64: 2, 128>}, {transform_indices = @transform_4, window_bounds = array<i64: 2, 128>}, {transform_indices = @transform_5, window_bounds = array<i64: 1, 16, 16, 128>}]} {
    %0 = tpu.iota {dimensions = array<i32: 1>} : vector<1x16x1xi32>
    %c0_i32 = arith.constant 0 : i32
    %1 = vector.broadcast %c0_i32 : i32 to vector<1x16x1xi32>
    %2 = arith.cmpi sgt, %0, %1 : vector<1x16x1xi32>
    %3 = arith.extui %2 : vector<1x16x1xi1> to vector<1x16x1xi32>
    %4 = arith.sitofp %3 : vector<1x16x1xi32> to vector<1x16x1xf32>
    %c15_i32 = arith.constant 15 : i32
    %5 = vector.broadcast %c15_i32 : i32 to vector<1x16x1xi32>
    %6 = arith.cmpi slt, %0, %5 : vector<1x16x1xi32>
    %7 = arith.extui %6 : vector<1x16x1xi1> to vector<1x16x1xi32>
    %8 = arith.sitofp %7 : vector<1x16x1xi32> to vector<1x16x1xf32>
    %c0_i32_0 = arith.constant 0 : i32
    %9 = arith.cmpi eq, %arg1, %c0_i32_0 : i32
    %10 = arith.extui %9 : i1 to i32
    %c0_i32_1 = arith.constant 0 : i32
    %11 = arith.cmpi ne, %10, %c0_i32_1 : i32
    scf.if %11 {
      %cst_28 = arith.constant 0.000000e+00 : bf16
      %53 = vector.broadcast %cst_28 : bf16 to vector<1x16x384xbf16>
      %c0_29 = arith.constant 0 : index
      %c0_30 = arith.constant 0 : index
      %c0_31 = arith.constant 0 : index
      %54 = vector.load %arg8[%c0_29, %c0_30, %c0_31] : memref<18x16x384xbf16, #tpu.memory_space<vmem>>, vector<1x16x384xbf16>
      tpu.vector_store %arg8[%c0_29, %c0_30, %c0_31], %53 {strides = array<i32>} : memref<18x16x384xbf16, #tpu.memory_space<vmem>>, vector<1x16x384xbf16>,
      %cst_32 = arith.constant 0.000000e+00 : bf16
      %55 = vector.broadcast %cst_32 : bf16 to vector<1x16x384xbf16>
      %c17 = arith.constant 17 : index
      %c0_33 = arith.constant 0 : index
      %c0_34 = arith.constant 0 : index
      %56 = vector.load %arg8[%c17, %c0_33, %c0_34] : memref<18x16x384xbf16, #tpu.memory_space<vmem>>, vector<1x16x384xbf16>
      tpu.vector_store %arg8[%c17, %c0_33, %c0_34], %55 {strides = array<i32>} : memref<18x16x384xbf16, #tpu.memory_space<vmem>>, vector<1x16x384xbf16>,
      %cst_35 = arith.constant 0.000000e+00 : bf16
      %57 = vector.broadcast %cst_35 : bf16 to vector<1x16x384xbf16>
      %c0_36 = arith.constant 0 : index
      %c0_37 = arith.constant 0 : index
      %c0_38 = arith.constant 0 : index
      %58 = vector.load %arg9[%c0_36, %c0_37, %c0_38] : memref<18x16x384xbf16, #tpu.memory_space<vmem>>, vector<1x16x384xbf16>
      tpu.vector_store %arg9[%c0_36, %c0_37, %c0_38], %57 {strides = array<i32>} : memref<18x16x384xbf16, #tpu.memory_space<vmem>>, vector<1x16x384xbf16>,
      %cst_39 = arith.constant 0.000000e+00 : bf16
      %59 = vector.broadcast %cst_39 : bf16 to vector<1x16x384xbf16>
      %c17_40 = arith.constant 17 : index
      %c0_41 = arith.constant 0 : index
      %c0_42 = arith.constant 0 : index
      %60 = vector.load %arg9[%c17_40, %c0_41, %c0_42] : memref<18x16x384xbf16, #tpu.memory_space<vmem>>, vector<1x16x384xbf16>
      tpu.vector_store %arg9[%c17_40, %c0_41, %c0_42], %59 {strides = array<i32>} : memref<18x16x384xbf16, #tpu.memory_space<vmem>>, vector<1x16x384xbf16>,
    } else {
    }
    %c0_i32_2 = arith.constant 0 : i32
    %12 = arith.cmpi eq, %arg1, %c0_i32_2 : i32
    %13 = arith.extui %12 : i1 to i32
    %c0_i32_3 = arith.constant 0 : i32
    %14 = arith.cmpi ne, %13, %c0_i32_3 : i32
    scf.if %14 {
      %c0_i32_28 = arith.constant 0 : i32
      %c16_i32_29 = arith.constant 16 : i32
      %53 = arith.muli %c0_i32_28, %c16_i32_29 : i32
      %54 = tpu.assume_multiple %53, 16 : i32
      %c0_30 = arith.constant 0 : index
      %55 = arith.index_cast %54 : i32 to index
      %c0_31 = arith.constant 0 : index
      %c0_32 = arith.constant 0 : index
      %56 = vector.load %arg2[%c0_30, %55, %c0_31, %c0_32] : memref<1x16x16x128xbf16, #tpu.memory_space<vmem>>, vector<1x16x16x128xbf16>
      %57 = vector.shape_cast %56 : vector<1x16x16x128xbf16> to vector<16x16x128xbf16>
      %58 = arith.extf %57 : vector<16x16x128xbf16> to vector<16x16x128xf32>
      %c1_i32_33 = arith.constant 1 : i32
      %59 = tpu.dynamic_rotate %58 by %c1_i32_33 dim 1 : vector<16x16x128xf32>, i32 -> vector<16x16x128xf32>
      %60 = vector.broadcast %4 : vector<1x16x1xf32> to vector<16x16x128xf32>
      %61 = arith.mulf %59, %60 : vector<16x16x128xf32>
      %c15_i32_34 = arith.constant 15 : i32
      %62 = tpu.dynamic_rotate %58 by %c15_i32_34 dim 1 : vector<16x16x128xf32>, i32 -> vector<16x16x128xf32>
      %63 = vector.broadcast %8 : vector<1x16x1xf32> to vector<16x16x128xf32>
      %64 = arith.mulf %62, %63 : vector<16x16x128xf32>
      %65 = arith.truncf %61 : vector<16x16x128xf32> to vector<16x16x128xbf16>
      %c1_i32_35 = arith.constant 1 : i32
      %66 = arith.addi %54, %c1_i32_35 : i32
      %67 = arith.index_cast %66 : i32 to index
      %c0_36 = arith.constant 0 : index
      %c0_37 = arith.constant 0 : index
      %68 = vector.load %arg8[%67, %c0_36, %c0_37] : memref<18x16x384xbf16, #tpu.memory_space<vmem>>, vector<16x16x128xbf16>
      tpu.vector_store %arg8[%67, %c0_36, %c0_37], %65 {strides = array<i32>} : memref<18x16x384xbf16, #tpu.memory_space<vmem>>, vector<16x16x128xbf16>,
      %69 = arith.truncf %58 : vector<16x16x128xf32> to vector<16x16x128xbf16>
      %c1_i32_38 = arith.constant 1 : i32
      %70 = arith.addi %54, %c1_i32_38 : i32
      %71 = arith.index_cast %70 : i32 to index
      %c0_39 = arith.constant 0 : index
      %c128 = arith.constant 128 : index
      %72 = vector.load %arg8[%71, %c0_39, %c128] : memref<18x16x384xbf16, #tpu.memory_space<vmem>>, vector<16x16x128xbf16>
      tpu.vector_store %arg8[%71, %c0_39, %c128], %69 {strides = array<i32>} : memref<18x16x384xbf16, #tpu.memory_space<vmem>>, vector<16x16x128xbf16>,
      %73 = arith.truncf %64 : vector<16x16x128xf32> to vector<16x16x128xbf16>
      %c1_i32_40 = arith.constant 1 : i32
      %74 = arith.addi %54, %c1_i32_40 : i32
      %75 = arith.index_cast %74 : i32 to index
      %c0_41 = arith.constant 0 : index
      %c256 = arith.constant 256 : index
      %76 = vector.load %arg8[%75, %c0_41, %c256] : memref<18x16x384xbf16, #tpu.memory_space<vmem>>, vector<16x16x128xbf16>
      tpu.vector_store %arg8[%75, %c0_41, %c256], %73 {strides = array<i32>} : memref<18x16x384xbf16, #tpu.memory_space<vmem>>, vector<16x16x128xbf16>,
      %c1_i32_42 = arith.constant 1 : i32
      %c0_43 = arith.constant 0 : index
      %c0_44 = arith.constant 0 : index
      %77 = vector.load %arg5[%c0_43, %c0_44] : memref<2x128xf32, #tpu.memory_space<vmem>>, vector<1x128xf32>
      %c1_45 = arith.constant 1 : index
      %c0_46 = arith.constant 0 : index
      %78 = vector.load %arg5[%c1_45, %c0_46] : memref<2x128xf32, #tpu.memory_space<vmem>>, vector<1x128xf32>
      %c0_i32_47 = arith.constant 0 : i32
      %c16_i32_48 = arith.constant 16 : i32
      %79 = arith.muli %c0_i32_47, %c16_i32_48 : i32
      %80 = tpu.assume_multiple %79, 16 : i32
      %81 = arith.index_cast %80 : i32 to index
      %c0_49 = arith.constant 0 : index
      %c0_50 = arith.constant 0 : index
      %82 = vector.load %arg8[%81, %c0_49, %c0_50] : memref<18x16x384xbf16, #tpu.memory_space<vmem>>, vector<16x16x384xbf16>
      %83 = vector.shape_cast %82 : vector<16x16x384xbf16> to vector<256x384xbf16>
      %c0_51 = arith.constant 0 : index
      %c0_52 = arith.constant 0 : index
      %c0_53 = arith.constant 0 : index
      %84 = vector.load %arg3[%c0_51, %c0_52, %c0_53] : memref<3x384x128xbf16, #tpu.memory_space<vmem>>, vector<1x384x128xbf16>
      %85 = vector.shape_cast %84 : vector<1x384x128xbf16> to vector<384x128xbf16>
      %cst_54 = arith.constant dense<0.000000e+00> : vector<256x128xf32>
      %86 = tpu.matmul %83, %85, %cst_54 {dimension_numbers = #tpu.dot_dimension_numbers<[1], [0], [0], [1], [0, 0, 1, 1], [], []>} : vector<256x384xbf16>, vector<384x128xbf16>, vector<256x128xf32> -> vector<256x128xf32>
      %c1_i32_55 = arith.constant 1 : i32
      %87 = arith.addi %80, %c1_i32_55 : i32
      %88 = arith.index_cast %87 : i32 to index
      %c0_56 = arith.constant 0 : index
      %c0_57 = arith.constant 0 : index
      %89 = vector.load %arg8[%88, %c0_56, %c0_57] : memref<18x16x384xbf16, #tpu.memory_space<vmem>>, vector<16x16x384xbf16>
      %90 = vector.shape_cast %89 : vector<16x16x384xbf16> to vector<256x384xbf16>
      %c1_58 = arith.constant 1 : index
      %c0_59 = arith.constant 0 : index
      %c0_60 = arith.constant 0 : index
      %91 = vector.load %arg3[%c1_58, %c0_59, %c0_60] : memref<3x384x128xbf16, #tpu.memory_space<vmem>>, vector<1x384x128xbf16>
      %92 = vector.shape_cast %91 : vector<1x384x128xbf16> to vector<384x128xbf16>
      %cst_61 = arith.constant dense<0.000000e+00> : vector<256x128xf32>
      %93 = tpu.matmul %90, %92, %cst_61 {dimension_numbers = #tpu.dot_dimension_numbers<[1], [0], [0], [1], [0, 0, 1, 1], [], []>} : vector<256x384xbf16>, vector<384x128xbf16>, vector<256x128xf32> -> vector<256x128xf32>
      %94 = arith.addf %86, %93 : vector<256x128xf32>
      %c2_i32_62 = arith.constant 2 : i32
      %95 = arith.addi %80, %c2_i32_62 : i32
      %96 = arith.index_cast %95 : i32 to index
      %c0_63 = arith.constant 0 : index
      %c0_64 = arith.constant 0 : index
      %97 = vector.load %arg8[%96, %c0_63, %c0_64] : memref<18x16x384xbf16, #tpu.memory_space<vmem>>, vector<16x16x384xbf16>
      %98 = vector.shape_cast %97 : vector<16x16x384xbf16> to vector<256x384xbf16>
      %c2_65 = arith.constant 2 : index
      %c0_66 = arith.constant 0 : index
      %c0_67 = arith.constant 0 : index
      %99 = vector.load %arg3[%c2_65, %c0_66, %c0_67] : memref<3x384x128xbf16, #tpu.memory_space<vmem>>, vector<1x384x128xbf16>
      %100 = vector.shape_cast %99 : vector<1x384x128xbf16> to vector<384x128xbf16>
      %cst_68 = arith.constant dense<0.000000e+00> : vector<256x128xf32>
      %101 = tpu.matmul %98, %100, %cst_68 {dimension_numbers = #tpu.dot_dimension_numbers<[1], [0], [0], [1], [0, 0, 1, 1], [], []>} : vector<256x384xbf16>, vector<384x128xbf16>, vector<256x128xf32> -> vector<256x128xf32>
      %102 = arith.addf %94, %101 : vector<256x128xf32>
      %103 = vector.broadcast %77 : vector<1x128xf32> to vector<256x128xf32>
      %104 = arith.mulf %102, %103 : vector<256x128xf32>
      %105 = vector.broadcast %78 : vector<1x128xf32> to vector<256x128xf32>
      %106 = arith.addf %104, %105 : vector<256x128xf32>
      %cst_69 = arith.constant 0.000000e+00 : f32
      %107 = vector.broadcast %cst_69 : f32 to vector<256x128xf32>
      %108 = arith.maximumf %106, %107 : vector<256x128xf32>
      %109 = vector.shape_cast %108 : vector<256x128xf32> to vector<16x16x128xf32>
      %c1_i32_70 = arith.constant 1 : i32
      %110 = tpu.dynamic_rotate %109 by %c1_i32_70 dim 1 : vector<16x16x128xf32>, i32 -> vector<16x16x128xf32>
      %111 = vector.broadcast %4 : vector<1x16x1xf32> to vector<16x16x128xf32>
      %112 = arith.mulf %110, %111 : vector<16x16x128xf32>
      %c15_i32_71 = arith.constant 15 : i32
      %113 = tpu.dynamic_rotate %109 by %c15_i32_71 dim 1 : vector<16x16x128xf32>, i32 -> vector<16x16x128xf32>
      %114 = vector.broadcast %8 : vector<1x16x1xf32> to vector<16x16x128xf32>
      %115 = arith.mulf %113, %114 : vector<16x16x128xf32>
      %116 = arith.truncf %112 : vector<16x16x128xf32> to vector<16x16x128xbf16>
      %c1_i32_72 = arith.constant 1 : i32
      %117 = arith.addi %80, %c1_i32_72 : i32
      %118 = arith.index_cast %117 : i32 to index
      %c0_73 = arith.constant 0 : index
      %c0_74 = arith.constant 0 : index
      %119 = vector.load %arg9[%118, %c0_73, %c0_74] : memref<18x16x384xbf16, #tpu.memory_space<vmem>>, vector<16x16x128xbf16>
      tpu.vector_store %arg9[%118, %c0_73, %c0_74], %116 {strides = array<i32>} : memref<18x16x384xbf16, #tpu.memory_space<vmem>>, vector<16x16x128xbf16>,
      %120 = arith.truncf %109 : vector<16x16x128xf32> to vector<16x16x128xbf16>
      %c1_i32_75 = arith.constant 1 : i32
      %121 = arith.addi %80, %c1_i32_75 : i32
      %122 = arith.index_cast %121 : i32 to index
      %c0_76 = arith.constant 0 : index
      %c128_77 = arith.constant 128 : index
      %123 = vector.load %arg9[%122, %c0_76, %c128_77] : memref<18x16x384xbf16, #tpu.memory_space<vmem>>, vector<16x16x128xbf16>
      tpu.vector_store %arg9[%122, %c0_76, %c128_77], %120 {strides = array<i32>} : memref<18x16x384xbf16, #tpu.memory_space<vmem>>, vector<16x16x128xbf16>,
      %124 = arith.truncf %115 : vector<16x16x128xf32> to vector<16x16x128xbf16>
      %c1_i32_78 = arith.constant 1 : i32
      %125 = arith.addi %80, %c1_i32_78 : i32
      %126 = arith.index_cast %125 : i32 to index
      %c0_79 = arith.constant 0 : index
      %c256_80 = arith.constant 256 : index
      %127 = vector.load %arg9[%126, %c0_79, %c256_80] : memref<18x16x384xbf16, #tpu.memory_space<vmem>>, vector<16x16x128xbf16>
      tpu.vector_store %arg9[%126, %c0_79, %c256_80], %124 {strides = array<i32>} : memref<18x16x384xbf16, #tpu.memory_space<vmem>>, vector<16x16x128xbf16>,
      %c1_i32_81 = arith.constant 1 : i32
    } else {
    }
    %c0 = arith.constant 0 : index
    %c0_4 = arith.constant 0 : index
    %15 = vector.load %arg6[%c0, %c0_4] : memref<2x128xf32, #tpu.memory_space<vmem>>, vector<1x128xf32>
    %c1 = arith.constant 1 : index
    %c0_5 = arith.constant 0 : index
    %16 = vector.load %arg6[%c1, %c0_5] : memref<2x128xf32, #tpu.memory_space<vmem>>, vector<1x128xf32>
    %c0_i32_6 = arith.constant 0 : i32
    %c16_i32 = arith.constant 16 : i32
    %17 = arith.muli %c0_i32_6, %c16_i32 : i32
    %18 = tpu.assume_multiple %17, 16 : i32
    %19 = arith.index_cast %18 : i32 to index
    %c0_7 = arith.constant 0 : index
    %c0_8 = arith.constant 0 : index
    %20 = vector.load %arg9[%19, %c0_7, %c0_8] : memref<18x16x384xbf16, #tpu.memory_space<vmem>>, vector<16x16x384xbf16>
    %21 = vector.shape_cast %20 : vector<16x16x384xbf16> to vector<256x384xbf16>
    %c0_9 = arith.constant 0 : index
    %c0_10 = arith.constant 0 : index
    %c0_11 = arith.constant 0 : index
    %22 = vector.load %arg4[%c0_9, %c0_10, %c0_11] : memref<3x384x128xbf16, #tpu.memory_space<vmem>>, vector<1x384x128xbf16>
    %23 = vector.shape_cast %22 : vector<1x384x128xbf16> to vector<384x128xbf16>
    %cst = arith.constant dense<0.000000e+00> : vector<256x128xf32>
    %24 = tpu.matmul %21, %23, %cst {dimension_numbers = #tpu.dot_dimension_numbers<[1], [0], [0], [1], [0, 0, 1, 1], [], []>} : vector<256x384xbf16>, vector<384x128xbf16>, vector<256x128xf32> -> vector<256x128xf32>
    %c1_i32 = arith.constant 1 : i32
    %25 = arith.addi %18, %c1_i32 : i32
    %26 = arith.index_cast %25 : i32 to index
    %c0_12 = arith.constant 0 : index
    %c0_13 = arith.constant 0 : index
    %27 = vector.load %arg9[%26, %c0_12, %c0_13] : memref<18x16x384xbf16, #tpu.memory_space<vmem>>, vector<16x16x384xbf16>
    %28 = vector.shape_cast %27 : vector<16x16x384xbf16> to vector<256x384xbf16>
    %c1_14 = arith.constant 1 : index
    %c0_15 = arith.constant 0 : index
    %c0_16 = arith.constant 0 : index
    %29 = vector.load %arg4[%c1_14, %c0_15, %c0_16] : memref<3x384x128xbf16, #tpu.memory_space<vmem>>, vector<1x384x128xbf16>
    %30 = vector.shape_cast %29 : vector<1x384x128xbf16> to vector<384x128xbf16>
    %cst_17 = arith.constant dense<0.000000e+00> : vector<256x128xf32>
    %31 = tpu.matmul %28, %30, %cst_17 {dimension_numbers = #tpu.dot_dimension_numbers<[1], [0], [0], [1], [0, 0, 1, 1], [], []>} : vector<256x384xbf16>, vector<384x128xbf16>, vector<256x128xf32> -> vector<256x128xf32>
    %32 = arith.addf %24, %31 : vector<256x128xf32>
    %c2_i32 = arith.constant 2 : i32
    %33 = arith.addi %18, %c2_i32 : i32
    %34 = arith.index_cast %33 : i32 to index
    %c0_18 = arith.constant 0 : index
    %c0_19 = arith.constant 0 : index
    %35 = vector.load %arg9[%34, %c0_18, %c0_19] : memref<18x16x384xbf16, #tpu.memory_space<vmem>>, vector<16x16x384xbf16>
    %36 = vector.shape_cast %35 : vector<16x16x384xbf16> to vector<256x384xbf16>
    %c2 = arith.constant 2 : index
    %c0_20 = arith.constant 0 : index
    %c0_21 = arith.constant 0 : index
    %37 = vector.load %arg4[%c2, %c0_20, %c0_21] : memref<3x384x128xbf16, #tpu.memory_space<vmem>>, vector<1x384x128xbf16>
    %38 = vector.shape_cast %37 : vector<1x384x128xbf16> to vector<384x128xbf16>
    %cst_22 = arith.constant dense<0.000000e+00> : vector<256x128xf32>
    %39 = tpu.matmul %36, %38, %cst_22 {dimension_numbers = #tpu.dot_dimension_numbers<[1], [0], [0], [1], [0, 0, 1, 1], [], []>} : vector<256x384xbf16>, vector<384x128xbf16>, vector<256x128xf32> -> vector<256x128xf32>
    %40 = arith.addf %32, %39 : vector<256x128xf32>
    %41 = vector.broadcast %15 : vector<1x128xf32> to vector<256x128xf32>
    %42 = arith.mulf %40, %41 : vector<256x128xf32>
    %43 = vector.broadcast %16 : vector<1x128xf32> to vector<256x128xf32>
    %44 = arith.addf %42, %43 : vector<256x128xf32>
    %cst_23 = arith.constant 0.000000e+00 : f32
    %45 = vector.broadcast %cst_23 : f32 to vector<256x128xf32>
    %46 = arith.maximumf %44, %45 : vector<256x128xf32>
    %47 = vector.shape_cast %46 : vector<256x128xf32> to vector<16x16x128xf32>
    %48 = arith.truncf %47 : vector<16x16x128xf32> to vector<16x16x128xbf16>
    %c0_24 = arith.constant 0 : index
    %49 = arith.index_cast %18 : i32 to index
    %c0_25 = arith.constant 0 : index
    %c0_26 = arith.constant 0 : index
    %50 = vector.load %arg7[%c0_24, %49, %c0_25, %c0_26] : memref<1x16x16x128xbf16, #tpu.memory_space<vmem>>, vector<1x16x16x128xbf16>
    %51 = vector.shape_cast %50 : vector<1x16x16x128xbf16> to vector<16x16x128xbf16>
    %52 = vector.shape_cast %48 : vector<16x16x128xbf16> to vector<1x16x16x128xbf16>
    tpu.vector_store %arg7[%c0_24, %49, %c0_25, %c0_26], %52 {strides = array<i32>} : memref<1x16x16x128xbf16, #tpu.memory_space<vmem>>, vector<1x16x16x128xbf16>,
    %c1_i32_27 = arith.constant 1 : i32
    return
  }
  func.func @transform_0(%arg0: i32, %arg1: i32) -> (i32, i32, i32, i32) {
    %c0_i32 = arith.constant 0 : i32
    %c0_i32_0 = arith.constant 0 : i32
    %c0_i32_1 = arith.constant 0 : i32
    %c0_i32_2 = arith.constant 0 : i32
    return %arg0, %c0_i32, %c0_i32_0, %c0_i32_1 : i32, i32, i32, i32
  }
  func.func @transform_1(%arg0: i32, %arg1: i32) -> (i32, i32, i32) {
    %c0_i32 = arith.constant 0 : i32
    %c0_i32_0 = arith.constant 0 : i32
    %c0_i32_1 = arith.constant 0 : i32
    %c0_i32_2 = arith.constant 0 : i32
    return %c0_i32, %c0_i32_0, %c0_i32_1 : i32, i32, i32
  }
  func.func @transform_2(%arg0: i32, %arg1: i32) -> (i32, i32, i32) {
    %c0_i32 = arith.constant 0 : i32
    %c0_i32_0 = arith.constant 0 : i32
    %c0_i32_1 = arith.constant 0 : i32
    return %c0_i32, %c0_i32_0, %arg1 : i32, i32, i32
  }
  func.func @transform_3(%arg0: i32, %arg1: i32) -> (i32, i32) {
    %c0_i32 = arith.constant 0 : i32
    %c0_i32_0 = arith.constant 0 : i32
    %c0_i32_1 = arith.constant 0 : i32
    return %c0_i32, %c0_i32_0 : i32, i32
  }
  func.func @transform_4(%arg0: i32, %arg1: i32) -> (i32, i32) {
    %c0_i32 = arith.constant 0 : i32
    %c0_i32_0 = arith.constant 0 : i32
    return %c0_i32, %arg1 : i32, i32
  }
  func.func @transform_5(%arg0: i32, %arg1: i32) -> (i32, i32, i32, i32) {
    %c0_i32 = arith.constant 0 : i32
    %c0_i32_0 = arith.constant 0 : i32
    %c0_i32_1 = arith.constant 0 : i32
    return %arg0, %c0_i32, %c0_i32_0, %arg1 : i32, i32, i32, i32
  }
}

</mosaic_0001>

<bundles_post_ra>
// kernel: tpu_custom_call.1
= control target key start
LH: loop header
LB: loop body
LE: loop exit
PB: predicated region body
PF: predicated region fallthrough
CT: control target
= control target key end

     0   :  { %10 = vsyncpa [#allocation5], 0  ;;  %s9480_s0 = inlined_call_operand.hbm [shape: bf16[2,16,16,128], index: 0, kind: input, shape index: {}]   ;;  %s9481_s1 = inlined_call_operand.hbm [shape: bf16[3,384,128], index: 1, kind: input, shape index: {}]   ;;  %s9482_s2 = inlined_call_operand.hbm [shape: bf16[3,384,128], index: 2, kind: input, shape index: {}]   ;;  %s9483_s3 = inlined_call_operand.vmem [shape: f32[2,128], index: 3, kind: input, shape index: {}]   ;;  %s9484_s4 = inlined_call_operand.vmem [shape: f32[2,128], index: 4, kind: input, shape index: {}]   ;;  %s9485_s5 = inlined_call_operand.hbm [shape: bf16[2,16,16,128], index: 5, kind: output, shape index: {}]  }
   0x1   :  { %12 = vsyncpa [#allocation5 + $0x1], 0 }
   0x2   :  { %13 = vsyncpa [#allocation8], 0 }
   0x3   :  { %14 = vsyncpa [#allocation6], 0 }
   0x4   :  { %16 = vsyncpa [#allocation6 + $0x1], 0  ;;  %s7299_s18 = smov 0   ;;  %s7301_s19 = smov 0  }
   0x5   :  { %s7303_s20 = smov 0   ;;  %s7305_s21 = smov 0  }
   0x6   :  { %s7307_s22 = smov 0   ;;  %s7309_s23 = smov 0  }
   0x7 LB: > { %s5047_s24 = sadd.s32 4294967295, %s7257_s23   ;;  %s5048_s25 = sadd.s32 4294967294, %s7257_s23   ;;  %s7257_s23 = sphi %s7309_s23, %s22_s23   ;;  %s7253_s22 = sphi %s7307_s22, %s9651_s22   ;;  %s7249_s21 = sphi %s7305_s21, %s9650_s21   ;;  %s7245_s20 = sphi %s7303_s20, %s9649_s20   ;;  %s7241_s19 = sphi %s7301_s19, %s9648_s19   ;;  %s7237_s18 = sphi %s7299_s18, %s9647_s18  }
   0x8   : > { %p54_p0 = scmp.ne.s32.totalorder %s7241_s19, %s7237_s18  ;;  %p7333_p1 = scmp.eq.s32.totalorder %s5047_s24, 0 }
   0x9   : > { %p7337_p2 = scmp.eq.s32.totalorder %s5047_s24, 1  ;;  %p180_p3 = scmp.eq.s32.totalorder %s5048_s25, 1 }
   0xa   : > { %s9533_s26 = scalar_select %p7333_p1, 1, 0 }
   0xb   : > { %p7343_p4 = por %p7333_p1, %p54_p0  ;;  %p5049_p5 = scmp.ge.s32.totalorder %s7257_s23, 1 }
   0xc   : > { %p7348_p6 = por %p180_p3, %p54_p0  ;;  %p187_p7 = scmp.lt.s32.totalorder %s7257_s23, 3 }
   0xd   : > { %s9535_s28 = scalar_select %p7343_p4, 1, 0 }
   0xe   : > { %s9536_s29 = scalar_select %p7348_p6, 1, 0 }
   0xf   : > { %p7353_p8 = pnand %p5049_p5, %p187_p7  ;;  %s7259_s6 = smov [#allocation7]  }
  0x10   : > { %s199_s7 = sshll.u32 %s7259_s6, 4  ;;  %s7260_s9 = smov [#allocation9]   ;;  %s7357_s7 = int_to_ptr.vmem [resolvable:$true] %s199_s7 }
  0x11   : > { %p6830_p9 = pneg %p7353_p8  ;;  %s214_s10 = sshll.u32 %s7260_s9, 4  ;;  %s7368_s10 = int_to_ptr.vmem [resolvable:$true] %s214_s10 }
  0x12   : > { %s7085_s13 = scalar_lea.hbm %s9481_s1, 9216 }
  0x13   : > { %p7364_p11 = pnand %p6830_p9, %p7333_p1  ;;  %p7086_p12 = scmp.ne.s32.totalorder %s9481_s1, %s7085_s13 }
  0x14   : > { %p7092_p5 = scmp.lt.u32.totalorder %s7085_s13, %s9481_s1 }
  0x15   : > { %p7087_p13 = pneg %p7364_p11 }
  0x17   : > { %p7088_p0 = pnand %p7087_p13, %p7086_p12 }
  0x19   : > { %p7089_p3 = pneg %p7088_p0 }
  0x1b   : > { %p7094_p7 = pnand %p7092_p5, %p7089_p3 }
  0x1d   : > { %7097 = shalt.err (!%p7094_p7)
}
  0x1e   : > { %s7098_s24 = scalar_lea.vmem %s7357_s7, 9216  ;;  %p7106_p1 = scmp.lt.s32.totalorder %s7357_s7, %s7357_s7 }
  0x1f   : > { %p7099_p9 = scmp.ne.s32.totalorder %s7357_s7, %s7098_s24  ;;  %p7107_p12 = scmp.lt.s32.totalorder %s7098_s24, %s7098_s24 }
  0x21   : > { %p7101_p10 = pnand %p7099_p9, %p7087_p13  ;;  %p7108_p0 = por %p7107_p12, %p7106_p1 }
  0x23   : > { %p7102_p6 = pneg %p7101_p10 }
  0x25   : > { %p7109_p4 = pnand %p7108_p0, %p7102_p6 }
  0x27   : > { %7112 = shalt.err (!%p7109_p4)
}
  0x28   : > { %s9489_s25 = smov 64   ;;  %s7262_s6 = smov 4  }
  0x29   : > { %6833 = dma.hbm_to_vmem [thread:$0]  (!%p7364_p11), %s9481_s1, 9216, %s7357_s7, [#allocation8], %s9489_s25, %s9489_s25, %s7262_s6  }
  0x2a   : > { %s7113_s14 = scalar_lea.hbm %s9482_s2, 9216 }
  0x2b   : > { %p7114_p1 = scmp.ne.s32.totalorder %s9482_s2, %s7113_s14  ;;  %p7120_p10 = scmp.lt.u32.totalorder %s7113_s14, %s9482_s2 }
  0x2d   : > { %p7116_p4 = pnand %p7114_p1, %p7087_p13 }
  0x2f   : > { %p7117_p6 = pneg %p7116_p4 }
  0x31   : > { %p7122_p3 = pnand %p7120_p10, %p7117_p6 }
  0x33   : > { %7125 = shalt.err (!%p7122_p3)
}
  0x34   : > { %s7126_s7 = scalar_lea.vmem %s7368_s10, 9216  ;;  %p7134_p12 = scmp.lt.s32.totalorder %s7368_s10, %s7368_s10 }
  0x35   : > { %p7127_p5 = scmp.ne.s32.totalorder %s7368_s10, %s7126_s7  ;;  %p7135_p0 = scmp.lt.s32.totalorder %s7126_s7, %s7126_s7 }
  0x37   : > { %p7129_p7 = pnand %p7127_p5, %p7087_p13  ;;  %p7136_p1 = por %p7135_p0, %p7134_p12 }
  0x39   : > { %p7130_p9 = pneg %p7129_p7 }
  0x3b   : > { %p7137_p4 = pnand %p7136_p1, %p7130_p9 }
  0x3d   : > { %7140 = shalt.err (!%p7137_p4)
}
  0x3e   : > { %6836 = dma.hbm_to_vmem [thread:$0]  (!%p7364_p11), %s9482_s2, 9216, %s7368_s10, [#allocation8], %s9489_s25, %s9489_s25, %s7262_s6  }
  0x3f   : > { %s34_s8 = sadd.s32 1, %s7253_s22  ;;  %s41_s12 = sadd.s32 1, %s7245_s20 }
  0x40   : > { %p36_p13 = scmp.ge.s32.totalorder %s34_s8, 2  ;;  %p48_p6 = scmp.ne.s32.totalorder %s7245_s20, %s7241_s19 }
  0x41   : > { %p49_p10 = scmp.eq.s32.totalorder %s7257_s23, 0  ;;  %p6847_p3 = scmp.lt.s32.totalorder %s7257_s23, 2 }
  0x42   : > { %s9653_s8 = smov (%p36_p13, %s34_s8), 0  ;;  %p7438_p7 = por %p7337_p2, %p48_p6 }
  0x43   : > { %p50_p5 = por %p49_p10, %p48_p6  ;;  %s38_s14 = ssub.s32 %s7253_s22, %s9653_s8 }
  0x44   : > { %s9539_s13 = scalar_select %p7438_p7, 1, 0 }
  0x45   : > { %s238_s15 = sand.u32 1, %s7245_s20   ;;  %p39_p9 = scmp.eq.s32.totalorder %s38_s14, 0 }
  0x46   : > { %s5054_s10 = sshll.u32 %s238_s15, 7  ;;  %s5265_s16 = sshll.u32 %s7253_s22, 11 }
  0x47   : > { %s7447_s17 = scalar_select %p39_p9, %s7245_s20, %s41_s12  }
  0x48   : > { %s7452_s9 = scalar_lea.hbm %s9480_s0, %s5265_s16  ;;  %s242_s27 = scalar_lea.vmem [#allocation4], %s5054_s10 }
  0x49   : > { %s249_s11 = sshll.u32 %s242_s27, 4  ;;  %p7456_p2 = pnand %p6847_p3, %p50_p5  ;;  %s7460_s11 = int_to_ptr.vmem [resolvable:$true] %s249_s11 }
  0x4a   : > { %s7462_s12 = scalar_lea.sflag [#allocation5], %s238_s15  ;;  %s7141_s14 = scalar_lea.hbm %s7452_s9, 2048 }
  0x4b   : > { %p7142_p11 = scmp.ne.s32.totalorder %s7452_s9, %s7141_s14  ;;  %p7143_p12 = pneg %p7456_p2 }
  0x4c   : > { %s7146_s24 = scalar_lea.hbm %s9480_s0, 4096  ;;  %p7147_p4 = scmp.lt.u32.totalorder %s7452_s9, %s9480_s0 }
  0x4d   : > { %p7144_p0 = pnand %p7143_p12, %p7142_p11  ;;  %p7148_p13 = scmp.lt.u32.totalorder %s7146_s24, %s7141_s14 }
  0x4e   : > { %p7150_p10 = scmp.lt.u32.totalorder %s7141_s14, %s7452_s9 }
  0x4f   : > { %p7145_p1 = pneg %p7144_p0  ;;  %p7149_p6 = por %p7148_p13, %p7147_p4 }
  0x51   : > { %p7151_p3 = por %p7150_p10, %p7149_p6 }
  0x53   : > { %p7152_p5 = pnand %p7151_p3, %p7145_p1 }
  0x55   : > { %7155 = shalt.err (!%p7152_p5)
}
  0x56   : > { %s7156_s15 = scalar_lea.vmem %s7460_s11, 2048  ;;  %s7263_s10 = smov [#allocation4]  }
  0x57   : > { %p7157_p9 = scmp.ne.s32.totalorder %s7460_s11, %s7156_s15  ;;  %s7161_s16 = sshll.u32 %s7263_s10, 4  ;;  %s7162_s16 = int_to_ptr.vmem [resolvable:$false] %s7161_s16 }
  0x58   : > { %s7163_s7 = scalar_lea.vmem %s7162_s16, 4096  ;;  %p7164_p7 = scmp.lt.s32.totalorder %s7460_s11, %s7162_s16 }
  0x59   : > { %p7159_p11 = pnand %p7157_p9, %p7143_p12  ;;  %p7165_p4 = scmp.lt.s32.totalorder %s7163_s7, %s7156_s15 }
  0x5b   : > { %p7160_p0 = pneg %p7159_p11  ;;  %p7166_p13 = por %p7165_p4, %p7164_p7 }
  0x5d   : > { %p7167_p6 = pnand %p7166_p13, %p7160_p0 }
  0x5f   : > { %7170 = shalt.err (!%p7167_p6)
}
  0x60   : > { %s9541_s14 = smov 64   ;;  %261 = sbr.rel (%p7353_p8) target bundleno = 1185 (0x4a1), region = 40 }
  0x61   : > { %6840 = dma.hbm_to_vmem [thread:$0]  (!%p7456_p2), %s7452_s9, 2048, %s7460_s11, %s7462_s12, %s9541_s14, %s9541_s14, %s7262_s6  }
  0x67   : > { %s7496_s24 = sand.u32 1, %s7241_s19   ;;  %p9542_p7 = scmp.ne.s32.totalorder %s9535_s28, 0 }
  0x68   : > { %s5058_s27 = sshll.u32 %s7496_s24, 7  ;;  %s264_s15 = scalar_lea.sflag [#allocation5], %s7496_s24 }
  0x69   : > { %s7502_s25 = scalar_lea.vmem [#allocation4], %s5058_s27 }
  0x6a   : > { %7224 = dma.done.wait (%p9542_p7), %s264_s15, 2048  }
  0x6b   : > { %7226 = vsyncadd (%p9542_p7), %s264_s15, 4294965248  ;;  %p9543_p2 = scmp.ne.s32.totalorder %s9533_s26, 0 }
  0x6d   : > { %7228 = dma.done.wait (%p9543_p2), [#allocation8], 18432  }
  0x6e   : > { %7230 = vsyncadd (%p9543_p2), [#allocation8], 4294948864  ;;  %v311_v0 = vlaneseq  ;;  %v9491_v1 = vmov 0   ;;  %v6907_v4 = vld [vmem:[#allocation7 + $0x100] sm:$0xff]   ;;  %v7265_v5 = vmov 0.0   ;;  %v6911_v10 = vld [vmem:[#allocation7 + $0x108] sm:$0xff]  }
  0x6f   : > { %1625 = vmatprep.mubr.bf16.mxu1 %v9491_v1  ;;  %v6908_v7 = vld [vmem:[#allocation7 + $0xc0] sm:$0xff]   ;;  %5394 = vmatprep.subr.bf16.mxu0 %v6907_v4  ;;  %v6912_v11 = vld [vmem:[#allocation7 + $0xc8] sm:$0xff]   ;;  %v6915_v14 = vld [vmem:[#allocation7 + $0x110] sm:$0xff]   ;;  %p9644_p12 = scmp.ne.s32.totalorder %s9539_s13, 0  ;;  %s7266_s11 = smov [#allocation10]  }
  0x70   : > { %v7513_v2 = vshrl.u32 %v311_v0, 7  ;;  %v6909_v8 = vld [vmem:[#allocation7 + $0x40] sm:$0xff]   ;;  %5395 = vmatpush3.bf16.msra.mxu0 %v6908_v7  ;;  %v6913_v12 = vld [vmem:[#allocation7 + $0x48] sm:$0xff]   ;;  %v6916_v15 = vld [vmem:[#allocation7 + $0xd0] sm:$0xff]   ;;  %s7175_s12 = sshll.u32 %s7266_s11, 4  ;;  %s7176_s12 = int_to_ptr.vmem [resolvable:$false] %s7175_s12 }
  0x71   : > { %v6910_v9 = vld [vmem:[#allocation7] sm:$0xff]   ;;  %5530 = vmatprep.subr.bf16.mxu1 %v6909_v8  ;;  %5396 = vmatprep.subr.bf16.mxu0 %v6911_v10  ;;  %v6914_v13 = vld [vmem:[#allocation7 + $0x8] sm:$0xff]   ;;  %v6917_v16 = vld [vmem:[#allocation7 + $0x50] sm:$0xff]   ;;  %s7177_s10 = scalar_lea.vmem %s7176_s12, 4096 }
  0x72   : > { %9544 = vst [vmem:[#allocation14_spill] sm:$0xff] %v7513_v2  ;;  %v313_v3 = vadd.s32 8, %v7513_v2  ;;  %5531 = vmatpush3.bf16.msra.mxu1 %v6910_v9  ;;  %v6918_v17 = vld [vmem:[#allocation7 + $0x10] sm:$0xff]   ;;  %v6919_v18 = vld [vmem:[#allocation7 + $0x118] sm:$0xff]   ;;  %v6923_v22 = vld [vmem:[#allocation7 + $0x120] sm:$0xff]   ;;  %vm314_vm1 = vcmp.gt.s32.totalorder %v7513_v2, 0 }
  0x73   : > { %5532 = vmatprep.subr.bf16.mxu1 %v6913_v12  ;;  %v6920_v19 = vld [vmem:[#allocation7 + $0xd8] sm:$0xff]   ;;  %v6924_v23 = vld [vmem:[#allocation7 + $0xe0] sm:$0xff]   ;;  %v6927_v26 = vld [vmem:[#allocation7 + $0x128] sm:$0xff]   ;;  %vm443_vm2 = vcmp.lt.s32.totalorder %v7513_v2, 1  ;;  %v7537_v47 = vsel %vm314_vm1, 1.0, %v7265_v5  ;;  %vm540_vm3 = vcmp.lt.s32.totalorder %v7513_v2, 7 }
  0x74   : > { %vm321_vm0 = vcmp.lt.s32.totalorder %v313_v3, 15  ;;  %5397 = vmatpush3.bf16.msra.mxu0 %v6912_v11  ;;  %v6921_v20 = vld [vmem:[#allocation7 + $0x58] sm:$0xff]   ;;  %v6925_v24 = vld [vmem:[#allocation7 + $0x60] sm:$0xff]   ;;  %v6928_v27 = vld [vmem:[#allocation7 + $0xe8] sm:$0xff]   ;;  %9547 = vst [vmem:[#allocation17_spill] sm:$0xff] %v7537_v47 }
  0x75   : > { %v7517_v6 = vsel %vm321_vm0, 1.0, %v7265_v5  ;;  %5398 = vmatprep.subr.bf16.mxu0 %v6915_v14  ;;  %v6922_v21 = vld [vmem:[#allocation7 + $0x18] sm:$0xff]   ;;  %v6926_v25 = vld [vmem:[#allocation7 + $0x20] sm:$0xff]   ;;  %v6929_v28 = vld [vmem:[#allocation7 + $0x68] sm:$0xff]  }
  0x76   : > { %9545 = vst [vmem:[#allocation15_spill] sm:$0xff] %v7517_v6  ;;  %5533 = vmatpush3.bf16.msra.mxu1 %v6914_v13  ;;  %v6930_v29 = vld [vmem:[#allocation7 + $0x28] sm:$0xff]   ;;  %v6931_v30 = vld [vmem:[#allocation7 + $0x130] sm:$0xff]   ;;  %v6935_v34 = vld [vmem:[#allocation7 + $0x138] sm:$0xff]  }
  0x77   : > { %5534 = vmatprep.subr.bf16.mxu1 %v6917_v16  ;;  %v6932_v31 = vld [vmem:[#allocation7 + $0xf0] sm:$0xff]   ;;  %v6936_v35 = vld [vmem:[#allocation7 + $0xf8] sm:$0xff]   ;;  %v7520_v38 = vld [vmem:[%s7502_s25] sm:$0xff]  }
  0x78   : > { %5399 = vmatpush3.bf16.msra.mxu0 %v6916_v15  ;;  %v6933_v32 = vld [vmem:[#allocation7 + $0x70] sm:$0xff]   ;;  %v6937_v36 = vld [vmem:[#allocation7 + $0x78] sm:$0xff]   ;;  %v379_v39 = vunpack.c.l.bf16 %v7520_v38  ;;  %v380_v40 = vunpack.c.h.bf16 %v7520_v38  ;;  %v6940_v41 = vld [vmem:[#allocation7 + $0x140] sm:$0xff]   ;;  %1159 = vmatprep.mubr.bf16.mxu0 %v7520_v38 }
  0x79   : > { %5400 = vmatprep.subr.bf16.mxu0 %v6919_v18  ;;  %v6934_v33 = vld [vmem:[#allocation7 + $0x30] sm:$0xff]   ;;  %v6938_v37 = vld [vmem:[#allocation7 + $0x38] sm:$0xff]   ;;  %v7526_v42 = vld [vmem:[%s7502_s25 + $0x8] sm:$0xff]  }
  0x7a   : > { %5535 = vmatpush3.bf16.msra.mxu1 %v6918_v17  ;;  %9546 = vst [vmem:[#allocation16_spill] sm:$0xff] %v7526_v42  ;;  %v381_v43 = vunpack.c.l.bf16 %v7526_v42  ;;  %v382_v44 = vunpack.c.h.bf16 %v7526_v42  ;;  %v411_v45 = vrot.slane %v379_v39, 7  ;;  %v427_v46 = vrot.slane %v380_v40, 7  ;;  %v7541_v48 = vld [vmem:[%s7502_s25 + $0x10] sm:$0xff]   ;;  %v6943_v62 = vld [vmem:[#allocation7 + $0x148] sm:$0xff]   ;;  %v6953_v63 = vld [vmem:[#allocation7 + $0x80] sm:$0xff]  }
  0x7b   : > { %5536 = vmatprep.subr.bf16.mxu1 %v6921_v20  ;;  %9548 = vst [vmem:[#allocation18_spill] sm:$0xff] %v7541_v48  ;;  %v383_v59 = vunpack.c.l.bf16 %v7541_v48  ;;  %v384_v60 = vunpack.c.h.bf16 %v7541_v48  ;;  %v7567_v7 = vld [vmem:[%s7502_s25 + $0x18] sm:$0xff]   ;;  %v6946_v8 = vld [vmem:[#allocation7 + $0x150] sm:$0xff]   ;;  %v6957_v9 = vld [vmem:[#allocation7 + $0x88] sm:$0xff]  }
  0x7c   : > { %5401 = vmatpush3.bf16.msra.mxu0 %v6920_v19  ;;  %v412_v49 = vrot.slane %v381_v43, 7  ;;  %v428_v50 = vrot.slane %v382_v44, 7  ;;  %v509_v51 = vrot.slane %v381_v43, 1  ;;  %v525_v52 = vrot.slane %v382_v44, 1  ;;  %9549 = vst [vmem:[#allocation19_spill] sm:$0xff] %v7567_v7  ;;  %v7577_v14 = vld [vmem:[%s7502_s25 + $0x20] sm:$0xff]  }
  0x7d   : > { %5402 = vmatprep.subr.bf16.mxu0 %v6923_v22  ;;  %v444_v53 = vsel %vm443_vm2, %v411_v45, %v427_v46  ;;  %v460_v54 = vsel %vm443_vm2, %v427_v46, %v411_v45  ;;  %v413_v4 = vrot.slane %v383_v59, 7  ;;  %v429_v5 = vrot.slane %v384_v60, 7  ;;  %9551 = vst [vmem:[#allocation21_spill] sm:$0xff] %v7577_v14  ;;  %v6949_v15 = vld [vmem:[#allocation7 + $0x158] sm:$0xff]   ;;  %v6961_v16 = vld [vmem:[#allocation7 + $0x90] sm:$0xff]   ;;  %v6966_v43 = vld [vmem:[#allocation7 + $0xa0] sm:$0xff]  }
  0x7e   : > { %5537 = vmatpush3.bf16.msra.mxu1 %v6922_v21  ;;  %v476_v55 = vmul.f32 %v7537_v47, %v460_v54  ;;  %v7552_v56 = vsel %vm540_vm3, %v509_v51, %v525_v52  ;;  %v7556_v57 = vsel %vm540_vm3, %v525_v52, %v509_v51  ;;  %v461_v58 = vsel %vm443_vm2, %v428_v50, %v412_v49  ;;  %v6963_v22 = vld [vmem:[#allocation7 + $0x98] sm:$0xff]  }
  0x7f   : > { %5538 = vmatprep.subr.bf16.mxu1 %v6925_v24  ;;  %v478_v0 = vmul.f32 %v7537_v47, %v461_v58  ;;  %v445_v3 = vsel %vm443_vm2, %v412_v49, %v428_v50  ;;  %v385_v11 = vunpack.c.l.bf16 %v7567_v7  ;;  %v462_v12 = vsel %vm443_vm2, %v429_v5, %v413_v4  ;;  %v6952_v24 = vld [vmem:[#allocation7 + $0x160] sm:$0xff]   ;;  %v7629_v50 = vld [vmem:[%s7502_s25 + $0x48] sm:$0xff]  }
  0x80   : > { %5403 = vmatpush3.bf16.msra.mxu0 %v6924_v23  ;;  %v605_v61 = vpack.c.bf16 %v444_v53, %v476_v55  ;;  %v386_v13 = vunpack.c.h.bf16 %v7567_v7  ;;  %v480_v17 = vmul.f32 %v7537_v47, %v462_v12  ;;  %v446_v19 = vsel %vm443_vm2, %v413_v4, %v429_v5  ;;  %v6967_v55 = vld [vmem:[#allocation7 + $0xa8] sm:$0xff]   ;;  %v7656_v5 = vld [vmem:[%s7502_s25 + $0x50] sm:$0xff]  }
  0x81   : > { %5404 = vmatprep.subr.bf16.mxu0 %v6927_v26  ;;  %v7570_v10 = vpack.c.bf16 %v445_v3, %v478_v0  ;;  %v414_v18 = vrot.slane %v385_v11, 7  ;;  %v387_v21 = vunpack.c.l.bf16 %v7577_v14  ;;  %v388_v23 = vunpack.c.h.bf16 %v7577_v14 }
  0x82   : > { %5539 = vmatpush3.bf16.msra.mxu1 %v6926_v25  ;;  %v430_v20 = vrot.slane %v386_v13, 7  ;;  %v7589_v25 = vld [vmem:[%s7502_s25 + $0x28] sm:$0xff]   ;;  %v7593_v26 = vrot.slane %v379_v39, 1  ;;  %v7622_v44 = vrot.slane %v386_v13, 1  ;;  %v6965_v13 = vld [vmem:[#allocation7 + $0x178] sm:$0xff]  }
  0x83   : > { %5540 = vmatprep.subr.bf16.mxu1 %v6929_v28  ;;  %9550 = vst [vmem:[#allocation20_spill] sm:$0xff] %v7570_v10  ;;  %v7599_v28 = vrot.slane %v383_v59, 1  ;;  %v6956_v39 = vld [vmem:[#allocation7 + $0x168] sm:$0xff]   ;;  %v7625_v46 = vrot.slane %v387_v21, 1  ;;  %v7634_v52 = vrot.slane %v388_v23, 1 }
  0x84   : > { %5405 = vmatpush3.bf16.msra.mxu0 %v6928_v27  ;;  %v7597_v27 = vrot.slane %v380_v40, 1  ;;  %v7618_v40 = vrot.slane %v385_v11, 1  ;;  %v447_v51 = vsel %vm443_vm2, %v414_v18, %v430_v20 }
  0x85   : > { %5406 = vmatprep.subr.bf16.mxu0 %v6931_v30  ;;  %v7604_v30 = vld [vmem:[%s7502_s25 + $0x30] sm:$0xff]  }
  0x86   : > { %5541 = vmatpush3.bf16.msra.mxu1 %v6930_v29  ;;  %v7601_v29 = vpack.c.bf16 %v446_v19, %v480_v17  ;;  %v392_v49 = vunpack.c.h.bf16 %v7604_v30  ;;  %v397_v17 = vunpack.c.l.bf16 %v7629_v50 }
  0x87   : > { %5542 = vmatprep.subr.bf16.mxu1 %v6933_v32  ;;  %v463_v32 = vsel %vm443_vm2, %v430_v20, %v414_v18  ;;  %v398_v20 = vunpack.c.h.bf16 %v7629_v50 }
  0x88   : > { %5407 = vmatpush3.bf16.msra.mxu0 %v6932_v31  ;;  %9552 = vst [vmem:[#allocation22_spill] sm:$0xff] %v7601_v29  ;;  %v7606_v31 = vrot.slane %v384_v60, 1  ;;  %v482_v45 = vmul.f32 %v7537_v47, %v463_v32  ;;  %v7662_v11 = vrot.slane %v392_v49, 1 }
  0x89   : > { %5408 = vmatprep.subr.bf16.mxu0 %v6935_v34  ;;  %v7611_v34 = vld [vmem:[%s7502_s25 + $0x38] sm:$0xff]  }
  0x8a   : > { %5543 = vmatpush3.bf16.msra.mxu1 %v6934_v33  ;;  %v415_v33 = vrot.slane %v387_v21, 7  ;;  %v393_v53 = vunpack.c.l.bf16 %v7611_v34  ;;  %v394_v54 = vunpack.c.h.bf16 %v7611_v34  ;;  %v7675_v21 = vld [vmem:[%s7502_s25 + $0x58] sm:$0xff]  }
  0x8b   : > { %5544 = vmatprep.subr.bf16.mxu1 %v6937_v36  ;;  %v389_v36 = vunpack.c.l.bf16 %v7589_v25 }
  0x8c   : > { %5409 = vmatpush3.bf16.msra.mxu0 %v6936_v35  ;;  %v431_v35 = vrot.slane %v388_v23, 7  ;;  %v7671_v19 = vrot.slane %v393_v53, 1 }
  0x8d   : > { %6210 = vmatprep.subr.bf16.mxu0 %v6940_v41  ;;  %v7641_v59 = vrot.slane %v389_v36, 7 }
  0x8e   : > { %5545 = vmatpush3.bf16.msra.mxu1 %v6938_v37  ;;  %v390_v37 = vunpack.c.h.bf16 %v7589_v25  ;;  %v464_v58 = vsel %vm443_vm2, %v431_v35, %v415_v33  ;;  %v448_v23 = vsel %vm443_vm2, %v415_v33, %v431_v35  ;;  %v6970_v33 = vld [vmem:[#allocation7 + $0xb8] sm:$0xff]   ;;  %v576_v35 = vmul.f32 %v7517_v6, %v7556_v57 }
  0x8f   : > { %1160 = vmatmul.mubr.bf16.vlgmr.msra.gmra.mrb[0].mxu0 %v605_v61  ;;  %6258 = vmatprep.subr.bf16.mxu1 %v6953_v63  ;;  %v484_v18 = vmul.f32 %v7537_v47, %v464_v58  ;;  %v7711_v57 = vrot.slane %v397_v17, 1 }
  0x90   : > { %6211 = vmatpush3.bf16.msra.mxu0 %v6940_v41  ;;  %1167 = vmatprep.mubr.bf16.mxu0 %v7526_v42  ;;  %v391_v41 = vunpack.c.l.bf16 %v7604_v30  ;;  %v7643_v60 = vrot.slane %v390_v37, 7 }
  0x91   : > { %1626 = vmatmul.mubr.bf16.vlgmr.msra.gmra.mrb[0].mxu1 %v9491_v1  ;;  %6212 = vmatprep.subr.bf16.mxu0 %v6943_v62  ;;  %v7725_v1 = vld [vmem:[%s7502_s25 + $0x78] sm:$0xff]  }
  0x92   : > { %1633 = vmatprep.mubr.bf16.mxu1 %v7520_v38  ;;  %6259 = vmatpush3.bf16.msra.mxu1 %v6953_v63  ;;  %v7616_v38 = vld [vmem:[%s7502_s25 + $0x40] sm:$0xff]   ;;  %v7648_v63 = vrot.slane %v390_v37, 1  ;;  %v7650_v0 = vrot.slane %v391_v41, 7  ;;  %v7652_v3 = vrot.slane %v391_v41, 1 }
  0x93   : > { %6260 = vmatprep.subr.bf16.mxu1 %v6957_v9  ;;  %v395_v4 = vunpack.c.l.bf16 %v7616_v38  ;;  %v396_v12 = vunpack.c.h.bf16 %v7616_v38  ;;  %v7685_v37 = vld [vmem:[%s7502_s25 + $0x60] sm:$0xff]  }
  0x94   : > { %6213 = vmatpush3.bf16.msra.mxu0 %v6943_v62  ;;  %v6960_v62 = vld [vmem:[#allocation7 + $0x170] sm:$0xff]  }
  0x95   : > { %6214 = vmatprep.subr.bf16.mxu0 %v6946_v8  ;;  %v7681_v32 = vrot.slane %v395_v4, 7  ;;  %v7690_v41 = vrot.slane %v395_v4, 1  ;;  %v7715_v4 = vrot.slane %v398_v20, 1 }
  0x96   : > { %6261 = vmatpush3.bf16.msra.mxu1 %v6957_v9  ;;  %v7660_v9 = vrot.slane %v392_v49, 7  ;;  %v465_v49 = vsel %vm443_vm2, %v7643_v60, %v7641_v59 }
  0x97   : > { %1168 = vmatmul.mubr.bf16.gmra.mrb[4].mxu0 %v7570_v10  ;;  %6262 = vmatprep.subr.bf16.mxu1 %v6961_v16 }
  0x98   : > { %1175 = vmatprep.mubr.bf16.mxu0 %v7541_v48  ;;  %6215 = vmatpush3.bf16.msra.mxu0 %v6946_v8  ;;  %v7658_v8 = vpack.c.bf16 %v447_v51, %v482_v45  ;;  %v7695_v45 = vld [vmem:[%s7502_s25 + $0x68] sm:$0xff]   ;;  %v7704_v51 = vrot.slane %v397_v17, 7  ;;  %v466_v17 = vsel %vm443_vm2, %v7660_v9, %v7650_v0 }
  0x99   : > { %1634 = vmatmul.mubr.bf16.gmra.mrb[4].mxu1 %v605_v61  ;;  %6216 = vmatprep.subr.bf16.mxu0 %v6949_v15  ;;  %v7645_v61 = vrot.slane %v389_v36, 1  ;;  %v399_v36 = vunpack.c.l.bf16 %v7656_v5 }
  0x9a   : > { %1641 = vmatprep.mubr.bf16.mxu1 %v7526_v42  ;;  %6263 = vmatpush3.bf16.msra.mxu1 %v6961_v16  ;;  %9553 = vst [vmem:[#allocation23_spill] sm:$0xff] %v7658_v8  ;;  %v7667_v16 = vrot.slane %v394_v54, 7  ;;  %v9559_v42 = vunpack.c.l.bf16 %v7695_v45 }
  0x9b   : > { %6264 = vmatprep.subr.bf16.mxu1 %v6963_v22  ;;  %v7731_v58 = vrot.slane %v399_v36, 1 }
  0x9c   : > { %6217 = vmatpush3.bf16.msra.mxu0 %v6949_v15  ;;  %v7665_v15 = vrot.slane %v393_v53, 7  ;;  %v6971_v53 = vld [vmem:[#allocation7 + $0x1c0] sm:$0xff]  }
  0x9d   : > { %6218 = vmatprep.subr.bf16.mxu0 %v6952_v24 }
  0x9e   : > { %6265 = vmatpush3.bf16.msra.mxu1 %v6963_v22  ;;  %v6969_v22 = vld [vmem:[#allocation7 + $0xb0] sm:$0xff]  }
  0x9f   : > { %1176 = vmatmul.mubr.bf16.gmra.mrb[8].mxu0 %v7601_v29  ;;  %6266 = vmatprep.subr.bf16.mxu1 %v6966_v43 }
  0xa0   : > { %1183 = vmatprep.mubr.bf16.mxu0 %v7567_v7  ;;  %6219 = vmatpush3.bf16.msra.mxu0 %v6952_v24  ;;  %v7679_v24 = vrot.slane %v394_v54, 1  ;;  %v7706_v54 = vpack.c.bf16 %v448_v23, %v484_v18  ;;  %v7722_v23 = vld [vmem:[%s7502_s25 + $0x70] sm:$0xff]   ;;  %v9556_v18 = vunpack.c.l.bf16 %v7675_v21  ;;  %s9328_s25 = scalar_lea.vmem [#allocation10], %s5058_s27  ;;  %s5298_s27 = sshll.u32 %s7249_s21, 11 }
  0xa1   : > { %1642 = vmatmul.mubr.bf16.gmra.mrb[8].mxu1 %v7570_v10  ;;  %6220 = vmatprep.subr.bf16.mxu0 %v6956_v39  ;;  %v9501_v10 = vunpack.c.h.bf16 %v7695_v45  ;;  %s4923_s26 = sshll.u32 %s9328_s25, 4  ;;  %s9427_s6 = scalar_lea.hbm %s9485_s5, %s5298_s27  ;;  %s9429_s26 = int_to_ptr.vmem [resolvable:$true] %s4923_s26 }
  0xa2   : > { %1649 = vmatprep.mubr.bf16.mxu1 %v7541_v48  ;;  %6267 = vmatpush3.bf16.msra.mxu1 %v6966_v43  ;;  %v7692_v43 = vrot.slane %v396_v12, 1  ;;  %9554 = vst [vmem:[#allocation24_spill] sm:$0xff] %v7706_v54  ;;  %v488_v48 = vmul.f32 %v7537_v47, %v466_v17  ;;  %v541_v17 = vsel %vm540_vm3, %v7593_v26, %v7597_v27  ;;  %s4909_s21 = scalar_lea.sflag [#allocation6], %s7496_s24  ;;  %s7171_s9 = scalar_lea.vmem %s9429_s26, 2048 }
  0xa3   : > { %6268 = vmatprep.subr.bf16.mxu1 %v6967_v55  ;;  %p7172_p8 = scmp.ne.s32.totalorder %s9429_s26, %s7171_s9  ;;  %p7178_p3 = scmp.lt.s32.totalorder %s9429_s26, %s7176_s12 }
  0xa4   : > { %6221 = vmatpush3.bf16.msra.mxu0 %v6956_v39  ;;  %v7688_v39 = vrot.slane %v396_v12, 7  ;;  %v7717_v12 = vrot.slane %v399_v36, 7  ;;  %v9558_v36 = vunpack.c.h.bf16 %v7685_v37  ;;  %p7179_p5 = scmp.lt.s32.totalorder %s7177_s10, %s7171_s9 }
  0xa5   : > { %6222 = vmatprep.subr.bf16.mxu0 %v6960_v62  ;;  %p7173_p1 = pnand %p7172_p8, %p9644_p12 }
  0xa6   : > { %6269 = vmatpush3.bf16.msra.mxu1 %v6967_v55  ;;  %v7709_v55 = vrot.slane %v398_v20, 7  ;;  %v9555_v20 = vunpack.c.h.bf16 %v7656_v5  ;;  %p7180_p9 = por %p7179_p5, %p7178_p3 }
  0xa7   : > { %1184 = vmatmul.mubr.bf16.gmra.mrb[12].mxu0 %v7658_v8  ;;  %6270 = vmatprep.subr.bf16.mxu1 %v6969_v22  ;;  %p7174_p10 = pneg %p7173_p1 }
  0xa8   : > { %1191 = vmatprep.mubr.bf16.mxu0 %v7577_v14  ;;  %6223 = vmatpush3.bf16.msra.mxu0 %v6960_v62  ;;  %v9500_v62 = vunpack.c.l.bf16 %v7685_v37 }
  0xa9   : > { %1650 = vmatmul.mubr.bf16.gmra.mrb[12].mxu1 %v7601_v29  ;;  %6224 = vmatprep.subr.bf16.mxu0 %v6965_v13  ;;  %p7181_p11 = pnand %p7180_p9, %p7174_p10 }
  0xaa   : > { %1657 = vmatprep.mubr.bf16.mxu1 %v7567_v7  ;;  %6271 = vmatpush3.bf16.msra.mxu1 %v6969_v22  ;;  %v9557_v7 = vunpack.c.h.bf16 %v7675_v21  ;;  %v486_v22 = vmul.f32 %v7537_v47, %v465_v49  ;;  %v9503_v49 = vunpack.c.h.bf16 %v7722_v23 }
  0xab   : > { %6272 = vmatprep.subr.bf16.mxu1 %v6970_v33 }
  0xac   : > { %v7744_v29 = vrot.slane %v9557_v7, 1  ;;  %6225 = vmatpush3.bf16.msra.mxu0 %v6965_v13  ;;  %v7757_v7 = vld [vmem:[#allocation7 + $0x200] sm:$0xff]   ;;  %v7762_v13 = vrot.slane %v9558_v36, 1 }
  0xad   : > { %5666 = vmatprep.subr.bf16.mxu0 %v6971_v53 }
  0xae   : > { %6273 = vmatpush3.bf16.msra.mxu1 %v6970_v33  ;;  %v7790_v33 = vrot.slane %v9501_v10, 1 }
  0xaf   : > { %1192 = vmatmul.mubr.bf16.gmra.mrb[16].mxu0 %v7706_v54  ;;  %6306 = vmatprep.subr.bf16.mxu1 %v7757_v7 }
  0xb0   : > { %1199 = vmatprep.mubr.bf16.mxu0 %v7589_v25 }
  0xb1   : > { %1658 = vmatmul.mubr.bf16.gmra.mrb[16].mxu1 %v7658_v8  ;;  %v7740_v8 = vrot.slane %v9556_v18, 1  ;;  %v7755_v18 = vrot.slane %v9500_v62, 1  ;;  %v557_v62 = vsel %vm540_vm3, %v7597_v27, %v7593_v26  ;;  %v9561_v26 = vunpack.c.h.bf16 %v7725_v1 }
  0xb2   : > { %1665 = vmatprep.mubr.bf16.mxu1 %v7577_v14  ;;  %v7735_v14 = vrot.slane %v9555_v20, 1  ;;  %v449_v20 = vsel %vm443_vm2, %v7641_v59, %v7643_v60  ;;  %v7767_v59 = vrot.slane %v9559_v42, 1  ;;  %v9502_v60 = vunpack.c.l.bf16 %v7722_v23 }
  0xb3   : > { %v450_v42 = vsel %vm443_vm2, %v7650_v0, %v7660_v9  ;;  %v7798_v0 = vrot.slane %v9503_v49, 1  ;;  %v9560_v9 = vunpack.c.l.bf16 %v7725_v1  ;;  %v7808_v27 = vrot.slane %v9561_v26, 1 }
  0xb4   : > { %v7794_v53 = vrot.slane %v9502_v60, 1  ;;  %v574_v10 = vmul.f32 %v7517_v6, %v557_v62  ;;  %v7812_v60 = vpack.c.bf16 %v576_v35, %v7552_v56  ;;  %v543_v49 = vsel %vm540_vm3, %v7599_v28, %v7606_v31 }
  0xb5   : > { %v7802_v36 = vrot.slane %v9560_v9, 1  ;;  %v7818_v9 = vpack.c.bf16 %v449_v20, %v486_v22  ;;  %v467_v26 = vsel %vm443_vm2, %v7667_v16, %v7665_v15  ;;  %v559_v56 = vsel %vm540_vm3, %v7606_v31, %v7599_v28 }
  0xb6   : > { %v7834_v35 = vsel %vm443_vm2, %v7665_v15, %v7667_v16  ;;  %v7836_v62 = vpack.c.bf16 %v574_v10, %v541_v17  ;;  %v544_v20 = vsel %vm540_vm3, %v7618_v40, %v7622_v44  ;;  %v560_v28 = vsel %vm540_vm3, %v7622_v44, %v7618_v40 }
  0xb7   : > { %v545_v31 = vsel %vm540_vm3, %v7625_v46, %v7634_v52  ;;  %v561_v10 = vsel %vm540_vm3, %v7634_v52, %v7625_v46  ;;  %v546_v15 = vsel %vm540_vm3, %v7645_v61, %v7648_v63  ;;  %v490_v16 = vmul.f32 %v7537_v47, %v467_v26  ;;  %1200 = vmatmul.mubr.bf16.gmra.mrb[20].mxu0 %v7818_v9 }
  0xb8   : > { %v580_v40 = vmul.f32 %v7517_v6, %v560_v28  ;;  %v582_v44 = vmul.f32 %v7517_v6, %v561_v10  ;;  %v562_v46 = vsel %vm540_vm3, %v7648_v63, %v7645_v61  ;;  %v547_v52 = vsel %vm540_vm3, %v7652_v3, %v7662_v11  ;;  %1207 = vmatprep.mubr.bf16.mxu0 %v7604_v30 }
  0xb9   : > { %1666 = vmatmul.mubr.bf16.gmra.mrb[20].mxu1 %v7706_v54  ;;  %v7820_v54 = vpack.c.bf16 %v450_v42, %v488_v48  ;;  %v578_v48 = vmul.f32 %v7517_v6, %v559_v56  ;;  %v548_v17 = vsel %vm540_vm3, %v7671_v19, %v7679_v24  ;;  %v584_v63 = vmul.f32 %v7517_v6, %v562_v46 }
  0xba   : > { %1673 = vmatprep.mubr.bf16.mxu1 %v7589_v25  ;;  %v7882_v42 = vpack.c.bf16 %v580_v40, %v544_v20  ;;  %v7884_v61 = vpack.c.bf16 %v582_v44, %v545_v31  ;;  %v565_v56 = vsel %vm540_vm3, %v7692_v43, %v7690_v41  ;;  %v567_v31 = vsel %vm540_vm3, %v7735_v14, %v7731_v58 }
  0xbb   : > { %v7860_v22 = vpack.c.bf16 %v578_v48, %v543_v49  ;;  %v563_v49 = vsel %vm540_vm3, %v7662_v11, %v7652_v3  ;;  %v564_v3 = vsel %vm540_vm3, %v7679_v24, %v7671_v19  ;;  %v549_v11 = vsel %vm540_vm3, %v7690_v41, %v7692_v43 }
  0xbc   : > { %v586_v26 = vmul.f32 %v7517_v6, %v563_v49  ;;  %v550_v48 = vsel %vm540_vm3, %v7711_v57, %v7715_v4  ;;  %v7906_v20 = vpack.c.bf16 %v584_v63, %v546_v15  ;;  %v588_v24 = vmul.f32 %v7517_v6, %v564_v3 }
  0xbd   : > { %v590_v28 = vmul.f32 %v7517_v6, %v565_v56  ;;  %v566_v41 = vsel %vm540_vm3, %v7715_v4, %v7711_v57  ;;  %v551_v43 = vsel %vm540_vm3, %v7731_v58, %v7735_v14  ;;  %v552_v10 = vsel %vm540_vm3, %v7740_v8, %v7744_v29 }
  0xbe   : > { %v7908_v19 = vpack.c.bf16 %v586_v26, %v547_v52  ;;  %v7928_v15 = vpack.c.bf16 %v588_v24, %v548_v17  ;;  %v592_v57 = vmul.f32 %v7517_v6, %v566_v41  ;;  %v594_v4 = vmul.f32 %v7517_v6, %v567_v31 }
  0xbf   : > { %v7930_v40 = vpack.c.bf16 %v590_v28, %v549_v11  ;;  %v568_v44 = vsel %vm540_vm3, %v7744_v29, %v7740_v8  ;;  %v553_v14 = vsel %vm540_vm3, %v7755_v18, %v7762_v13  ;;  %v569_v58 = vsel %vm540_vm3, %v7762_v13, %v7755_v18  ;;  %1208 = vmatmul.mubr.bf16.gmra.mrb[24].mxu0 %v7820_v54 }
  0xc0   : > { %v554_v46 = vsel %vm540_vm3, %v7767_v59, %v7790_v33  ;;  %v7950_v52 = vpack.c.bf16 %v592_v57, %v550_v48  ;;  %v7952_v49 = vpack.c.bf16 %v594_v4, %v551_v43  ;;  %v596_v29 = vmul.f32 %v7517_v6, %v568_v44  ;;  %1215 = vmatprep.mubr.bf16.mxu0 %v7611_v34 }
  0xc1   : > { %1674 = vmatmul.mubr.bf16.gmra.mrb[24].mxu1 %v7818_v9  ;;  %v598_v8 = vmul.f32 %v7517_v6, %v569_v58  ;;  %v9562_v17 = vunpack.c.h.bf16 %v7656_v5  ;;  %v570_v18 = vsel %vm540_vm3, %v7790_v33, %v7767_v59  ;;  %v555_v13 = vsel %vm540_vm3, %v7794_v53, %v7798_v0 }
  0xc2   : > { %1681 = vmatprep.mubr.bf16.mxu1 %v7604_v30  ;;  %v571_v26 = vsel %vm540_vm3, %v7798_v0, %v7794_v53  ;;  %v7972_v3 = vpack.c.bf16 %v596_v29, %v552_v10  ;;  %v600_v56 = vmul.f32 %v7517_v6, %v570_v18  ;;  %v556_v33 = vsel %vm540_vm3, %v7802_v36, %v7808_v27 }
  0xc3   : > { %v437_v63 = vrot.slane %v9562_v17, 7  ;;  %v7974_v11 = vpack.c.bf16 %v598_v8, %v553_v14  ;;  %v602_v59 = vmul.f32 %v7517_v6, %v571_v26  ;;  %v572_v53 = vsel %vm540_vm3, %v7808_v27, %v7802_v36 }
  0xc4   : > { %v7988_v0 = vpack.c.bf16 %v600_v56, %v554_v46  ;;  %v604_v24 = vmul.f32 %v7517_v6, %v572_v53  ;;  %v7994_v28 = vpack.c.bf16 %v7834_v35, %v490_v16  ;;  %v468_v41 = vsel %vm443_vm2, %v7688_v39, %v7681_v32 }
  0xc5   : > { %v7990_v48 = vpack.c.bf16 %v602_v59, %v555_v13  ;;  %v9563_v36 = vunpack.c.l.bf16 %v7675_v21  ;;  %v9564_v31 = vunpack.c.h.bf16 %v7675_v21  ;;  %v492_v57 = vmul.f32 %v7537_v47, %v468_v41 }
  0xc6   : > { %v8000_v43 = vpack.c.bf16 %v604_v24, %v556_v33  ;;  %v9565_v35 = vunpack.c.l.bf16 %v7685_v37  ;;  %v9566_v4 = vunpack.c.h.bf16 %v7685_v37  ;;  %v9567_v14 = vunpack.c.l.bf16 %v7695_v45 }
  0xc7   : > { %v422_v27 = vrot.slane %v9563_v36, 7  ;;  %v438_v10 = vrot.slane %v9564_v31, 7  ;;  %1216 = vmatmul.mubr.bf16.gmra.mrb[28].mxu0 %v7994_v28  ;;  %v9568_v46 = vunpack.c.h.bf16 %v7695_v45  ;;  %v452_v8 = vsel %vm443_vm2, %v7681_v32, %v7688_v39 }
  0xc8   : > { %v423_v16 = vrot.slane %v9565_v35, 7  ;;  %v439_v44 = vrot.slane %v9566_v4, 7  ;;  %v424_v58 = vrot.slane %v9567_v14, 7  ;;  %1223 = vmatprep.mubr.bf16.mxu0 %v7616_v38  ;;  %v8023_v17 = vpack.c.bf16 %v452_v8, %v492_v57 }
  0xc9   : > { %1682 = vmatmul.mubr.bf16.gmra.mrb[28].mxu1 %v7820_v54  ;;  %v440_v29 = vrot.slane %v9568_v46, 7  ;;  %v469_v18 = vsel %vm443_vm2, %v7709_v55, %v7704_v51  ;;  %v453_v32 = vsel %vm443_vm2, %v7704_v51, %v7709_v55  ;;  %v470_v26 = vsel %vm443_vm2, %v437_v63, %v7717_v12 }
  0xca   : > { %1689 = vmatprep.mubr.bf16.mxu1 %v7611_v34  ;;  %v494_v13 = vmul.f32 %v7537_v47, %v469_v18  ;;  %v496_v56 = vmul.f32 %v7537_v47, %v470_v26  ;;  %v454_v51 = vsel %vm443_vm2, %v7717_v12, %v437_v63  ;;  %v471_v59 = vsel %vm443_vm2, %v438_v10, %v422_v27 }
  0xcb   : > { %v498_v33 = vmul.f32 %v7537_v47, %v471_v59  ;;  %v455_v53 = vsel %vm443_vm2, %v422_v27, %v438_v10  ;;  %v472_v63 = vsel %vm443_vm2, %v439_v44, %v423_v16  ;;  %v456_v41 = vsel %vm443_vm2, %v423_v16, %v439_v44 }
  0xcc   : > { %v8038_v39 = vpack.c.bf16 %v453_v32, %v494_v13  ;;  %v8051_v55 = vpack.c.bf16 %v454_v51, %v496_v56  ;;  %v500_v24 = vmul.f32 %v7537_v47, %v472_v63  ;;  %v473_v27 = vsel %vm443_vm2, %v440_v29, %v424_v58  ;;  %v6985_v63 = vld [vmem:[#allocation7 + $0x210] sm:$0xff]  }
  0xcd   : > { %v8062_v12 = vpack.c.bf16 %v455_v53, %v498_v33  ;;  %v502_v31 = vmul.f32 %v7537_v47, %v473_v27  ;;  %v457_v10 = vsel %vm443_vm2, %v424_v58, %v440_v29  ;;  %v9569_v57 = vunpack.c.l.bf16 %v7722_v23  ;;  %v6982_v53 = vld [vmem:[#allocation7 + $0x208] sm:$0xff]   ;;  %v6986_v27 = vld [vmem:[#allocation7 + $0x218] sm:$0xff]  }
  0xce   : > { %v8073_v36 = vpack.c.bf16 %v456_v41, %v500_v24  ;;  %v9570_v16 = vunpack.c.h.bf16 %v7722_v23  ;;  %v9571_v29 = vunpack.c.l.bf16 %v7725_v1  ;;  %v9572_v18 = vunpack.c.h.bf16 %v7725_v1  ;;  %v6972_v24 = vld [vmem:[#allocation7 + $0x180] sm:$0xff]   ;;  %v6973_v41 = vld [vmem:[#allocation7 + $0x1c8] sm:$0xff]  }
  0xcf   : > { %1224 = vmatmul.mubr.bf16.gmra.mrb[32].mxu0 %v8023_v17  ;;  %v425_v35 = vrot.slane %v9569_v57, 7  ;;  %v8088_v44 = vpack.c.bf16 %v457_v10, %v502_v31  ;;  %v9573_v59 = vmov 0   ;;  %v6974_v31 = vld [vmem:[#allocation7 + $0x188] sm:$0xff]   ;;  %v6976_v10 = vld [vmem:[#allocation7 + $0x190] sm:$0xff]   ;;  %v6977_v57 = vld [vmem:[#allocation7 + $0x1d8] sm:$0xff]  }
  0xd0   : > { %1231 = vmatprep.mubr.bf16.mxu0 %v7629_v50  ;;  %v441_v4 = vrot.slane %v9570_v16, 7  ;;  %v426_v8 = vrot.slane %v9571_v29, 7  ;;  %v442_v13 = vrot.slane %v9572_v18, 7  ;;  %v6978_v16 = vld [vmem:[#allocation7 + $0x198] sm:$0xff]   ;;  %v6987_v18 = vld [vmem:[#allocation7 + $0x1f0] sm:$0xff]  }
  0xd1   : > { %1690 = vmatmul.mubr.bf16.gmra.mrb[32].mxu1 %v7994_v28  ;;  %v6994_v29 = vld [vmem:[#allocation7 + $0x238] sm:$0xff]  }
  0xd2   : > { %1697 = vmatprep.mubr.bf16.mxu1 %v7616_v38  ;;  %v474_v14 = vsel %vm443_vm2, %v441_v4, %v425_v35  ;;  %v458_v58 = vsel %vm443_vm2, %v425_v35, %v441_v4  ;;  %v475_v26 = vsel %vm443_vm2, %v442_v13, %v426_v8  ;;  %v459_v51 = vsel %vm443_vm2, %v426_v8, %v442_v13  ;;  %v6990_v35 = vld [vmem:[#allocation7 + $0x228] sm:$0xff]   ;;  %v6979_v4 = vld [vmem:[#allocation7 + $0x1e0] sm:$0xff]   ;;  %v6988_v13 = vld [vmem:[#allocation7 + $0x1b0] sm:$0xff]  }
  0xd3   : > { %v504_v46 = vmul.f32 %v7537_v47, %v474_v14  ;;  %v506_v56 = vmul.f32 %v7537_v47, %v475_v26  ;;  %v6993_v14 = vld [vmem:[#allocation7 + $0x230] sm:$0xff]   ;;  %v6984_v8 = vld [vmem:[#allocation7 + $0x1a8] sm:$0xff]   ;;  %v6991_v26 = vld [vmem:[#allocation7 + $0x1f8] sm:$0xff]  }
  0xd5   : > { %v8103_v32 = vpack.c.bf16 %v458_v58, %v504_v46  ;;  %v8114_v33 = vpack.c.bf16 %v459_v51, %v506_v56  ;;  %v6980_v46 = vld [vmem:[#allocation7 + $0x1a0] sm:$0xff]   ;;  %v6983_v58 = vld [vmem:[#allocation7 + $0x1e8] sm:$0xff]   ;;  %v6992_v56 = vld [vmem:[#allocation7 + $0x1b8] sm:$0xff]  }
  0xd6   : > { %v9574_v51 = vld [vmem:[#allocation16_spill] sm:$0xff] }
  0xd7   : > { %1232 = vmatmul.mubr.bf16.gmra.mrb[36].mxu0 %v8038_v39 }
  0xd8   : > { %1239 = vmatprep.mubr.bf16.mxu0 %v7656_v5 }
  0xd9   : > { %1698 = vmatmul.mubr.bf16.gmra.mrb[36].mxu1 %v8023_v17 }
  0xda   : > { %1705 = vmatprep.mubr.bf16.mxu1 %v7629_v50 }
  0xdf   : > { %1240 = vmatmul.mubr.bf16.gmra.mrb[40].mxu0 %v8051_v55 }
  0xe0   : > { %1247 = vmatprep.mubr.bf16.mxu0 %v7675_v21 }
  0xe1   : > { %1706 = vmatmul.mubr.bf16.gmra.mrb[40].mxu1 %v8038_v39 }
  0xe2   : > { %1713 = vmatprep.mubr.bf16.mxu1 %v7656_v5 }
  0xe7   : > { %1248 = vmatmul.mubr.bf16.gmra.mrb[44].mxu0 %v8062_v12 }
  0xe8   : > { %1255 = vmatprep.mubr.bf16.mxu0 %v7685_v37 }
  0xe9   : > { %1714 = vmatmul.mubr.bf16.gmra.mrb[44].mxu1 %v8051_v55 }
  0xea   : > { %1721 = vmatprep.mubr.bf16.mxu1 %v7675_v21 }
  0xef   : > { %1256 = vmatmul.mubr.bf16.gmra.mrb[48].mxu0 %v8073_v36 }
  0xf0   : > { %1263 = vmatprep.mubr.bf16.mxu0 %v7695_v45 }
  0xf1   : > { %1722 = vmatmul.mubr.bf16.gmra.mrb[48].mxu1 %v8062_v12 }
  0xf2   : > { %1729 = vmatprep.mubr.bf16.mxu1 %v7685_v37 }
  0xf7   : > { %1264 = vmatmul.mubr.bf16.gmra.mrb[52].mxu0 %v8088_v44 }
  0xf8   : > { %1271 = vmatprep.mubr.bf16.mxu0 %v7722_v23 }
  0xf9   : > { %1730 = vmatmul.mubr.bf16.gmra.mrb[52].mxu1 %v8073_v36 }
  0xfa   : > { %1737 = vmatprep.mubr.bf16.mxu1 %v7695_v45 }
  0xff   : > { %1272 = vmatmul.mubr.bf16.gmra.mrb[56].mxu0 %v8103_v32 }
 0x100   : > { %1279 = vmatprep.mubr.bf16.mxu0 %v7725_v1 }
 0x101   : > { %1738 = vmatmul.mubr.bf16.gmra.mrb[56].mxu1 %v8088_v44 }
 0x102   : > { %1745 = vmatprep.mubr.bf16.mxu1 %v7722_v23 }
 0x107   : > { %1280 = vmatmul.mubr.bf16.gmra.mrb[60].mxu0 %v8114_v33 }
 0x108   : > { %6226 = vmatprep.mubr.bf16.mxu0 %v7836_v62 }
 0x109   : > { %1746 = vmatmul.mubr.bf16.gmra.mrb[60].mxu1 %v8103_v32 }
 0x10a   : > { %6274 = vmatprep.mubr.bf16.mxu1 %v9573_v59 }
 0x10f   : > { %6227 = vmatmul.mubr.bf16.vlgmr.msra.gmra.mrb[64].mxu0 %v7812_v60 }
 0x110   : > { %5667 = vmatpush3.bf16.msra.mxu0 %v6972_v24  ;;  %6230 = vmatprep.mubr.bf16.mxu0 %v7860_v22  ;;  %v9577_v24 = vld [vmem:[#allocation22_spill] sm:$0xff] }
 0x111   : > { %6275 = vmatmul.mubr.bf16.vlgmr.msra.gmra.mrb[64].mxu1 %v7836_v62  ;;  %5668 = vmatprep.subr.bf16.mxu0 %v6973_v41  ;;  %v6975_v62 = vld [vmem:[#allocation7 + $0x1d0] sm:$0xff]   ;;  %v9578_v41 = vld [vmem:[#allocation19_spill] sm:$0xff] }
 0x112   : > { %6278 = vmatprep.mubr.bf16.mxu1 %v7812_v60  ;;  %6307 = vmatpush3.bf16.msra.mxu1 %v7757_v7  ;;  %v6989_v7 = vld [vmem:[#allocation7 + $0x220] sm:$0xff]  }
 0x113   : > { %6308 = vmatprep.subr.bf16.mxu1 %v6982_v53 }
 0x114   : > { %5669 = vmatpush3.bf16.msra.mxu0 %v6974_v31  ;;  %v9579_v31 = vld [vmem:[#allocation23_spill] sm:$0xff] }
 0x115   : > { %5670 = vmatprep.subr.bf16.mxu0 %v6975_v62 }
 0x116   : > { %6309 = vmatpush3.bf16.msra.mxu1 %v6982_v53  ;;  %v9575_v53 = vld [vmem:[#allocation20_spill] sm:$0xff] }
 0x117   : > { %6310 = vmatprep.subr.bf16.mxu1 %v6985_v63  ;;  %6231 = vmatmul.mubr.bf16.gmra.mrb[68].mxu0 %v7882_v42 }
 0x118   : > { %6234 = vmatprep.mubr.bf16.mxu0 %v7884_v61  ;;  %5671 = vmatpush3.bf16.msra.mxu0 %v6976_v10 }
 0x119   : > { %6279 = vmatmul.mubr.bf16.gmra.mrb[68].mxu1 %v7860_v22  ;;  %5672 = vmatprep.subr.bf16.mxu0 %v6977_v57 }
 0x11a   : > { %6282 = vmatprep.mubr.bf16.mxu1 %v7882_v42  ;;  %6311 = vmatpush3.bf16.msra.mxu1 %v6985_v63  ;;  %v9576_v63 = vld [vmem:[#allocation18_spill] sm:$0xff] }
 0x11b   : > { %6312 = vmatprep.subr.bf16.mxu1 %v6986_v27 }
 0x11c   : > { %5673 = vmatpush3.bf16.msra.mxu0 %v6978_v16 }
 0x11d   : > { %5674 = vmatprep.subr.bf16.mxu0 %v6979_v4 }
 0x11e   : > { %6313 = vmatpush3.bf16.msra.mxu1 %v6986_v27 }
 0x11f   : > { %6314 = vmatprep.subr.bf16.mxu1 %v6989_v7  ;;  %6235 = vmatmul.mubr.bf16.gmra.mrb[72].mxu0 %v7906_v20 }
 0x120   : > { %6238 = vmatprep.mubr.bf16.mxu0 %v7908_v19  ;;  %5675 = vmatpush3.bf16.msra.mxu0 %v6980_v46 }
 0x121   : > { %6283 = vmatmul.mubr.bf16.gmra.mrb[72].mxu1 %v7884_v61  ;;  %5676 = vmatprep.subr.bf16.mxu0 %v6983_v58  ;;  %v9581_v58 = vld [vmem:[#allocation24_spill] sm:$0xff] }
 0x122   : > { %6286 = vmatprep.mubr.bf16.mxu1 %v7906_v20  ;;  %6315 = vmatpush3.bf16.msra.mxu1 %v6989_v7  ;;  %v9580_v7 = vld [vmem:[#allocation21_spill] sm:$0xff] }
 0x123   : > { %6316 = vmatprep.subr.bf16.mxu1 %v6990_v35 }
 0x124   : > { %5677 = vmatpush3.bf16.msra.mxu0 %v6984_v8 }
 0x125   : > { %5678 = vmatprep.subr.bf16.mxu0 %v6987_v18 }
 0x126   : > { %6317 = vmatpush3.bf16.msra.mxu1 %v6990_v35 }
 0x127   : > { %6318 = vmatprep.subr.bf16.mxu1 %v6993_v14  ;;  %6239 = vmatmul.mubr.bf16.gmra.mrb[76].mxu0 %v7928_v15 }
 0x128   : > { %6242 = vmatprep.mubr.bf16.mxu0 %v7930_v40  ;;  %5679 = vmatpush3.bf16.msra.mxu0 %v6988_v13 }
 0x129   : > { %6287 = vmatmul.mubr.bf16.gmra.mrb[76].mxu1 %v7908_v19  ;;  %5680 = vmatprep.subr.bf16.mxu0 %v6991_v26 }
 0x12a   : > { %6290 = vmatprep.mubr.bf16.mxu1 %v7928_v15  ;;  %6319 = vmatpush3.bf16.msra.mxu1 %v6993_v14 }
 0x12b   : > { %6320 = vmatprep.subr.bf16.mxu1 %v6994_v29 }
 0x12c   : > { %5681 = vmatpush3.bf16.msra.mxu0 %v6992_v56 }
 0x12e   : > { %6321 = vmatpush3.bf16.msra.mxu1 %v6994_v29 }
 0x12f   : > { %6243 = vmatmul.mubr.bf16.gmra.mrb[80].mxu0 %v7950_v52 }
 0x130   : > { %6246 = vmatprep.mubr.bf16.mxu0 %v7952_v49 }
 0x131   : > { %6291 = vmatmul.mubr.bf16.gmra.mrb[80].mxu1 %v7930_v40 }
 0x132   : > { %6294 = vmatprep.mubr.bf16.mxu1 %v7950_v52 }
 0x137   : > { %6247 = vmatmul.mubr.bf16.gmra.mrb[84].mxu0 %v7972_v3 }
 0x138   : > { %6250 = vmatprep.mubr.bf16.mxu0 %v7974_v11 }
 0x139   : > { %6295 = vmatmul.mubr.bf16.gmra.mrb[84].mxu1 %v7952_v49 }
 0x13a   : > { %6298 = vmatprep.mubr.bf16.mxu1 %v7972_v3 }
 0x13f   : > { %6251 = vmatmul.mubr.bf16.gmra.mrb[88].mxu0 %v7988_v0 }
 0x140   : > { %6254 = vmatprep.mubr.bf16.mxu0 %v7990_v48 }
 0x141   : > { %6299 = vmatmul.mubr.bf16.gmra.mrb[88].mxu1 %v7974_v11 }
 0x142   : > { %6302 = vmatprep.mubr.bf16.mxu1 %v7988_v0 }
 0x147   : > { %6255 = vmatmul.mubr.bf16.gmra.mrb[92].mxu0 %v8000_v43 }
 0x148   : > { %2192 = vmatprep.mubr.bf16.mxu0 %v9574_v51 }
 0x149   : > { %6303 = vmatmul.mubr.bf16.gmra.mrb[92].mxu1 %v7990_v48 }
 0x14a   : > { %6322 = vmatprep.mubr.bf16.mxu1 %v7812_v60 }
 0x14f   : > { %2193 = vmatmul.mubr.bf16.vlgmr.msra.gmra.mrb[96].mxu0 %v9575_v53 }
 0x150   : > { %2200 = vmatprep.mubr.bf16.mxu0 %v9576_v63 }
 0x151   : > { %6323 = vmatmul.mubr.bf16.vlgmr.msra.gmra.mrb[64].mxu1 %v7860_v22 }
 0x152   : > { %6326 = vmatprep.mubr.bf16.mxu1 %v7882_v42 }
 0x157   : > { %2201 = vmatmul.mubr.bf16.gmra.mrb[100].mxu0 %v9577_v24 }
 0x158   : > { %2208 = vmatprep.mubr.bf16.mxu0 %v9578_v41 }
 0x159   : > { %6327 = vmatmul.mubr.bf16.gmra.mrb[68].mxu1 %v7884_v61 }
 0x15a   : > { %6330 = vmatprep.mubr.bf16.mxu1 %v7906_v20 }
 0x15f   : > { %2209 = vmatmul.mubr.bf16.gmra.mrb[104].mxu0 %v9579_v31 }
 0x160   : > { %2216 = vmatprep.mubr.bf16.mxu0 %v9580_v7 }
 0x161   : > { %6331 = vmatmul.mubr.bf16.gmra.mrb[72].mxu1 %v7908_v19 }
 0x162   : > { %6334 = vmatprep.mubr.bf16.mxu1 %v7928_v15  ;;  %v5410_v20 = vpop.f32.mrb[0].mxu0 }
 0x163   : > { %v5411_v19 = vpop.f32.mrb[1].mxu0 }
 0x164   : > { %v5546_v60 = vpop.f32.mrb[0].mxu1  ;;  %v5413_v10 = vpop.f32.mrb[2].mxu0  ;;  %v8169_v57 = vadd.f32 %v5411_v19, %v5410_v20 }
 0x165   : > { %v5547_v22 = vpop.f32.mrb[1].mxu1  ;;  %v5414_v35 = vpop.f32.mrb[3].mxu0 }
 0x166   : > { %v8161_v27 = vadd.f32 %v5547_v22, %v5546_v60  ;;  %v5549_v42 = vpop.f32.mrb[2].mxu1  ;;  %v8173_v46 = vadd.f32 %v5414_v35, %v5413_v10 }
 0x167   : > { %v5550_v62 = vpop.f32.mrb[3].mxu1  ;;  %2217 = vmatmul.mubr.bf16.gmra.mrb[108].mxu0 %v9581_v58 }
 0x168   : > { %v8165_v61 = vadd.f32 %v5550_v62, %v5549_v42  ;;  %2224 = vmatprep.mubr.bf16.mxu0 %v7589_v25 }
 0x169   : > { %6335 = vmatmul.mubr.bf16.gmra.mrb[76].mxu1 %v7930_v40 }
 0x16a   : > { %6338 = vmatprep.mubr.bf16.mxu1 %v7950_v52  ;;  %v5416_v52 = vpop.f32.mrb[4].mxu0 }
 0x16b   : > { %v5417_v8 = vpop.f32.mrb[5].mxu0 }
 0x16c   : > { %v5552_v15 = vpop.f32.mrb[4].mxu1  ;;  %v5419_v18 = vpop.f32.mrb[6].mxu0  ;;  %v8181_v26 = vadd.f32 %v5417_v8, %v5416_v52 }
 0x16d   : > { %v5553_v16 = vpop.f32.mrb[5].mxu1  ;;  %v5420_v56 = vpop.f32.mrb[7].mxu0 }
 0x16e   : > { %v8171_v4 = vadd.f32 %v5553_v16, %v5552_v15  ;;  %v5555_v14 = vpop.f32.mrb[6].mxu1  ;;  %v8185_v24 = vadd.f32 %v5420_v56, %v5419_v18 }
 0x16f   : > { %v5556_v29 = vpop.f32.mrb[7].mxu1  ;;  %2225 = vmatmul.mubr.bf16.gmra.mrb[112].mxu0 %v7818_v9 }
 0x170   : > { %v8177_v40 = vadd.f32 %v5556_v29, %v5555_v14  ;;  %2232 = vmatprep.mubr.bf16.mxu0 %v7604_v30 }
 0x171   : > { %6339 = vmatmul.mubr.bf16.gmra.mrb[80].mxu1 %v7952_v49 }
 0x172   : > { %6342 = vmatprep.mubr.bf16.mxu1 %v7972_v3  ;;  %v5422_v3 = vpop.f32.mrb[8].mxu0 }
 0x173   : > { %v5423_v41 = vpop.f32.mrb[9].mxu0 }
 0x174   : > { %v5558_v13 = vpop.f32.mrb[8].mxu1  ;;  %v5425_v60 = vpop.f32.mrb[10].mxu0  ;;  %v8193_v42 = vadd.f32 %v5423_v41, %v5422_v3 }
 0x175   : > { %v5559_v51 = vpop.f32.mrb[9].mxu1  ;;  %v5426_v31 = vpop.f32.mrb[11].mxu0 }
 0x176   : > { %v8183_v53 = vadd.f32 %v5559_v51, %v5558_v13  ;;  %v5561_v63 = vpop.f32.mrb[10].mxu1  ;;  %v8197_v20 = vadd.f32 %v5426_v31, %v5425_v60 }
 0x177   : > { %v5562_v25 = vpop.f32.mrb[11].mxu1  ;;  %2233 = vmatmul.mubr.bf16.gmra.mrb[116].mxu0 %v7820_v54 }
 0x178   : > { %v8189_v49 = vadd.f32 %v5562_v25, %v5561_v63  ;;  %2240 = vmatprep.mubr.bf16.mxu0 %v7611_v34 }
 0x179   : > { %6343 = vmatmul.mubr.bf16.gmra.mrb[84].mxu1 %v7974_v11 }
 0x17a   : > { %6346 = vmatprep.mubr.bf16.mxu1 %v7988_v0  ;;  %v5428_v0 = vpop.f32.mrb[12].mxu0 }
 0x17b   : > { %v5429_v19 = vpop.f32.mrb[13].mxu0 }
 0x17c   : > { %v5564_v22 = vpop.f32.mrb[12].mxu1  ;;  %v5431_v10 = vpop.f32.mrb[14].mxu0  ;;  %v8205_v35 = vadd.f32 %v5429_v19, %v5428_v0 }
 0x17d   : > { %v5565_v62 = vpop.f32.mrb[13].mxu1  ;;  %v5432_v16 = vpop.f32.mrb[15].mxu0 }
 0x17e   : > { %v8195_v7 = vadd.f32 %v5565_v62, %v5564_v22  ;;  %v5567_v9 = vpop.f32.mrb[14].mxu1  ;;  %v8209_v29 = vadd.f32 %v5432_v16, %v5431_v10 }
 0x17f   : > { %v5568_v30 = vpop.f32.mrb[15].mxu1  ;;  %2241 = vmatmul.mubr.bf16.gmra.mrb[120].mxu0 %v7994_v28 }
 0x180   : > { %v8201_v11 = vadd.f32 %v5568_v30, %v5567_v9  ;;  %2248 = vmatprep.mubr.bf16.mxu0 %v7616_v38 }
 0x181   : > { %6347 = vmatmul.mubr.bf16.gmra.mrb[88].mxu1 %v7990_v48 }
 0x182   : > { %6350 = vmatprep.mubr.bf16.mxu1 %v8000_v43  ;;  %v5434_v43 = vpop.f32.mrb[16].mxu0 }
 0x183   : > { %v5435_v52 = vpop.f32.mrb[17].mxu0 }
 0x184   : > { %v5570_v15 = vpop.f32.mrb[16].mxu1  ;;  %v5437_v8 = vpop.f32.mrb[18].mxu0  ;;  %v8216_v13 = vadd.f32 %v5435_v52, %v5434_v43 }
 0x185   : > { %v5571_v14 = vpop.f32.mrb[17].mxu1  ;;  %v5438_v56 = vpop.f32.mrb[19].mxu0 }
 0x186   : > { %v8207_v58 = vadd.f32 %v5571_v14, %v5570_v15  ;;  %v5573_v54 = vpop.f32.mrb[18].mxu1  ;;  %v8220_v3 = vadd.f32 %v5438_v56, %v5437_v8 }
 0x187   : > { %v5574_v34 = vpop.f32.mrb[19].mxu1  ;;  %2249 = vmatmul.mubr.bf16.gmra.mrb[124].mxu0 %v8023_v17 }
 0x188   : > { %v8213_v48 = vadd.f32 %v5574_v34, %v5573_v54  ;;  %2256 = vmatprep.mubr.bf16.mxu0 %v7629_v50 }
 0x189   : > { %6351 = vmatmul.mubr.bf16.gmra.mrb[92].mxu1 %v9573_v59 }
 0x18a   : > { %v5440_v41 = vpop.f32.mrb[20].mxu0 }
 0x18b   : > { %v5441_v60 = vpop.f32.mrb[21].mxu0 }
 0x18c   : > { %v5576_v18 = vpop.f32.mrb[20].mxu1  ;;  %v5443_v22 = vpop.f32.mrb[22].mxu0  ;;  %v8226_v62 = vadd.f32 %v5441_v60, %v5440_v41  ;;  %v6997_v60 = vld [vmem:[#allocation9 + $0x108] sm:$0xff]  }
 0x18d   : > { %v5577_v51 = vpop.f32.mrb[21].mxu1  ;;  %v5444_v9 = vpop.f32.mrb[23].mxu0 }
 0x18e   : > { %v8218_v63 = vadd.f32 %v5577_v51, %v5576_v18  ;;  %v5579_v25 = vpop.f32.mrb[22].mxu1  ;;  %v8230_v10 = vadd.f32 %v5444_v9, %v5443_v22  ;;  %v6995_v51 = vld [vmem:[#allocation9 + $0x100] sm:$0xff]  }
 0x18f   : > { %v5580_v38 = vpop.f32.mrb[23].mxu1  ;;  %2257 = vmatmul.mubr.bf16.gmra.mrb[128].mxu0 %v8038_v39  ;;  %5802 = vmatprep.subr.bf16.mxu0 %v6995_v51  ;;  %v7002_v51 = vld [vmem:[#allocation9 + $0x118] sm:$0xff]  }
 0x190   : > { %v8224_v28 = vadd.f32 %v5580_v38, %v5579_v25  ;;  %2264 = vmatprep.mubr.bf16.mxu0 %v7656_v5  ;;  %v6996_v25 = vld [vmem:[#allocation9 + $0xc0] sm:$0xff]  }
 0x191   : > { %5803 = vmatpush3.bf16.msra.mxu0 %v6996_v25  ;;  %v7003_v25 = vld [vmem:[#allocation9 + $0x148] sm:$0xff]  }
 0x192   : > { %v5446_v15 = vpop.f32.mrb[24].mxu0  ;;  %5804 = vmatprep.subr.bf16.mxu0 %v6997_v60 }
 0x193   : > { %v5447_v16 = vpop.f32.mrb[25].mxu0 }
 0x194   : > { %v5582_v31 = vpop.f32.mrb[24].mxu1  ;;  %v5449_v14 = vpop.f32.mrb[26].mxu0  ;;  %v8236_v34 = vadd.f32 %v5447_v16, %v5446_v15 }
 0x195   : > { %v5583_v30 = vpop.f32.mrb[25].mxu1  ;;  %v5450_v43 = vpop.f32.mrb[27].mxu0 }
 0x196   : > { %v8228_v0 = vadd.f32 %v5583_v30, %v5582_v31  ;;  %v5585_v19 = vpop.f32.mrb[26].mxu1  ;;  %v8240_v56 = vadd.f32 %v5450_v43, %v5449_v14  ;;  %v6998_v30 = vld [vmem:[#allocation9 + $0xc8] sm:$0xff]   ;;  %v6999_v14 = vld [vmem:[#allocation9 + $0x110] sm:$0xff]  }
 0x197   : > { %v5586_v17 = vpop.f32.mrb[27].mxu1  ;;  %2265 = vmatmul.mubr.bf16.gmra.mrb[132].mxu0 %v8051_v55 }
 0x198   : > { %v8234_v50 = vadd.f32 %v5586_v17, %v5585_v19  ;;  %2272 = vmatprep.mubr.bf16.mxu0 %v7675_v21  ;;  %5805 = vmatpush3.bf16.msra.mxu0 %v6998_v30 }
 0x199   : > { %5806 = vmatprep.subr.bf16.mxu0 %v6999_v14 }
 0x19a   : > { %v5452_v38 = vpop.f32.mrb[28].mxu0 }
 0x19b   : > { %v5453_v41 = vpop.f32.mrb[29].mxu0 }
 0x19c   : > { %v5588_v54 = vpop.f32.mrb[28].mxu1  ;;  %v5455_v22 = vpop.f32.mrb[30].mxu0  ;;  %v8246_v9 = vadd.f32 %v5453_v41, %v5452_v38 }
 0x19d   : > { %v5589_v52 = vpop.f32.mrb[29].mxu1  ;;  %v5456_v19 = vpop.f32.mrb[31].mxu0 }
 0x19e   : > { %v8238_v8 = vadd.f32 %v5589_v52, %v5588_v54  ;;  %v5591_v18 = vpop.f32.mrb[30].mxu1  ;;  %v8250_v21 = vadd.f32 %v5456_v19, %v5455_v22  ;;  %v7000_v54 = vld [vmem:[#allocation9 + $0x140] sm:$0xff]   ;;  %v7001_v52 = vld [vmem:[#allocation9 + $0xd0] sm:$0xff]  }
 0x19f   : > { %v5592_v39 = vpop.f32.mrb[31].mxu1  ;;  %2273 = vmatmul.mubr.bf16.gmra.mrb[136].mxu0 %v8062_v12  ;;  %6354 = vmatprep.subr.bf16.mxu1 %v7000_v54 }
 0x1a0   : > { %v8244_v5 = vadd.f32 %v5592_v39, %v5591_v18  ;;  %2280 = vmatprep.mubr.bf16.mxu0 %v7685_v37  ;;  %5807 = vmatpush3.bf16.msra.mxu0 %v7001_v52  ;;  %v7004_v37 = vld [vmem:[#allocation9 + $0xd8] sm:$0xff]  }
 0x1a1   : > { %6355 = vmatpush3.bf16.msra.mxu1 %v7000_v54  ;;  %5808 = vmatprep.subr.bf16.mxu0 %v7002_v51  ;;  %v7007_v54 = vld [vmem:[#allocation9 + $0xe0] sm:$0xff]   ;;  %v7009_v51 = vld [vmem:[#allocation9 + $0x158] sm:$0xff]  }
 0x1a2   : > { %v5458_v18 = vpop.f32.mrb[32].mxu0  ;;  %6356 = vmatprep.subr.bf16.mxu1 %v7003_v25 }
 0x1a3   : > { %v5459_v39 = vpop.f32.mrb[33].mxu0 }
 0x1a4   : > { %v5594_v31 = vpop.f32.mrb[32].mxu1  ;;  %v8256_v38 = vadd.f32 %v5459_v39, %v5458_v18  ;;  %v5461_v41 = vpop.f32.mrb[34].mxu0  ;;  %5809 = vmatpush3.bf16.msra.mxu0 %v7004_v37  ;;  %v7008_v39 = vld [vmem:[#allocation9 + $0x128] sm:$0xff]  }
 0x1a5   : > { %v5595_v17 = vpop.f32.mrb[33].mxu1  ;;  %v5462_v60 = vpop.f32.mrb[35].mxu0  ;;  %6357 = vmatpush3.bf16.msra.mxu1 %v7003_v25 }
 0x1a6   : > { %v8248_v55 = vadd.f32 %v5595_v17, %v5594_v31  ;;  %v5597_v15 = vpop.f32.mrb[34].mxu1  ;;  %v8258_v31 = vadd.f32 %v5462_v60, %v5461_v41 }
 0x1a7   : > { %v5598_v16 = vpop.f32.mrb[35].mxu1  ;;  %2281 = vmatmul.mubr.bf16.gmra.mrb[140].mxu0 %v8073_v36 }
 0x1a8   : > { %v8254_v43 = vadd.f32 %v5598_v16, %v5597_v15  ;;  %v7005_v15 = vld [vmem:[#allocation9 + $0x120] sm:$0xff]   ;;  %v7006_v16 = vld [vmem:[#allocation9 + $0x150] sm:$0xff]   ;;  %2288 = vmatprep.mubr.bf16.mxu0 %v7695_v45 }
 0x1a9   : > { %5810 = vmatprep.subr.bf16.mxu0 %v7005_v15  ;;  %6358 = vmatprep.subr.bf16.mxu1 %v7006_v16  ;;  %v7011_v15 = vld [vmem:[#allocation9 + $0x130] sm:$0xff]  }
 0x1aa   : > { %v5464_v52 = vpop.f32.mrb[36].mxu0  ;;  %6359 = vmatpush3.bf16.msra.mxu1 %v7006_v16  ;;  %5811 = vmatpush3.bf16.msra.mxu0 %v7007_v54  ;;  %v7012_v16 = vld [vmem:[#allocation9 + $0x160] sm:$0xff]   ;;  %v7013_v54 = vld [vmem:[#allocation9 + $0xf0] sm:$0xff]  }
 0x1ab   : > { %v5465_v18 = vpop.f32.mrb[37].mxu0  ;;  %5812 = vmatprep.subr.bf16.mxu0 %v7008_v39  ;;  %6360 = vmatprep.subr.bf16.mxu1 %v7009_v51 }
 0x1ac   : > { %v5600_v12 = vpop.f32.mrb[36].mxu1  ;;  %v8266_v41 = vadd.f32 %v5465_v18, %v5464_v52  ;;  %v5467_v25 = vpop.f32.mrb[38].mxu0 }
 0x1ad   : > { %v5601_v22 = vpop.f32.mrb[37].mxu1  ;;  %v5468_v60 = vpop.f32.mrb[39].mxu0 }
 0x1ae   : > { %v8260_v30 = vadd.f32 %v5601_v22, %v5600_v12  ;;  %v5603_v19 = vpop.f32.mrb[38].mxu1  ;;  %v7010_v12 = vld [vmem:[#allocation9 + $0xe8] sm:$0xff]   ;;  %v8268_v45 = vadd.f32 %v5468_v60, %v5467_v25  ;;  %6361 = vmatpush3.bf16.msra.mxu1 %v7009_v51  ;;  %v7014_v25 = vld [vmem:[#allocation9 + $0x138] sm:$0xff]  }
 0x1af   : > { %v5604_v17 = vpop.f32.mrb[39].mxu1  ;;  %2289 = vmatmul.mubr.bf16.gmra.mrb[144].mxu0 %v8088_v44  ;;  %6362 = vmatprep.subr.bf16.mxu1 %v7012_v16 }
 0x1b0   : > { %v8264_v14 = vadd.f32 %v5604_v17, %v5603_v19  ;;  %2296 = vmatprep.mubr.bf16.mxu0 %v7722_v23  ;;  %5813 = vmatpush3.bf16.msra.mxu0 %v7010_v12 }
 0x1b1   : > { %5814 = vmatprep.subr.bf16.mxu0 %v7011_v15 }
 0x1b2   : > { %v5470_v18 = vpop.f32.mrb[40].mxu0  ;;  %6363 = vmatpush3.bf16.msra.mxu1 %v7012_v16  ;;  %v7017_v16 = vld [vmem:[#allocation9 + $0x170] sm:$0xff]  }
 0x1b3   : > { %v5471_v39 = vpop.f32.mrb[41].mxu0 }
 0x1b4   : > { %v5606_v36 = vpop.f32.mrb[40].mxu1  ;;  %v8276_v60 = vadd.f32 %v5471_v39, %v5470_v18  ;;  %v5473_v51 = vpop.f32.mrb[42].mxu0  ;;  %5815 = vmatpush3.bf16.msra.mxu0 %v7013_v54 }
 0x1b5   : > { %v5607_v22 = vpop.f32.mrb[41].mxu1  ;;  %v5474_v6 = vpop.f32.mrb[43].mxu0  ;;  %5816 = vmatprep.subr.bf16.mxu0 %v7014_v25  ;;  %v7018_v25 = vld [vmem:[#allocation9 + $0x178] sm:$0xff]  }
 0x1b6   : > { %v8270_v37 = vadd.f32 %v5607_v22, %v5606_v36  ;;  %v5609_v19 = vpop.f32.mrb[42].mxu1  ;;  %v7015_v36 = vld [vmem:[#allocation9 + $0x168] sm:$0xff]   ;;  %v7016_v22 = vld [vmem:[#allocation9 + $0xf8] sm:$0xff]   ;;  %v8278_v23 = vadd.f32 %v5474_v6, %v5473_v51 }
 0x1b7   : > { %v5610_v17 = vpop.f32.mrb[43].mxu1  ;;  %6364 = vmatprep.subr.bf16.mxu1 %v7015_v36  ;;  %2297 = vmatmul.mubr.bf16.gmra.mrb[148].mxu0 %v8103_v32 }
 0x1b8   : > { %v8274_v52 = vadd.f32 %v5610_v17, %v5609_v19  ;;  %6365 = vmatpush3.bf16.msra.mxu1 %v7015_v36  ;;  %2304 = vmatprep.mubr.bf16.mxu0 %v7725_v1 }
 0x1b9   : > { %5817 = vmatpush3.bf16.msra.mxu0 %v7016_v22  ;;  %6366 = vmatprep.subr.bf16.mxu1 %v7017_v16 }
 0x1ba   : > { %9582 = vst [vmem:[#allocation16_spill] sm:$0xff] %v8274_v52  ;;  %v5476_v54 = vpop.f32.mrb[44].mxu0 }
 0x1bb   : > { %v5477_v18 = vpop.f32.mrb[45].mxu0 }
 0x1bc   : > { %v5612_v44 = vpop.f32.mrb[44].mxu1  ;;  %6367 = vmatpush3.bf16.msra.mxu1 %v7017_v16  ;;  %v8286_v39 = vadd.f32 %v5477_v18, %v5476_v54  ;;  %v5479_v6 = vpop.f32.mrb[46].mxu0 }
 0x1bd   : > { %v5613_v47 = vpop.f32.mrb[45].mxu1  ;;  %v5480_v51 = vpop.f32.mrb[47].mxu0  ;;  %6368 = vmatprep.subr.bf16.mxu1 %v7018_v25 }
 0x1be   : > { %v8280_v12 = vadd.f32 %v5613_v47, %v5612_v44  ;;  %v5615_v19 = vpop.f32.mrb[46].mxu1  ;;  %v8288_v44 = vadd.f32 %v5480_v51, %v5479_v6 }
 0x1bf   : > { %v5616_v17 = vpop.f32.mrb[47].mxu1  ;;  %2305 = vmatmul.mubr.bf16.gmra.mrb[152].mxu0 %v8114_v33 }
 0x1c0   : > { %v8284_v15 = vadd.f32 %v5616_v17, %v5615_v19  ;;  %6369 = vmatpush3.bf16.msra.mxu1 %v7018_v25  ;;  %2312 = vmatprep.mubr.bf16.mxu0 %v9573_v59 }
 0x1c2   : > { %9583 = vst [vmem:[#allocation20_spill] sm:$0xff] %v8284_v15  ;;  %v5482_v17 = vpop.f32.mrb[48].mxu0 }
 0x1c3   : > { %v5483_v16 = vpop.f32.mrb[49].mxu0 }
 0x1c4   : > { %v5618_v47 = vpop.f32.mrb[48].mxu1  ;;  %v8296_v54 = vadd.f32 %v5483_v16, %v5482_v17  ;;  %v5485_v18 = vpop.f32.mrb[50].mxu0 }
 0x1c5   : > { %v5619_v36 = vpop.f32.mrb[49].mxu1  ;;  %v5486_v6 = vpop.f32.mrb[51].mxu0 }
 0x1c6   : > { %v8290_v32 = vadd.f32 %v5619_v36, %v5618_v47  ;;  %v5621_v1 = vpop.f32.mrb[50].mxu1  ;;  %9586 = vst [vmem:[#allocation19_spill] sm:$0xff] %v8296_v54  ;;  %v8298_v47 = vadd.f32 %v5486_v6, %v5485_v18 }
 0x1c7   : > { %v5622_v22 = vpop.f32.mrb[51].mxu1  ;;  %2313 = vmatmul.mubr.bf16.gmra.mrb[156].mxu0 %v9573_v59 }
 0x1c8   : > { %9584 = vst [vmem:[#allocation18_spill] sm:$0xff] %v8290_v32  ;;  %v8294_v19 = vadd.f32 %v5622_v22, %v5621_v1  ;;  %9587 = vst [vmem:[#allocation23_spill] sm:$0xff] %v8298_v47 }
 0x1ca   : > { %9585 = vst [vmem:[#allocation22_spill] sm:$0xff] %v8294_v19  ;;  %v5488_v1 = vpop.f32.mrb[52].mxu0 }
 0x1cb   : > { %v5489_v22 = vpop.f32.mrb[53].mxu0 }
 0x1cc   : > { %v5624_v2 = vpop.f32.mrb[52].mxu1  ;;  %v8305_v19 = vadd.f32 %v5489_v22, %v5488_v1  ;;  %v5491_v17 = vpop.f32.mrb[54].mxu0 }
 0x1cd   : > { %v5625_v51 = vpop.f32.mrb[53].mxu1  ;;  %v5492_v54 = vpop.f32.mrb[55].mxu0 }
 0x1ce   : > { %v8300_v36 = vadd.f32 %v5625_v51, %v5624_v2  ;;  %v5627_v32 = vpop.f32.mrb[54].mxu1  ;;  %9590 = vst [vmem:[#allocation25_spill] sm:$0xff] %v8305_v19  ;;  %v8307_v15 = vadd.f32 %v5492_v54, %v5491_v17 }
 0x1cf   : > { %v5628_v33 = vpop.f32.mrb[55].mxu1 }
 0x1d0   : > { %9588 = vst [vmem:[#allocation21_spill] sm:$0xff] %v8300_v36  ;;  %v8303_v25 = vadd.f32 %v5628_v33, %v5627_v32  ;;  %9591 = vst [vmem:[#allocation26_spill] sm:$0xff] %v8307_v15 }
 0x1d2   : > { %9589 = vst [vmem:[#allocation24_spill] sm:$0xff] %v8303_v25  ;;  %v5494_v59 = vpop.f32.mrb[56].mxu0 }
 0x1d3   : > { %v5495_v47 = vpop.f32.mrb[57].mxu0 }
 0x1d4   : > { %v5630_v16 = vpop.f32.mrb[56].mxu1  ;;  %v8313_v32 = vadd.f32 %v5495_v47, %v5494_v59  ;;  %v5497_v33 = vpop.f32.mrb[58].mxu0 }
 0x1d5   : > { %v5631_v52 = vpop.f32.mrb[57].mxu1  ;;  %v5498_v1 = vpop.f32.mrb[59].mxu0 }
 0x1d6   : > { %v8309_v18 = vadd.f32 %v5631_v52, %v5630_v16  ;;  %v5633_v2 = vpop.f32.mrb[58].mxu1  ;;  %9594 = vst [vmem:[#allocation29_spill] sm:$0xff] %v8313_v32  ;;  %v8315_v36 = vadd.f32 %v5498_v1, %v5497_v33 }
 0x1d7   : > { %v5634_v6 = vpop.f32.mrb[59].mxu1 }
 0x1d8   : > { %9592 = vst [vmem:[#allocation27_spill] sm:$0xff] %v8309_v18  ;;  %v8311_v51 = vadd.f32 %v5634_v6, %v5633_v2 }
 0x1da   : > { %9593 = vst [vmem:[#allocation28_spill] sm:$0xff] %v8311_v51  ;;  %v5500_v16 = vpop.f32.mrb[60].mxu0 }
 0x1db   : > { %v5501_v18 = vpop.f32.mrb[61].mxu0 }
 0x1dc   : > { %v5636_v25 = vpop.f32.mrb[60].mxu1  ;;  %v8321_v2 = vadd.f32 %v5501_v18, %v5500_v16  ;;  %v5503_v6 = vpop.f32.mrb[62].mxu0 }
 0x1dd   : > { %v5637_v22 = vpop.f32.mrb[61].mxu1  ;;  %v5504_v51 = vpop.f32.mrb[63].mxu0 }
 0x1de   : > { %v8317_v19 = vadd.f32 %v5637_v22, %v5636_v25  ;;  %v5639_v54 = vpop.f32.mrb[62].mxu1  ;;  %v8323_v59 = vadd.f32 %v5504_v51, %v5503_v6 }
 0x1df   : > { %v5640_v17 = vpop.f32.mrb[63].mxu1 }
 0x1e0   : > { %v8319_v52 = vadd.f32 %v5640_v17, %v5639_v54 }
 0x1e2   : > { %v6228_v47 = vpop.f32.mrb[64].mxu0 }
 0x1e3   : > { %v1331_v32 = vadd.f32 %v6228_v47, %v8181_v26  ;;  %v1322_v15 = vpop.f32.mrb[65].mxu0 }
 0x1e4   : > { %v1323_v33 = vadd.f32 %v8169_v57, %v1322_v15  ;;  %v6229_v25 = vpop.f32.mrb[66].mxu0 }
 0x1e5   : > { %v8328_v1 = vadd.f32 %v8171_v4, %v1331_v32  ;;  %v1334_v22 = vadd.f32 %v6229_v25, %v8185_v24  ;;  %v1325_v54 = vpop.f32.mrb[67].mxu0 }
 0x1e6   : > { %v8332_v18 = vadd.f32 %v8161_v27, %v1323_v33  ;;  %v1326_v17 = vadd.f32 %v8173_v46, %v1325_v54 }
 0x1e7   : > { %v8336_v51 = vadd.f32 %v8177_v40, %v1334_v22 }
 0x1e8   : > { %v8339_v26 = vadd.f32 %v8165_v61, %v1326_v17 }
 0x1ea   : > { %v6232_v16 = vpop.f32.mrb[68].mxu0 }
 0x1eb   : > { %v1347_v57 = vadd.f32 %v6232_v16, %v8205_v35  ;;  %v1338_v15 = vpop.f32.mrb[69].mxu0 }
 0x1ec   : > { %v1339_v4 = vadd.f32 %v8193_v42, %v1338_v15  ;;  %v6233_v32 = vpop.f32.mrb[70].mxu0 }
 0x1ed   : > { %v8344_v24 = vadd.f32 %v8195_v7, %v1347_v57  ;;  %v1350_v27 = vadd.f32 %v6233_v32, %v8209_v29  ;;  %v1341_v6 = vpop.f32.mrb[71].mxu0 }
 0x1ee   : > { %v8348_v46 = vadd.f32 %v8183_v53, %v1339_v4  ;;  %v1342_v40 = vadd.f32 %v8197_v20, %v1341_v6 }
 0x1ef   : > { %v8352_v61 = vadd.f32 %v8201_v11, %v1350_v27 }
 0x1f0   : > { %v8355_v35 = vadd.f32 %v8189_v49, %v1342_v40 }
 0x1f2   : > { %v6236_v47 = vpop.f32.mrb[72].mxu0 }
 0x1f3   : > { %v1363_v42 = vadd.f32 %v6236_v47, %v8226_v62  ;;  %v1354_v33 = vpop.f32.mrb[73].mxu0 }
 0x1f4   : > { %v1355_v7 = vadd.f32 %v8216_v13, %v1354_v33  ;;  %v6237_v25 = vpop.f32.mrb[74].mxu0 }
 0x1f5   : > { %v8360_v29 = vadd.f32 %v8218_v63, %v1363_v42  ;;  %v1366_v53 = vadd.f32 %v6237_v25, %v8230_v10  ;;  %v1357_v22 = vpop.f32.mrb[75].mxu0  ;;  %v9596_v25 = vld [vmem:[#allocation16_spill] sm:$0xff] }
 0x1f6   : > { %v8364_v20 = vadd.f32 %v8207_v58, %v1355_v7  ;;  %v1358_v11 = vadd.f32 %v8220_v3, %v1357_v22 }
 0x1f7   : > { %v8368_v49 = vadd.f32 %v8224_v28, %v1366_v53 }
 0x1f8   : > { %v8371_v62 = vadd.f32 %v8213_v48, %v1358_v11  ;;  %v8383_v48 = vld [vmem:[#allocation9 + $0x80] sm:$0xff]  }
 0x1f9   : > { %6402 = vmatprep.subr.bf16.mxu1 %v8383_v48 }
 0x1fa   : > { %v6240_v54 = vpop.f32.mrb[76].mxu0 }
 0x1fb   : > { %v1379_v13 = vadd.f32 %v6240_v54, %v8246_v9  ;;  %v1370_v17 = vpop.f32.mrb[77].mxu0 }
 0x1fc   : > { %v1371_v63 = vadd.f32 %v8236_v34, %v1370_v17  ;;  %v6241_v16 = vpop.f32.mrb[78].mxu0 }
 0x1fd   : > { %v8376_v10 = vadd.f32 %v8238_v8, %v1379_v13  ;;  %v1382_v58 = vadd.f32 %v6241_v16, %v8250_v21  ;;  %v1373_v57 = vpop.f32.mrb[79].mxu0 }
 0x1fe   : > { %v8380_v3 = vadd.f32 %v8228_v0, %v1371_v63  ;;  %v1374_v28 = vadd.f32 %v8240_v56, %v1373_v57  ;;  %v9602_v57 = vld [vmem:[#allocation23_spill] sm:$0xff] }
 0x1ff   : > { %v8386_v15 = vadd.f32 %v8244_v5, %v1382_v58 }
 0x200   : > { %v8389_v9 = vadd.f32 %v8234_v50, %v1374_v28 }
 0x202   : > { %v6244_v34 = vpop.f32.mrb[80].mxu0 }
 0x203   : > { %v1395_v8 = vadd.f32 %v6244_v34, %v8266_v41  ;;  %v1386_v21 = vpop.f32.mrb[81].mxu0  ;;  %v9603_v34 = vld [vmem:[#allocation24_spill] sm:$0xff] }
 0x204   : > { %v1387_v4 = vadd.f32 %v8256_v38, %v1386_v21  ;;  %v6245_v0 = vpop.f32.mrb[82].mxu0  ;;  %v9604_v21 = vld [vmem:[#allocation22_spill] sm:$0xff] }
 0x205   : > { %v8395_v32 = vadd.f32 %v8260_v30, %v1395_v8  ;;  %v1398_v56 = vadd.f32 %v6245_v0, %v8268_v45  ;;  %v1389_v27 = vpop.f32.mrb[83].mxu0  ;;  %v7023_v0 = vld [vmem:[#allocation9 + $0x40] sm:$0xff]  }
 0x206   : > { %v8399_v5 = vadd.f32 %v8248_v55, %v1387_v4  ;;  %v1390_v50 = vadd.f32 %v8258_v31, %v1389_v27  ;;  %5938 = vmatprep.subr.bf16.mxu0 %v7023_v0 }
 0x207   : > { %v8403_v6 = vadd.f32 %v8264_v14, %v1398_v56 }
 0x208   : > { %v8406_v41 = vadd.f32 %v8254_v43, %v1390_v50  ;;  %v9595_v43 = vld [vmem:[#allocation20_spill] sm:$0xff] }
 0x20a   : > { %v6248_v40 = vpop.f32.mrb[84].mxu0 }
 0x20b   : > { %v1411_v38 = vadd.f32 %v6248_v40, %v8286_v39  ;;  %v1402_v47 = vpop.f32.mrb[85].mxu0  ;;  %v9605_v40 = vld [vmem:[#allocation29_spill] sm:$0xff] }
 0x20c   : > { %v1403_v30 = vadd.f32 %v8276_v60, %v1402_v47  ;;  %v6249_v42 = vpop.f32.mrb[86].mxu0  ;;  %v9597_v60 = vld [vmem:[#allocation25_spill] sm:$0xff] }
 0x20d   : > { %v8411_v45 = vadd.f32 %v8280_v12, %v1411_v38  ;;  %v1414_v55 = vadd.f32 %v6249_v42, %v8288_v44  ;;  %v1405_v33 = vpop.f32.mrb[87].mxu0  ;;  %v9598_v12 = vld [vmem:[#allocation19_spill] sm:$0xff]  ;;  %v9599_v44 = vld [vmem:[#allocation21_spill] sm:$0xff] }
 0x20e   : > { %v8415_v31 = vadd.f32 %v8270_v37, %v1403_v30  ;;  %v1406_v14 = vadd.f32 %v8278_v23, %v1405_v33  ;;  %v9600_v37 = vld [vmem:[#allocation26_spill] sm:$0xff] }
 0x20f   : > { %v8419_v7 = vadd.f32 %v9595_v43, %v1414_v55  ;;  %v9601_v23 = vld [vmem:[#allocation18_spill] sm:$0xff]  ;;  %v9607_v43 = vld [vmem:[#allocation27_spill] sm:$0xff] }
 0x210   : > { %v8422_v39 = vadd.f32 %v9596_v25, %v1406_v14 }
 0x212   : > { %v6252_v53 = vpop.f32.mrb[88].mxu0 }
 0x213   : > { %v1427_v22 = vadd.f32 %v6252_v53, %v9597_v60  ;;  %v1418_v11 = vpop.f32.mrb[89].mxu0 }
 0x214   : > { %v1419_v54 = vadd.f32 %v9598_v12, %v1418_v11  ;;  %v6253_v13 = vpop.f32.mrb[90].mxu0  ;;  %v9610_v11 = vld [vmem:[#allocation28_spill] sm:$0xff] }
 0x215   : > { %v8427_v17 = vadd.f32 %v9599_v44, %v1427_v22  ;;  %v1430_v63 = vadd.f32 %v6253_v13, %v9600_v37  ;;  %v1421_v16 = vpop.f32.mrb[91].mxu0 }
 0x216   : > { %v8431_v58 = vadd.f32 %v9601_v23, %v1419_v54  ;;  %v1422_v28 = vadd.f32 %v9602_v57, %v1421_v16 }
 0x217   : > { %v8435_v8 = vadd.f32 %v9603_v34, %v1430_v63 }
 0x218   : > { %v8438_v4 = vadd.f32 %v9604_v21, %v1422_v28  ;;  %v8472_v21 = vld [vmem:[%s9483_s3 + $0x1] ss:$0 sm:$0xff] }
 0x21a   : > { %v6256_v56 = vpop.f32.mrb[92].mxu0 }
 0x21b   : > { %v1443_v27 = vadd.f32 %v6256_v56, %v8321_v2  ;;  %v1434_v50 = vpop.f32.mrb[93].mxu0 }
 0x21c   : > { %v1435_v38 = vadd.f32 %v9605_v40, %v1434_v50  ;;  %v6257_v47 = vpop.f32.mrb[94].mxu0 }
 0x21d   : > { %v8443_v42 = vadd.f32 %v8317_v19, %v1443_v27  ;;  %v1446_v55 = vadd.f32 %v6257_v47, %v8323_v59  ;;  %v1437_v33 = vpop.f32.mrb[95].mxu0 }
 0x21e   : > { %v8447_v25 = vadd.f32 %v9607_v43, %v1435_v38  ;;  %v1438_v53 = vadd.f32 %v8315_v36, %v1437_v33 }
 0x21f   : > { %9606 = vst [vmem:[#allocation20_spill] sm:$0xff] %v8443_v42  ;;  %v8451_v2 = vadd.f32 %v8319_v52, %v1446_v55  ;;  %v8464_v52 = vld [vmem:[%s9483_s3] ss:$0 sm:$0xff] }
 0x220   : > { %9608 = vst [vmem:[#allocation16_spill] sm:$0xff] %v8447_v25  ;;  %v8454_v12 = vadd.f32 %v9610_v11, %v1438_v53 }
 0x221   : > { %9609 = vst [vmem:[#allocation25_spill] sm:$0xff] %v8451_v2  ;;  %v7026_v2 = vld [vmem:[#allocation9 + $0x48] sm:$0xff]  }
 0x222   : > { %9611 = vst [vmem:[#allocation19_spill] sm:$0xff] %v8454_v12  ;;  %v5682_v54 = vpop.f32.mrb[96].mxu0 }
 0x223   : > { %v5683_v19 = vpop.f32.mrb[97].mxu0 }
 0x224   : > { %v6324_v30 = vpop.f32.mrb[64].mxu1  ;;  %v5684_v13 = vadd.f32 %v5683_v19, %v5682_v54  ;;  %v5685_v44 = vpop.f32.mrb[98].mxu0 }
 0x225   : > { %v2355_v14 = vpop.f32.mrb[65].mxu1  ;;  %v5686_v37 = vpop.f32.mrb[99].mxu0 }
 0x226   : > { %v6325_v60 = vpop.f32.mrb[66].mxu1  ;;  %v6504_v16 = vadd.f32 %v5684_v13, %v8332_v18  ;;  %v5687_v23 = vadd.f32 %v5686_v37, %v5685_v44 }
 0x227   : > { %v2358_v22 = vpop.f32.mrb[67].mxu1 }
 0x228   : > { %v6505_v28 = vadd.f32 %v6504_v16, %v2355_v14  ;;  %v6512_v34 = vadd.f32 %v5687_v23, %v8339_v26 }
 0x22a   : > { %v2518_v18 = vmul.f32 %v6505_v28, %v8464_v52  ;;  %v6513_v0 = vadd.f32 %v6512_v34, %v2358_v22  ;;  %v5688_v56 = vpop.f32.mrb[100].mxu0 }
 0x22b   : > { %v5689_v27 = vpop.f32.mrb[101].mxu0 }
 0x22c   : > { %v8456_v59 = vpop.f32.mrb[68].mxu1  ;;  %v2554_v50 = vadd.f32 %v8472_v21, %v2518_v18  ;;  %v2519_v40 = vmul.f32 %v6513_v0, %v8464_v52  ;;  %v5690_v38 = vadd.f32 %v5689_v27, %v5688_v56  ;;  %v5691_v47 = vpop.f32.mrb[102].mxu0 }
 0x22d   : > { %v2371_v63 = vpop.f32.mrb[69].mxu1  ;;  %v5692_v33 = vpop.f32.mrb[103].mxu0 }
 0x22e   : > { %v8459_v36 = vpop.f32.mrb[70].mxu1  ;;  %v2586_v14 = vmax.f32 %v2554_v50, 0.0  ;;  %v2555_v43 = vadd.f32 %v8472_v21, %v2519_v40  ;;  %v6500_v53 = vadd.f32 %v5690_v38, %v8328_v1  ;;  %v5693_v11 = vadd.f32 %v5692_v33, %v5691_v47 }
 0x22f   : > { %v8466_v57 = vpop.f32.mrb[71].mxu1 }
 0x230   : > { %v2587_v19 = vmax.f32 %v2555_v43, 0.0  ;;  %v6501_v13 = vadd.f32 %v6500_v53, %v6324_v30  ;;  %v6508_v44 = vadd.f32 %v5693_v11, %v8336_v51  ;;  %v2618_v37 = vrot.slane %v2586_v14, 7  ;;  %v9614_v43 = vld [vmem:[#allocation17_spill] sm:$0xff] }
 0x231   : > { %v2714_v56 = vrot.slane %v2586_v14, 1 }
 0x232   : > { %v2634_v16 = vrot.slane %v2587_v19, 7  ;;  %v2520_v23 = vmul.f32 %v6501_v13, %v8464_v52  ;;  %v6509_v28 = vadd.f32 %v6508_v44, %v6325_v60  ;;  %v5694_v34 = vpop.f32.mrb[104].mxu0  ;;  %v8489_v18 = vpack.c.bf16 %v2587_v19, %v2586_v14 }
 0x233   : > { %v5695_v0 = vpop.f32.mrb[105].mxu0  ;;  %v2730_v1 = vrot.slane %v2587_v19, 1 }
 0x234   : > { %v8477_v55 = vpop.f32.mrb[72].mxu1  ;;  %9612 = vst [vmem:[#allocation21_spill] sm:$0xff] %v8489_v18  ;;  %v2666_v50 = vsel %vm443_vm2, %v2634_v16, %v2618_v37  ;;  %v2556_v40 = vadd.f32 %v8472_v21, %v2520_v23  ;;  %v2521_v30 = vmul.f32 %v6509_v28, %v8464_v52  ;;  %v5696_v38 = vadd.f32 %v5695_v0, %v5694_v34  ;;  %v5697_v51 = vpop.f32.mrb[106].mxu0  ;;  %v9615_v28 = vld [vmem:[#allocation15_spill] sm:$0xff] }
 0x235   : > { %v8479_v26 = vpop.f32.mrb[73].mxu1  ;;  %3286 = vmatprep.mubr.bf16.mxu0 %v8489_v18  ;;  %v5698_v60 = vpop.f32.mrb[107].mxu0  ;;  %v2650_v33 = vsel %vm443_vm2, %v2618_v37, %v2634_v16  ;;  %v2682_v14 = vmul.f32 %v9614_v43, %v2666_v50  ;;  %v2746_v53 = vsel %vm540_vm3, %v2714_v56, %v2730_v1  ;;  %v2762_v11 = vsel %vm540_vm3, %v2730_v1, %v2714_v56  ;;  %v7025_v37 = vld [vmem:[#allocation9] sm:$0xff]  }
 0x236   : > { %v8483_v22 = vpop.f32.mrb[74].mxu1  ;;  %v2557_v13 = vadd.f32 %v8472_v21, %v2521_v30  ;;  %v6520_v44 = vadd.f32 %v5696_v38, %v8348_v46  ;;  %v5699_v23 = vadd.f32 %v5698_v60, %v5697_v51  ;;  %v2779_v34 = vmul.f32 %v9615_v28, %v2762_v11  ;;  %v7028_v11 = vld [vmem:[#allocation9 + $0x50] sm:$0xff]  }
 0x237   : > { %v8485_v54 = vpop.f32.mrb[75].mxu1  ;;  %v8512_v16 = vpack.c.bf16 %v2650_v33, %v2682_v14  ;;  %v2588_v50 = vmax.f32 %v2556_v40, 0.0 }
 0x238   : > { %v6521_v42 = vadd.f32 %v6520_v44, %v2371_v63  ;;  %v6528_v56 = vadd.f32 %v5699_v23, %v8355_v35  ;;  %v8517_v1 = vpack.c.bf16 %v2779_v34, %v2746_v53  ;;  %v2589_v30 = vmax.f32 %v2557_v13, 0.0  ;;  %v7027_v63 = vld [vmem:[#allocation9 + $0x8] sm:$0xff]  }
 0x239   : > { %9616 = vst [vmem:[#allocation26_spill] sm:$0xff] %v8512_v16  ;;  %3287 = vmatmul.mubr.bf16.vlgmr.msra.gmra.mrb[160].mxu0 %v8512_v16  ;;  %v2715_v46 = vrot.slane %v2588_v50, 1  ;;  %v2619_v35 = vrot.slane %v2588_v50, 7 }
 0x23a   : > { %9617 = vst [vmem:[#allocation18_spill] sm:$0xff] %v8517_v1  ;;  %v2522_v38 = vmul.f32 %v6521_v42, %v8464_v52  ;;  %v6529_v51 = vadd.f32 %v6528_v56, %v8466_v57  ;;  %6370 = vmatprep.mubr.bf16.mxu1 %v8517_v1  ;;  %v5700_v60 = vpop.f32.mrb[108].mxu0  ;;  %v2731_v40 = vrot.slane %v2589_v30, 1  ;;  %v8523_v33 = vpack.c.bf16 %v2589_v30, %v2588_v50 }
 0x23b   : > { %5939 = vmatpush3.bf16.msra.mxu0 %v7025_v37  ;;  %v5701_v14 = vpop.f32.mrb[109].mxu0  ;;  %v2635_v53 = vrot.slane %v2589_v30, 7 }
 0x23c   : > { %v8496_v47 = vpop.f32.mrb[76].mxu1  ;;  %9618 = vst [vmem:[#allocation23_spill] sm:$0xff] %v8523_v33  ;;  %5940 = vmatprep.subr.bf16.mxu0 %v7026_v2  ;;  %v2558_v13 = vadd.f32 %v8472_v21, %v2522_v38  ;;  %v2523_v44 = vmul.f32 %v6529_v51, %v8464_v52  ;;  %v5702_v42 = vadd.f32 %v5701_v14, %v5700_v60  ;;  %v5703_v23 = vpop.f32.mrb[110].mxu0 }
 0x23d   : > { %v8505_v19 = vpop.f32.mrb[77].mxu1  ;;  %3294 = vmatprep.mubr.bf16.mxu0 %v8523_v33  ;;  %v2747_v57 = vsel %vm540_vm3, %v2715_v46, %v2731_v40  ;;  %v5704_v37 = vpop.f32.mrb[111].mxu0  ;;  %v2651_v50 = vsel %vm443_vm2, %v2619_v35, %v2635_v53  ;;  %v2667_v2 = vsel %vm443_vm2, %v2635_v53, %v2619_v35  ;;  %v2763_v56 = vsel %vm540_vm3, %v2731_v40, %v2715_v46  ;;  %v7030_v35 = vld [vmem:[#allocation9 + $0x10] sm:$0xff]  }
 0x23e   : > { %v8510_v0 = vpop.f32.mrb[78].mxu1  ;;  %v2559_v38 = vadd.f32 %v8472_v21, %v2523_v44  ;;  %v6516_v51 = vadd.f32 %v5702_v42, %v8344_v24  ;;  %v5705_v60 = vadd.f32 %v5704_v37, %v5703_v23  ;;  %v2684_v14 = vmul.f32 %v9614_v43, %v2667_v2  ;;  %v7031_v23 = vld [vmem:[#allocation9 + $0x58] sm:$0xff]  }
 0x23f   : > { %v8514_v18 = vpop.f32.mrb[79].mxu1  ;;  %5941 = vmatpush3.bf16.msra.mxu0 %v7027_v63  ;;  %v2781_v16 = vmul.f32 %v9615_v28, %v2763_v56  ;;  %v2590_v1 = vmax.f32 %v2558_v13, 0.0 }
 0x240   : > { %5942 = vmatprep.subr.bf16.mxu0 %v7028_v11  ;;  %v6517_v46 = vadd.f32 %v6516_v51, %v8456_v59  ;;  %v6524_v40 = vadd.f32 %v5705_v60, %v8352_v61  ;;  %v8550_v53 = vpack.c.bf16 %v2651_v50, %v2684_v14  ;;  %v2591_v24 = vmax.f32 %v2559_v38, 0.0  ;;  %v7020_v59 = vld [vmem:[#allocation9 + $0x88] sm:$0xff]  }
 0x241   : > { %v8552_v44 = vpack.c.bf16 %v2781_v16, %v2747_v57  ;;  %v2620_v42 = vrot.slane %v2590_v1, 7  ;;  %v2716_v50 = vrot.slane %v2590_v1, 1  ;;  %v7032_v16 = vld [vmem:[#allocation9 + $0x18] sm:$0xff]   ;;  %v9632_v27 = vld [vmem:[#allocation18_spill] sm:$0xff] }
 0x242   : > { %9619 = vst [vmem:[#allocation24_spill] sm:$0xff] %v8550_v53  ;;  %v2524_v63 = vmul.f32 %v6517_v46, %v8464_v52  ;;  %v6525_v37 = vadd.f32 %v6524_v40, %v8459_v36  ;;  %3295 = vmatmul.mubr.bf16.gmra.mrb[164].mxu0 %v8550_v53  ;;  %v5706_v13 = vpop.f32.mrb[112].mxu0  ;;  %v8557_v11 = vpack.c.bf16 %v2591_v24, %v2590_v1  ;;  %v2636_v2 = vrot.slane %v2591_v24, 7  ;;  %v7033_v46 = vld [vmem:[#allocation9 + $0x60] sm:$0xff]  }
 0x243   : > { %9620 = vst [vmem:[#allocation22_spill] sm:$0xff] %v8552_v44  ;;  %6371 = vmatmul.mubr.bf16.vlgmr.msra.gmra.mrb[96].mxu1 %v8552_v44  ;;  %v5707_v61 = vpop.f32.mrb[113].mxu0  ;;  %v2732_v56 = vrot.slane %v2591_v24, 1  ;;  %5943 = vmatpush3.bf16.msra.mxu0 %v7030_v35 }
 0x244   : > { %v8530_v34 = vpop.f32.mrb[80].mxu1  ;;  %9621 = vst [vmem:[#allocation29_spill] sm:$0xff] %v8557_v11  ;;  %v2560_v57 = vadd.f32 %v8472_v21, %v2524_v63  ;;  %v2525_v38 = vmul.f32 %v6525_v37, %v8464_v52  ;;  %v5708_v51 = vadd.f32 %v5707_v61, %v5706_v13  ;;  %v5709_v36 = vpop.f32.mrb[114].mxu0  ;;  %3302 = vmatprep.mubr.bf16.mxu0 %v8557_v11 }
 0x245   : > { %v8538_v30 = vpop.f32.mrb[81].mxu1  ;;  %v2652_v60 = vsel %vm443_vm2, %v2620_v42, %v2636_v2  ;;  %v5710_v40 = vpop.f32.mrb[115].mxu0  ;;  %v2668_v1 = vsel %vm443_vm2, %v2636_v2, %v2620_v42  ;;  %v2748_v35 = vsel %vm540_vm3, %v2716_v50, %v2732_v56  ;;  %v2764_v24 = vsel %vm540_vm3, %v2732_v56, %v2716_v50  ;;  %6403 = vmatpush3.bf16.msra.mxu1 %v8383_v48  ;;  %v7021_v42 = vld [vmem:[#allocation9 + $0x90] sm:$0xff]   ;;  %v7035_v56 = vld [vmem:[#allocation9 + $0x20] sm:$0xff]  }
 0x246   : > { %v8543_v33 = vpop.f32.mrb[82].mxu1  ;;  %5944 = vmatprep.subr.bf16.mxu0 %v7031_v23  ;;  %v2561_v37 = vadd.f32 %v8472_v21, %v2525_v38  ;;  %v6536_v13 = vadd.f32 %v5708_v51, %v8364_v20  ;;  %v5711_v61 = vadd.f32 %v5710_v40, %v5709_v36  ;;  %v2686_v11 = vmul.f32 %v9614_v43, %v2668_v1  ;;  %v7036_v40 = vld [vmem:[#allocation9 + $0x68] sm:$0xff]  }
 0x247   : > { %v8546_v12 = vpop.f32.mrb[83].mxu1  ;;  %6404 = vmatprep.subr.bf16.mxu1 %v7020_v59  ;;  %v2783_v2 = vmul.f32 %v9615_v28, %v2764_v24  ;;  %v2592_v44 = vmax.f32 %v2560_v57, 0.0  ;;  %5945 = vmatpush3.bf16.msra.mxu0 %v7032_v16 }
 0x248   : > { %v6537_v48 = vadd.f32 %v6536_v13, %v8479_v26  ;;  %v6544_v23 = vadd.f32 %v5711_v61, %v8371_v62  ;;  %v8586_v38 = vpack.c.bf16 %v2652_v60, %v2686_v11  ;;  %v2593_v20 = vmax.f32 %v2561_v37, 0.0  ;;  %5946 = vmatprep.subr.bf16.mxu0 %v7033_v46  ;;  %v7022_v62 = vld [vmem:[#allocation9 + $0x98] sm:$0xff]  }
 0x249   : > { %v8588_v51 = vpack.c.bf16 %v2783_v2, %v2748_v35  ;;  %v2621_v36 = vrot.slane %v2592_v44, 7  ;;  %6405 = vmatpush3.bf16.msra.mxu1 %v7020_v59  ;;  %v2717_v60 = vrot.slane %v2592_v44, 1  ;;  %v7037_v59 = vld [vmem:[#allocation9 + $0x28] sm:$0xff]  }
 0x24a   : > { %9622 = vst [vmem:[#allocation27_spill] sm:$0xff] %v8586_v38  ;;  %v2526_v1 = vmul.f32 %v6537_v48, %v8464_v52  ;;  %v6545_v57 = vadd.f32 %v6544_v23, %v8485_v54  ;;  %3303 = vmatmul.mubr.bf16.gmra.mrb[168].mxu0 %v8586_v38  ;;  %v5712_v16 = vpop.f32.mrb[116].mxu0  ;;  %v8593_v24 = vpack.c.bf16 %v2593_v20, %v2592_v44  ;;  %v2637_v26 = vrot.slane %v2593_v20, 7  ;;  %v7038_v48 = vld [vmem:[#allocation9 + $0x70] sm:$0xff]  }
 0x24b   : > { %9623 = vst [vmem:[#allocation28_spill] sm:$0xff] %v8588_v51  ;;  %6406 = vmatprep.subr.bf16.mxu1 %v7021_v42  ;;  %6374 = vmatprep.mubr.bf16.mxu1 %v8588_v51  ;;  %v5713_v11 = vpop.f32.mrb[117].mxu0  ;;  %v2733_v46 = vrot.slane %v2593_v20, 1 }
 0x24c   : > { %v8565_v14 = vpop.f32.mrb[84].mxu1  ;;  %9624 = vst [vmem:[#allocation14_spill] sm:$0xff] %v8593_v24  ;;  %5947 = vmatpush3.bf16.msra.mxu0 %v7035_v56  ;;  %v2562_v35 = vadd.f32 %v8472_v21, %v2526_v1  ;;  %v2527_v37 = vmul.f32 %v6545_v57, %v8464_v52  ;;  %v5714_v54 = vadd.f32 %v5713_v11, %v5712_v16  ;;  %v5715_v13 = vpop.f32.mrb[118].mxu0 }
 0x24d   : > { %v8573_v63 = vpop.f32.mrb[85].mxu1  ;;  %3310 = vmatprep.mubr.bf16.mxu0 %v8593_v24  ;;  %v2653_v61 = vsel %vm443_vm2, %v2621_v36, %v2637_v26  ;;  %v5716_v23 = vpop.f32.mrb[119].mxu0  ;;  %v2669_v44 = vsel %vm443_vm2, %v2637_v26, %v2621_v36  ;;  %v2749_v56 = vsel %vm540_vm3, %v2717_v60, %v2733_v46  ;;  %v2765_v20 = vsel %vm540_vm3, %v2733_v46, %v2717_v60  ;;  %v7024_v36 = vld [vmem:[#allocation9 + $0xa0] sm:$0xff]   ;;  %v7040_v60 = vld [vmem:[#allocation9 + $0x30] sm:$0xff]  }
 0x24e   : > { %v8579_v53 = vpop.f32.mrb[86].mxu1  ;;  %6407 = vmatpush3.bf16.msra.mxu1 %v7021_v42  ;;  %5948 = vmatprep.subr.bf16.mxu0 %v7036_v40  ;;  %v2563_v57 = vadd.f32 %v8472_v21, %v2527_v37  ;;  %v6532_v16 = vadd.f32 %v5714_v54, %v8360_v29  ;;  %v5717_v11 = vadd.f32 %v5716_v23, %v5715_v13  ;;  %v2594_v51 = vmax.f32 %v2562_v35, 0.0  ;;  %v7041_v13 = vld [vmem:[#allocation9 + $0x78] sm:$0xff]  }
 0x24f   : > { %v8582_v50 = vpop.f32.mrb[87].mxu1  ;;  %v2688_v24 = vmul.f32 %v9614_v43, %v2669_v44  ;;  %6408 = vmatprep.subr.bf16.mxu1 %v7022_v62  ;;  %v2785_v26 = vmul.f32 %v9615_v28, %v2765_v20 }
 0x250   : > { %5949 = vmatpush3.bf16.msra.mxu0 %v7037_v59  ;;  %v6533_v42 = vadd.f32 %v6532_v16, %v8477_v55  ;;  %v6540_v40 = vadd.f32 %v5717_v11, %v8368_v49  ;;  %v2595_v29 = vmax.f32 %v2563_v57, 0.0  ;;  %v2622_v54 = vrot.slane %v2594_v51, 7  ;;  %v7029_v49 = vld [vmem:[#allocation9 + $0xa8] sm:$0xff]  }
 0x251   : > { %v8621_v46 = vpack.c.bf16 %v2653_v61, %v2688_v24  ;;  %5950 = vmatprep.subr.bf16.mxu0 %v7038_v48  ;;  %v8623_v37 = vpack.c.bf16 %v2785_v26, %v2749_v56  ;;  %v2718_v61 = vrot.slane %v2594_v51, 1 }
 0x252   : > { %6409 = vmatpush3.bf16.msra.mxu1 %v7022_v62  ;;  %v2528_v23 = vmul.f32 %v6533_v42, %v8464_v52  ;;  %v6541_v35 = vadd.f32 %v6540_v40, %v8483_v22  ;;  %v5718_v59 = vpop.f32.mrb[120].mxu0  ;;  %v8628_v44 = vpack.c.bf16 %v2595_v29, %v2594_v51  ;;  %v2638_v55 = vrot.slane %v2595_v29, 7  ;;  %v7042_v62 = vld [vmem:[#allocation9 + $0x38] sm:$0xff]  }
 0x253   : > { %9625 = vst [vmem:[#allocation17_spill] sm:$0xff] %v8621_v46  ;;  %3311 = vmatmul.mubr.bf16.gmra.mrb[172].mxu0 %v8621_v46  ;;  %6410 = vmatprep.subr.bf16.mxu1 %v7024_v36  ;;  %v5719_v24 = vpop.f32.mrb[121].mxu0  ;;  %v2734_v48 = vrot.slane %v2595_v29, 1 }
 0x254   : > { %v8601_v2 = vpop.f32.mrb[88].mxu1  ;;  %9626 = vst [vmem:[#allocation15_spill] sm:$0xff] %v8628_v44  ;;  %6375 = vmatmul.mubr.bf16.gmra.mrb[100].mxu1 %v8623_v37  ;;  %5951 = vmatpush3.bf16.msra.mxu0 %v7040_v60  ;;  %v2564_v56 = vadd.f32 %v8472_v21, %v2528_v23  ;;  %v2529_v20 = vmul.f32 %v6541_v35, %v8464_v52  ;;  %v5721_v57 = vpop.f32.mrb[122].mxu0 }
 0x255   : > { %v8609_v1 = vpop.f32.mrb[89].mxu1  ;;  %v5720_v22 = vadd.f32 %v5719_v24, %v5718_v59  ;;  %3318 = vmatprep.mubr.bf16.mxu0 %v8628_v44  ;;  %v2654_v16 = vsel %vm443_vm2, %v2622_v54, %v2638_v55  ;;  %v5722_v26 = vpop.f32.mrb[123].mxu0  ;;  %v2670_v51 = vsel %vm443_vm2, %v2638_v55, %v2622_v54  ;;  %v2750_v60 = vsel %vm540_vm3, %v2718_v61, %v2734_v48  ;;  %v7034_v54 = vld [vmem:[#allocation9 + $0xb0] sm:$0xff]  }
 0x256   : > { %v8614_v38 = vpop.f32.mrb[90].mxu1  ;;  %v2766_v42 = vsel %vm540_vm3, %v2734_v48, %v2718_v61  ;;  %6411 = vmatpush3.bf16.msra.mxu1 %v7024_v36  ;;  %5952 = vmatprep.subr.bf16.mxu0 %v7041_v13  ;;  %v2565_v29 = vadd.f32 %v8472_v21, %v2529_v20  ;;  %v5723_v35 = vadd.f32 %v5722_v26, %v5721_v57  ;;  %v2596_v44 = vmax.f32 %v2564_v56, 0.0 }
 0x257   : > { %v8617_v25 = vpop.f32.mrb[91].mxu1  ;;  %v6552_v23 = vadd.f32 %v5720_v22, %v8380_v3  ;;  %v2690_v59 = vmul.f32 %v9614_v43, %v2670_v51  ;;  %6412 = vmatprep.subr.bf16.mxu1 %v7029_v49  ;;  %v2787_v55 = vmul.f32 %v9615_v28, %v2766_v42 }
 0x258   : > { %5953 = vmatpush3.bf16.msra.mxu0 %v7042_v62  ;;  %v6560_v13 = vadd.f32 %v5723_v35, %v8389_v9  ;;  %v2597_v3 = vmax.f32 %v2565_v29, 0.0  ;;  %v2623_v20 = vrot.slane %v2596_v44, 7 }
 0x259   : > { %v6553_v36 = vadd.f32 %v6552_v23, %v8505_v19  ;;  %v8656_v61 = vpack.c.bf16 %v2654_v16, %v2690_v59  ;;  %v8658_v48 = vpack.c.bf16 %v2787_v55, %v2750_v60  ;;  %v7039_v19 = vld [vmem:[#allocation9 + $0xb8] sm:$0xff]   ;;  %v2719_v16 = vrot.slane %v2596_v44, 1 }
 0x25a   : > { %6413 = vmatpush3.bf16.msra.mxu1 %v7029_v49  ;;  %v6561_v57 = vadd.f32 %v6560_v13, %v8514_v18  ;;  %v5724_v56 = vpop.f32.mrb[124].mxu0  ;;  %v8663_v26 = vpack.c.bf16 %v2597_v3, %v2596_v44  ;;  %v2639_v62 = vrot.slane %v2597_v3, 7  ;;  %v2735_v51 = vrot.slane %v2597_v3, 1 }
 0x25b   : > { %v2530_v22 = vmul.f32 %v6553_v36, %v8464_v52  ;;  %3319 = vmatmul.mubr.bf16.gmra.mrb[176].mxu0 %v8656_v61  ;;  %6414 = vmatprep.subr.bf16.mxu1 %v7034_v54  ;;  %v5725_v9 = vpop.f32.mrb[125].mxu0 }
 0x25c   : > { %v8636_v11 = vpop.f32.mrb[92].mxu1  ;;  %6378 = vmatprep.mubr.bf16.mxu1 %v8658_v48  ;;  %v2531_v49 = vmul.f32 %v6561_v57, %v8464_v52  ;;  %v5726_v42 = vadd.f32 %v5725_v9, %v5724_v56  ;;  %v5727_v29 = vpop.f32.mrb[126].mxu0  ;;  %3326 = vmatprep.mubr.bf16.mxu0 %v8663_v26  ;;  %v2655_v18 = vsel %vm443_vm2, %v2623_v20, %v2639_v62 }
 0x25d   : > { %v8644_v40 = vpop.f32.mrb[93].mxu1  ;;  %v2566_v60 = vadd.f32 %v8472_v21, %v2530_v22  ;;  %v5728_v23 = vpop.f32.mrb[127].mxu0  ;;  %v2671_v35 = vsel %vm443_vm2, %v2639_v62, %v2623_v20  ;;  %v2751_v59 = vsel %vm540_vm3, %v2719_v16, %v2735_v51  ;;  %v2767_v44 = vsel %vm540_vm3, %v2735_v51, %v2719_v16  ;;  %v7043_v22 = vld [vmem:[#allocation9 + $0x1c0] sm:$0xff]  }
 0x25e   : > { %v8649_v24 = vpop.f32.mrb[94].mxu1  ;;  %6415 = vmatpush3.bf16.msra.mxu1 %v7034_v54  ;;  %v2567_v55 = vadd.f32 %v8472_v21, %v2531_v49  ;;  %v6548_v36 = vadd.f32 %v5726_v42, %v8376_v10  ;;  %v5729_v13 = vadd.f32 %v5728_v23, %v5727_v29  ;;  %v2692_v3 = vmul.f32 %v9614_v43, %v2671_v35 }
 0x25f   : > { %v8652_v46 = vpop.f32.mrb[95].mxu1  ;;  %6416 = vmatprep.subr.bf16.mxu1 %v7039_v19  ;;  %v2789_v57 = vmul.f32 %v9615_v28, %v2767_v44  ;;  %v2598_v56 = vmax.f32 %v2566_v60, 0.0 }
 0x260   : > { %v6549_v20 = vadd.f32 %v6548_v36, %v8496_v47  ;;  %v6556_v62 = vadd.f32 %v5729_v13, %v8386_v15  ;;  %v8683_v9 = vpack.c.bf16 %v2655_v18, %v2692_v3  ;;  %v2599_v16 = vmax.f32 %v2567_v55, 0.0 }
 0x261   : > { %v8685_v54 = vpack.c.bf16 %v2789_v57, %v2751_v59  ;;  %v2624_v51 = vrot.slane %v2598_v56, 7  ;;  %v2720_v47 = vrot.slane %v2598_v56, 1 }
 0x262   : > { %6417 = vmatpush3.bf16.msra.mxu1 %v7039_v19  ;;  %v2532_v10 = vmul.f32 %v6549_v20, %v8464_v52  ;;  %v6557_v49 = vadd.f32 %v6556_v62, %v8510_v0  ;;  %v5730_v42 = vpop.f32.mrb[128].mxu0  ;;  %v8690_v29 = vpack.c.bf16 %v2599_v16, %v2598_v56  ;;  %v2640_v60 = vrot.slane %v2599_v16, 7 }
 0x263   : > { %3327 = vmatmul.mubr.bf16.gmra.mrb[180].mxu0 %v8683_v9  ;;  %6074 = vmatprep.subr.bf16.mxu1 %v7043_v22  ;;  %v5731_v15 = vpop.f32.mrb[129].mxu0  ;;  %v2736_v18 = vrot.slane %v2599_v16, 1 }
 0x264   : > { %6379 = vmatmul.mubr.bf16.gmra.mrb[104].mxu1 %v8685_v54  ;;  %v2568_v23 = vadd.f32 %v8472_v21, %v2532_v10  ;;  %v2533_v19 = vmul.f32 %v6557_v49, %v8464_v52  ;;  %v5732_v35 = vadd.f32 %v5731_v15, %v5730_v42  ;;  %v5733_v59 = vpop.f32.mrb[130].mxu0  ;;  %3334 = vmatprep.mubr.bf16.mxu0 %v8690_v29 }
 0x265   : > { %v2656_v0 = vsel %vm443_vm2, %v2624_v51, %v2640_v60  ;;  %v5734_v44 = vpop.f32.mrb[131].mxu0  ;;  %v2672_v55 = vsel %vm443_vm2, %v2640_v60, %v2624_v51  ;;  %v2752_v36 = vsel %vm540_vm3, %v2720_v47, %v2736_v18  ;;  %v2768_v13 = vsel %vm540_vm3, %v2736_v18, %v2720_v47 }
 0x266   : > { %v2569_v3 = vadd.f32 %v8472_v21, %v2533_v19  ;;  %v6568_v22 = vadd.f32 %v5732_v35, %v8399_v5  ;;  %v5735_v57 = vadd.f32 %v5734_v44, %v5733_v59  ;;  %v2694_v56 = vmul.f32 %v9614_v43, %v2672_v55 }
 0x267   : > { %v2791_v20 = vmul.f32 %v9615_v28, %v2768_v13  ;;  %v2600_v62 = vmax.f32 %v2568_v23, 0.0 }
 0x268   : > { %v6569_v16 = vadd.f32 %v6568_v22, %v8538_v30  ;;  %v6576_v51 = vadd.f32 %v5735_v57, %v8406_v41  ;;  %v8710_v10 = vpack.c.bf16 %v2656_v0, %v2694_v56  ;;  %v2601_v49 = vmax.f32 %v2569_v3, 0.0 }
 0x269   : > { %v8712_v42 = vpack.c.bf16 %v2791_v20, %v2752_v36  ;;  %v2625_v60 = vrot.slane %v2600_v62, 7  ;;  %v2721_v41 = vrot.slane %v2600_v62, 1 }
 0x26a   : > { %v2534_v15 = vmul.f32 %v6569_v16, %v8464_v52  ;;  %v6577_v5 = vadd.f32 %v6576_v51, %v8546_v12  ;;  %v5736_v47 = vpop.f32.mrb[132].mxu0  ;;  %v8717_v18 = vpack.c.bf16 %v2601_v49, %v2600_v62  ;;  %v2641_v23 = vrot.slane %v2601_v49, 7 }
 0x26b   : > { %3335 = vmatmul.mubr.bf16.gmra.mrb[184].mxu0 %v8710_v10  ;;  %6382 = vmatprep.mubr.bf16.mxu1 %v8712_v42  ;;  %v5737_v30 = vpop.f32.mrb[133].mxu0  ;;  %v2737_v19 = vrot.slane %v2601_v49, 1 }
 0x26c   : > { %v2570_v35 = vadd.f32 %v8472_v21, %v2534_v15  ;;  %v2535_v59 = vmul.f32 %v6577_v5, %v8464_v52  ;;  %v5738_v0 = vadd.f32 %v5737_v30, %v5736_v47  ;;  %v5739_v44 = vpop.f32.mrb[134].mxu0  ;;  %3342 = vmatprep.mubr.bf16.mxu0 %v8717_v18  ;;  %v2657_v12 = vsel %vm443_vm2, %v2625_v60, %v2641_v23 }
 0x26d   : > { %v5740_v55 = vpop.f32.mrb[135].mxu0  ;;  %v2673_v36 = vsel %vm443_vm2, %v2641_v23, %v2625_v60  ;;  %v2753_v13 = vsel %vm540_vm3, %v2721_v41, %v2737_v19  ;;  %v2769_v3 = vsel %vm540_vm3, %v2737_v19, %v2721_v41 }
 0x26e   : > { %v2571_v22 = vadd.f32 %v8472_v21, %v2535_v59  ;;  %v6564_v57 = vadd.f32 %v5738_v0, %v8395_v32  ;;  %v5741_v56 = vadd.f32 %v5740_v55, %v5739_v44  ;;  %v2696_v20 = vmul.f32 %v9614_v43, %v2673_v36 }
 0x26f   : > { %v2793_v62 = vmul.f32 %v9615_v28, %v2769_v3  ;;  %v2602_v16 = vmax.f32 %v2570_v35, 0.0 }
 0x270   : > { %v6565_v51 = vadd.f32 %v6564_v57, %v8530_v34  ;;  %v6572_v49 = vadd.f32 %v5741_v56, %v8403_v6  ;;  %v8737_v60 = vpack.c.bf16 %v2657_v12, %v2696_v20  ;;  %v2603_v15 = vmax.f32 %v2571_v22, 0.0 }
 0x271   : > { %v8739_v5 = vpack.c.bf16 %v2793_v62, %v2753_v13  ;;  %v2626_v47 = vrot.slane %v2602_v16, 7  ;;  %v2722_v6 = vrot.slane %v2602_v16, 1 }
 0x272   : > { %v2536_v23 = vmul.f32 %v6565_v51, %v8464_v52  ;;  %v6573_v32 = vadd.f32 %v6572_v49, %v8543_v33  ;;  %v5742_v30 = vpop.f32.mrb[136].mxu0  ;;  %v8744_v41 = vpack.c.bf16 %v2603_v15, %v2602_v16  ;;  %v2642_v19 = vrot.slane %v2603_v15, 7 }
 0x273   : > { %3343 = vmatmul.mubr.bf16.gmra.mrb[188].mxu0 %v8737_v60  ;;  %6383 = vmatmul.mubr.bf16.gmra.mrb[108].mxu1 %v8739_v5  ;;  %v5743_v34 = vpop.f32.mrb[137].mxu0  ;;  %v2738_v35 = vrot.slane %v2603_v15, 1 }
 0x274   : > { %v2572_v59 = vadd.f32 %v8472_v21, %v2536_v23  ;;  %v2537_v0 = vmul.f32 %v6573_v32, %v8464_v52  ;;  %v5744_v44 = vadd.f32 %v5743_v34, %v5742_v30  ;;  %v5745_v12 = vpop.f32.mrb[138].mxu0  ;;  %3350 = vmatprep.mubr.bf16.mxu0 %v8744_v41  ;;  %v2658_v33 = vsel %vm443_vm2, %v2626_v47, %v2642_v19 }
 0x275   : > { %v5746_v55 = vpop.f32.mrb[139].mxu0  ;;  %v2674_v36 = vsel %vm443_vm2, %v2642_v19, %v2626_v47  ;;  %v2754_v13 = vsel %vm540_vm3, %v2722_v6, %v2738_v35  ;;  %v2770_v3 = vsel %vm540_vm3, %v2738_v35, %v2722_v6 }
 0x276   : > { %v2573_v22 = vadd.f32 %v8472_v21, %v2537_v0  ;;  %v6584_v57 = vadd.f32 %v5744_v44, %v8415_v31  ;;  %v5747_v56 = vadd.f32 %v5746_v55, %v5745_v12  ;;  %v2698_v20 = vmul.f32 %v9614_v43, %v2674_v36 }
 0x277   : > { %v2795_v62 = vmul.f32 %v9615_v28, %v2770_v3  ;;  %v2604_v16 = vmax.f32 %v2572_v59, 0.0 }
 0x278   : > { %v6585_v51 = vadd.f32 %v6584_v57, %v8573_v63  ;;  %v6592_v49 = vadd.f32 %v5747_v56, %v8422_v39  ;;  %v8764_v15 = vpack.c.bf16 %v2658_v33, %v2698_v20  ;;  %v2605_v47 = vmax.f32 %v2573_v22, 0.0 }
 0x279   : > { %v8766_v23 = vpack.c.bf16 %v2795_v62, %v2754_v13  ;;  %v2627_v32 = vrot.slane %v2604_v16, 7  ;;  %v2723_v39 = vrot.slane %v2604_v16, 1 }
 0x27a   : > { %v2538_v30 = vmul.f32 %v6585_v51, %v8464_v52  ;;  %v6593_v31 = vadd.f32 %v6592_v49, %v8582_v50  ;;  %v5748_v19 = vpop.f32.mrb[140].mxu0  ;;  %v8771_v34 = vpack.c.bf16 %v2605_v47, %v2604_v16  ;;  %v2643_v6 = vrot.slane %v2605_v47, 7 }
 0x27b   : > { %3351 = vmatmul.mubr.bf16.gmra.mrb[192].mxu0 %v8764_v15  ;;  %6386 = vmatprep.mubr.bf16.mxu1 %v8766_v23  ;;  %v5749_v63 = vpop.f32.mrb[141].mxu0  ;;  %v2739_v35 = vrot.slane %v2605_v47, 1 }
 0x27c   : > { %v2574_v59 = vadd.f32 %v8472_v21, %v2538_v30  ;;  %v2539_v0 = vmul.f32 %v6593_v31, %v8464_v52  ;;  %v5750_v44 = vadd.f32 %v5749_v63, %v5748_v19  ;;  %v5751_v12 = vpop.f32.mrb[142].mxu0  ;;  %3358 = vmatprep.mubr.bf16.mxu0 %v8771_v34  ;;  %v2659_v50 = vsel %vm443_vm2, %v2627_v32, %v2643_v6 }
 0x27d   : > { %v5752_v33 = vpop.f32.mrb[143].mxu0  ;;  %v2675_v55 = vsel %vm443_vm2, %v2643_v6, %v2627_v32  ;;  %v2755_v36 = vsel %vm540_vm3, %v2723_v39, %v2739_v35  ;;  %v2771_v13 = vsel %vm540_vm3, %v2739_v35, %v2723_v39 }
 0x27e   : > { %v2575_v3 = vadd.f32 %v8472_v21, %v2539_v0  ;;  %v6580_v22 = vadd.f32 %v5750_v44, %v8411_v45  ;;  %v5753_v57 = vadd.f32 %v5752_v33, %v5751_v12  ;;  %v2700_v56 = vmul.f32 %v9614_v43, %v2675_v55 }
 0x27f   : > { %v2797_v20 = vmul.f32 %v9615_v28, %v2771_v13  ;;  %v2606_v62 = vmax.f32 %v2574_v59, 0.0 }
 0x280   : > { %v6581_v16 = vadd.f32 %v6580_v22, %v8565_v14  ;;  %v6588_v51 = vadd.f32 %v5753_v57, %v8419_v7  ;;  %v8791_v49 = vpack.c.bf16 %v2659_v50, %v2700_v56  ;;  %v2607_v47 = vmax.f32 %v2575_v3, 0.0 }
 0x281   : > { %v8793_v32 = vpack.c.bf16 %v2797_v20, %v2755_v36  ;;  %v2628_v30 = vrot.slane %v2606_v62, 7  ;;  %v2724_v7 = vrot.slane %v2606_v62, 1 }
 0x282   : > { %v2540_v31 = vmul.f32 %v6581_v16, %v8464_v52  ;;  %v6589_v45 = vadd.f32 %v6588_v51, %v8579_v53  ;;  %v5754_v19 = vpop.f32.mrb[144].mxu0  ;;  %v8798_v6 = vpack.c.bf16 %v2607_v47, %v2606_v62  ;;  %v2644_v63 = vrot.slane %v2607_v47, 7 }
 0x283   : > { %3359 = vmatmul.mubr.bf16.gmra.mrb[196].mxu0 %v8791_v49  ;;  %6387 = vmatmul.mubr.bf16.gmra.mrb[112].mxu1 %v8793_v32  ;;  %v5755_v14 = vpop.f32.mrb[145].mxu0  ;;  %v2740_v39 = vrot.slane %v2607_v47, 1 }
 0x284   : > { %v2576_v35 = vadd.f32 %v8472_v21, %v2540_v31  ;;  %v2541_v59 = vmul.f32 %v6589_v45, %v8464_v52  ;;  %v5756_v0 = vadd.f32 %v5755_v14, %v5754_v19  ;;  %v5757_v44 = vpop.f32.mrb[146].mxu0  ;;  %3366 = vmatprep.mubr.bf16.mxu0 %v8798_v6  ;;  %v2660_v53 = vsel %vm443_vm2, %v2628_v30, %v2644_v63 }
 0x285   : > { %v5758_v12 = vpop.f32.mrb[147].mxu0  ;;  %v2676_v50 = vsel %vm443_vm2, %v2644_v63, %v2628_v30  ;;  %v2756_v33 = vsel %vm540_vm3, %v2724_v7, %v2740_v39  ;;  %v2772_v55 = vsel %vm540_vm3, %v2740_v39, %v2724_v7 }
 0x286   : > { %v2577_v36 = vadd.f32 %v8472_v21, %v2541_v59  ;;  %v6600_v13 = vadd.f32 %v5756_v0, %v8431_v58  ;;  %v5759_v3 = vadd.f32 %v5758_v12, %v5757_v44  ;;  %v2702_v22 = vmul.f32 %v9614_v43, %v2676_v50 }
 0x287   : > { %v2799_v57 = vmul.f32 %v9615_v28, %v2772_v55  ;;  %v2608_v56 = vmax.f32 %v2576_v35, 0.0 }
 0x288   : > { %v6601_v20 = vadd.f32 %v6600_v13, %v8609_v1  ;;  %v6608_v62 = vadd.f32 %v5759_v3, %v8438_v4  ;;  %v8818_v16 = vpack.c.bf16 %v2660_v53, %v2702_v22  ;;  %v2609_v51 = vmax.f32 %v2577_v36, 0.0 }
 0x289   : > { %v8820_v47 = vpack.c.bf16 %v2799_v57, %v2756_v33  ;;  %v2629_v30 = vrot.slane %v2608_v56, 7  ;;  %v2725_v4 = vrot.slane %v2608_v56, 1 }
 0x28a   : > { %v2542_v31 = vmul.f32 %v6601_v20, %v8464_v52  ;;  %v6609_v58 = vadd.f32 %v6608_v62, %v8617_v25  ;;  %v5760_v45 = vpop.f32.mrb[148].mxu0  ;;  %v8825_v19 = vpack.c.bf16 %v2609_v51, %v2608_v56  ;;  %v2645_v63 = vrot.slane %v2609_v51, 7 }
 0x28b   : > { %3367 = vmatmul.mubr.bf16.gmra.mrb[200].mxu0 %v8818_v16  ;;  %6390 = vmatprep.mubr.bf16.mxu1 %v8820_v47  ;;  %v5761_v1 = vpop.f32.mrb[149].mxu0  ;;  %v2741_v14 = vrot.slane %v2609_v51, 1 }
 0x28c   : > { %v2578_v7 = vadd.f32 %v8472_v21, %v2542_v31  ;;  %v2543_v39 = vmul.f32 %v6609_v58, %v8464_v52  ;;  %v5762_v35 = vadd.f32 %v5761_v1, %v5760_v45  ;;  %v5763_v59 = vpop.f32.mrb[150].mxu0  ;;  %3374 = vmatprep.mubr.bf16.mxu0 %v8825_v19  ;;  %v2661_v25 = vsel %vm443_vm2, %v2629_v30, %v2645_v63 }
 0x28d   : > { %v5764_v0 = vpop.f32.mrb[151].mxu0  ;;  %v2677_v44 = vsel %vm443_vm2, %v2645_v63, %v2629_v30  ;;  %v2757_v53 = vsel %vm540_vm3, %v2725_v4, %v2741_v14  ;;  %v2773_v12 = vsel %vm540_vm3, %v2741_v14, %v2725_v4 }
 0x28e   : > { %v2579_v50 = vadd.f32 %v8472_v21, %v2543_v39  ;;  %v6596_v33 = vadd.f32 %v5762_v35, %v8427_v17  ;;  %v5765_v55 = vadd.f32 %v5764_v0, %v5763_v59  ;;  %v2704_v36 = vmul.f32 %v9614_v43, %v2677_v44 }
 0x28f   : > { %v2801_v13 = vmul.f32 %v9615_v28, %v2773_v12  ;;  %v2610_v3 = vmax.f32 %v2578_v7, 0.0 }
 0x290   : > { %v6597_v22 = vadd.f32 %v6596_v33, %v8601_v2  ;;  %v6604_v57 = vadd.f32 %v5765_v55, %v8435_v8  ;;  %v8845_v56 = vpack.c.bf16 %v2661_v25, %v2704_v36  ;;  %v2611_v20 = vmax.f32 %v2579_v50, 0.0  ;;  %v9628_v36 = vld [vmem:[#allocation19_spill] sm:$0xff] }
 0x291   : > { %v8847_v62 = vpack.c.bf16 %v2801_v13, %v2757_v53  ;;  %v2630_v51 = vrot.slane %v2610_v3, 7  ;;  %v2726_v8 = vrot.slane %v2610_v3, 1 }
 0x292   : > { %v2544_v30 = vmul.f32 %v6597_v22, %v8464_v52  ;;  %v6605_v17 = vadd.f32 %v6604_v57, %v8614_v38  ;;  %v5766_v31 = vpop.f32.mrb[152].mxu0  ;;  %v8852_v58 = vpack.c.bf16 %v2611_v20, %v2610_v3  ;;  %v2646_v45 = vrot.slane %v2611_v20, 7 }
 0x293   : > { %3375 = vmatmul.mubr.bf16.gmra.mrb[204].mxu0 %v8845_v56  ;;  %6391 = vmatmul.mubr.bf16.gmra.mrb[116].mxu1 %v8847_v62  ;;  %v5767_v2 = vpop.f32.mrb[153].mxu0  ;;  %v2742_v63 = vrot.slane %v2611_v20, 1 }
 0x294   : > { %v2580_v1 = vadd.f32 %v8472_v21, %v2544_v30  ;;  %v2545_v4 = vmul.f32 %v6605_v17, %v8464_v52  ;;  %v5768_v14 = vadd.f32 %v5767_v2, %v5766_v31  ;;  %v5769_v7 = vpop.f32.mrb[154].mxu0  ;;  %3382 = vmatprep.mubr.bf16.mxu0 %v8852_v58  ;;  %v2662_v38 = vsel %vm443_vm2, %v2630_v51, %v2646_v45  ;;  %v9627_v52 = vld [vmem:[#allocation16_spill] sm:$0xff] }
 0x295   : > { %v5770_v39 = vpop.f32.mrb[155].mxu0  ;;  %v2678_v35 = vsel %vm443_vm2, %v2646_v45, %v2630_v51  ;;  %v2758_v59 = vsel %vm540_vm3, %v2726_v8, %v2742_v63  ;;  %v2774_v25 = vsel %vm540_vm3, %v2742_v63, %v2726_v8  ;;  %v7084_v63 = vld [vmem:[%s9483_s3 + $0x1] ss:$0 sm:$0xff] }
 0x296   : > { %v2581_v0 = vadd.f32 %v8472_v21, %v2545_v4  ;;  %v6616_v44 = vadd.f32 %v5768_v14, %v9627_v52  ;;  %v5771_v53 = vadd.f32 %v5770_v39, %v5769_v7  ;;  %v2706_v12 = vmul.f32 %v9614_v43, %v2678_v35  ;;  %v7083_v21 = vld [vmem:[%s9483_s3] ss:$0 sm:$0xff] }
 0x297   : > { %v2803_v50 = vmul.f32 %v9615_v28, %v2774_v25  ;;  %v2612_v33 = vmax.f32 %v2580_v1, 0.0 }
 0x298   : > { %v6617_v55 = vadd.f32 %v6616_v44, %v8644_v40  ;;  %v6624_v13 = vadd.f32 %v5771_v53, %v9628_v36  ;;  %v8872_v3 = vpack.c.bf16 %v2662_v38, %v2706_v12  ;;  %v2613_v22 = vmax.f32 %v2581_v0, 0.0  ;;  %v9629_v0 = vld [vmem:[#allocation20_spill] sm:$0xff] }
 0x299   : > { %v8874_v57 = vpack.c.bf16 %v2803_v50, %v2758_v59  ;;  %v2631_v20 = vrot.slane %v2612_v33, 7  ;;  %v2727_v2 = vrot.slane %v2612_v33, 1 }
 0x29a   : > { %v2546_v51 = vmul.f32 %v7083_v21, %v6617_v55  ;;  %v6625_v30 = vadd.f32 %v6624_v13, %v8652_v46  ;;  %v5772_v17 = vpop.f32.mrb[156].mxu0  ;;  %v8881_v31 = vpack.c.bf16 %v2613_v22, %v2612_v33  ;;  %v2647_v40 = vrot.slane %v2613_v22, 7  ;;  %v9630_v55 = vld [vmem:[#allocation25_spill] sm:$0xff] }
 0x29b   : > { %3383 = vmatmul.mubr.bf16.gmra.mrb[208].mxu0 %v8872_v3  ;;  %6394 = vmatprep.mubr.bf16.mxu1 %v8874_v57  ;;  %v5773_v45 = vpop.f32.mrb[157].mxu0  ;;  %v2743_v8 = vrot.slane %v2613_v22, 1 }
 0x29c   : > { %v2582_v1 = vadd.f32 %v7084_v63, %v2546_v51  ;;  %v2547_v4 = vmul.f32 %v7083_v21, %v6625_v30  ;;  %v5774_v14 = vadd.f32 %v5773_v45, %v5772_v17  ;;  %v5775_v7 = vpop.f32.mrb[158].mxu0  ;;  %3390 = vmatprep.mubr.bf16.mxu0 %v8881_v31  ;;  %v2663_v46 = vsel %vm443_vm2, %v2631_v20, %v2647_v40 }
 0x29d   : > { %v5776_v38 = vpop.f32.mrb[159].mxu0  ;;  %v2679_v39 = vsel %vm443_vm2, %v2647_v40, %v2631_v20  ;;  %v2759_v35 = vsel %vm540_vm3, %v2727_v2, %v2743_v8  ;;  %v2775_v59 = vsel %vm540_vm3, %v2743_v8, %v2727_v2 }
 0x29e   : > { %v2583_v25 = vadd.f32 %v7084_v63, %v2547_v4  ;;  %v6612_v52 = vadd.f32 %v5774_v14, %v9629_v0  ;;  %v5777_v44 = vadd.f32 %v5776_v38, %v5775_v7  ;;  %v2708_v53 = vmul.f32 %v9614_v43, %v2679_v39 }
 0x29f   : > { %v2805_v12 = vmul.f32 %v9615_v28, %v2775_v59  ;;  %v2614_v50 = vmax.f32 %v2582_v1, 0.0 }
 0x2a0   : > { %v6613_v33 = vadd.f32 %v6612_v52, %v8636_v11  ;;  %v6620_v36 = vadd.f32 %v5777_v44, %v9630_v55  ;;  %v8901_v13 = vpack.c.bf16 %v2663_v46, %v2708_v53  ;;  %v2615_v22 = vmax.f32 %v2583_v25, 0.0 }
 0x2a1   : > { %v8903_v20 = vpack.c.bf16 %v2805_v12, %v2759_v35  ;;  %v2632_v51 = vrot.slane %v2614_v50, 7  ;;  %v2728_v2 = vrot.slane %v2614_v50, 1 }
 0x2a2   : > { %v2548_v30 = vmul.f32 %v7083_v21, %v6613_v33  ;;  %v6621_v17 = vadd.f32 %v6620_v36, %v8649_v24  ;;  %v8907_v40 = vpack.c.bf16 %v2615_v22, %v2614_v50  ;;  %v2648_v45 = vrot.slane %v2615_v22, 7 }
 0x2a3   : > { %3391 = vmatmul.mubr.bf16.gmra.mrb[212].mxu0 %v8901_v13  ;;  %6395 = vmatmul.mubr.bf16.gmra.mrb[120].mxu1 %v8903_v20  ;;  %v2744_v11 = vrot.slane %v2615_v22, 1 }
 0x2a4   : > { %v2584_v8 = vadd.f32 %v7084_v63, %v2548_v30  ;;  %v2549_v1 = vmul.f32 %v7083_v21, %v6621_v17  ;;  %3398 = vmatprep.mubr.bf16.mxu0 %v8907_v40  ;;  %v2664_v4 = vsel %vm443_vm2, %v2632_v51, %v2648_v45  ;;  %v2680_v14 = vsel %vm443_vm2, %v2648_v45, %v2632_v51  ;;  %v7044_v45 = vld [vmem:[#allocation9 + $0x180] sm:$0xff]  }
 0x2a5   : > { %v2710_v24 = vmul.f32 %v9614_v43, %v2680_v14  ;;  %v2760_v7 = vsel %vm540_vm3, %v2728_v2, %v2744_v11  ;;  %v2776_v46 = vsel %vm540_vm3, %v2744_v11, %v2728_v2  ;;  %v9631_v17 = vmov 0   ;;  %v7045_v2 = vld [vmem:[#allocation9 + $0x1c8] sm:$0xff]   ;;  %v9635_v14 = vld [vmem:[#allocation28_spill] sm:$0xff] }
 0x2a6   : > { %v2585_v38 = vadd.f32 %v7084_v63, %v2549_v1  ;;  %v2807_v39 = vmul.f32 %v9615_v28, %v2776_v46  ;;  %v2616_v21 = vmax.f32 %v2584_v8, 0.0  ;;  %v7046_v11 = vld [vmem:[#allocation9 + $0x188] sm:$0xff]   ;;  %v7047_v8 = vld [vmem:[#allocation9 + $0x1d0] sm:$0xff]   ;;  %v7050_v46 = vld [vmem:[#allocation9 + $0x198] sm:$0xff]  }
 0x2a7   : > { %v8921_v35 = vpack.c.bf16 %v2664_v4, %v2710_v24  ;;  %v7048_v1 = vld [vmem:[#allocation9 + $0x190] sm:$0xff]   ;;  %v7049_v4 = vld [vmem:[#allocation9 + $0x1d8] sm:$0xff]   ;;  %v9636_v24 = vld [vmem:[#allocation26_spill] sm:$0xff] }
 0x2a8   : > { %v8923_v59 = vpack.c.bf16 %v2807_v39, %v2760_v7  ;;  %v2617_v25 = vmax.f32 %v2585_v38, 0.0  ;;  %v2633_v0 = vrot.slane %v2616_v21, 7  ;;  %v2729_v53 = vrot.slane %v2616_v21, 1  ;;  %v9637_v7 = vld [vmem:[#allocation23_spill] sm:$0xff]  ;;  %v7051_v38 = vld [vmem:[#allocation9 + $0x1e0] sm:$0xff]  }
 0x2a9   : > { %v7052_v39 = vld [vmem:[#allocation9 + $0x1a0] sm:$0xff]  }
 0x2aa   : > { %6398 = vmatprep.mubr.bf16.mxu1 %v8923_v59  ;;  %v8927_v52 = vpack.c.bf16 %v2617_v25, %v2616_v21  ;;  %v2649_v44 = vrot.slane %v2617_v25, 7  ;;  %v2745_v12 = vrot.slane %v2617_v25, 1  ;;  %v7053_v21 = vld [vmem:[#allocation9 + $0x1e8] sm:$0xff]   ;;  %v9638_v25 = vld [vmem:[#allocation24_spill] sm:$0xff] }
 0x2ab   : > { %3399 = vmatmul.mubr.bf16.gmra.mrb[216].mxu0 %v8921_v35 }
 0x2ac   : > { %3406 = vmatprep.mubr.bf16.mxu0 %v8927_v52  ;;  %v2665_v63 = vsel %vm443_vm2, %v2633_v0, %v2649_v44  ;;  %v2681_v50 = vsel %vm443_vm2, %v2649_v44, %v2633_v0  ;;  %v2761_v33 = vsel %vm540_vm3, %v2729_v53, %v2745_v12  ;;  %v2777_v55 = vsel %vm540_vm3, %v2745_v12, %v2729_v53  ;;  %v9639_v0 = vld [vmem:[#allocation29_spill] sm:$0xff]  ;;  %v7054_v44 = vld [vmem:[#allocation9 + $0x1a8] sm:$0xff]   ;;  %v7055_v53 = vld [vmem:[#allocation9 + $0x1f0] sm:$0xff]  }
 0x2ad   : > { %v2712_v36 = vmul.f32 %v9614_v43, %v2681_v50  ;;  %v2809_v22 = vmul.f32 %v9615_v28, %v2777_v55  ;;  %v9633_v43 = vld [vmem:[#allocation22_spill] sm:$0xff]  ;;  %v9634_v28 = vld [vmem:[#allocation21_spill] sm:$0xff]  ;;  %v7056_v12 = vld [vmem:[#allocation9 + $0x1b0] sm:$0xff]  }
 0x2ae   : > { %v9640_v50 = vld [vmem:[#allocation27_spill] sm:$0xff]  ;;  %v7058_v55 = vld [vmem:[#allocation9 + $0x1b8] sm:$0xff]  }
 0x2af   : > { %v8940_v51 = vpack.c.bf16 %v2665_v63, %v2712_v36  ;;  %v8942_v30 = vpack.c.bf16 %v2809_v22, %v2761_v33  ;;  %v7057_v63 = vld [vmem:[#allocation9 + $0x1f8] sm:$0xff]   ;;  %v9641_v33 = vld [vmem:[#allocation14_spill] sm:$0xff] }
 0x2b0   : > { %v7059_v36 = vld [vmem:[#allocation9 + $0x200] sm:$0xff]   ;;  %v9642_v22 = vld [vmem:[#allocation17_spill] sm:$0xff] }
 0x2b1   : > { %6399 = vmatmul.mubr.bf16.gmra.mrb[124].mxu1 %v8942_v30 }
 0x2b2   : > { %6418 = vmatprep.mubr.bf16.mxu1 %v9631_v17 }
 0x2b3   : > { %3407 = vmatmul.mubr.bf16.gmra.mrb[220].mxu0 %v8940_v51 }
 0x2b4   : > { %3752 = vmatprep.mubr.bf16.mxu0 %v9631_v17 }
 0x2b9   : > { %6419 = vmatmul.mubr.bf16.vlgmr.msra.gmra.mrb[96].mxu1 %v9632_v27  ;;  %v7061_v27 = vld [vmem:[#allocation9 + $0x210] sm:$0xff]  }
 0x2ba   : > { %6422 = vmatprep.mubr.bf16.mxu1 %v9633_v43  ;;  %6075 = vmatpush3.bf16.msra.mxu1 %v7044_v45  ;;  %v9643_v45 = vld [vmem:[#allocation15_spill] sm:$0xff] }
 0x2bb   : > { %3753 = vmatmul.mubr.bf16.vlgmr.msra.gmra.mrb[224].mxu0 %v9631_v17  ;;  %6076 = vmatprep.subr.bf16.mxu1 %v7045_v2  ;;  %v7060_v2 = vld [vmem:[#allocation9 + $0x208] sm:$0xff]  }
 0x2bc   : > { %3760 = vmatprep.mubr.bf16.mxu0 %v9634_v28  ;;  %v7062_v28 = vld [vmem:[#allocation9 + $0x218] sm:$0xff]  }
 0x2be   : > { %6077 = vmatpush3.bf16.msra.mxu1 %v7046_v11  ;;  %v7063_v11 = vld [vmem:[#allocation9 + $0x220] sm:$0xff]  }
 0x2bf   : > { %6078 = vmatprep.subr.bf16.mxu1 %v7047_v8  ;;  %v7064_v8 = vld [vmem:[#allocation9 + $0x228] sm:$0xff]  }
 0x2c1   : > { %6423 = vmatmul.mubr.bf16.gmra.mrb[100].mxu1 %v9635_v14 }
 0x2c2   : > { %6426 = vmatprep.mubr.bf16.mxu1 %v8623_v37  ;;  %6079 = vmatpush3.bf16.msra.mxu1 %v7048_v1 }
 0x2c3   : > { %3761 = vmatmul.mubr.bf16.gmra.mrb[228].mxu0 %v9636_v24  ;;  %6080 = vmatprep.subr.bf16.mxu1 %v7049_v4  ;;  %v7065_v4 = vld [vmem:[#allocation9 + $0x230] sm:$0xff]  }
 0x2c4   : > { %3768 = vmatprep.mubr.bf16.mxu0 %v9637_v7 }
 0x2c6   : > { %6081 = vmatpush3.bf16.msra.mxu1 %v7050_v46 }
 0x2c7   : > { %6082 = vmatprep.subr.bf16.mxu1 %v7051_v38 }
 0x2c9   : > { %6427 = vmatmul.mubr.bf16.gmra.mrb[104].mxu1 %v8658_v48 }
 0x2ca   : > { %6430 = vmatprep.mubr.bf16.mxu1 %v8685_v54  ;;  %6083 = vmatpush3.bf16.msra.mxu1 %v7052_v39 }
 0x2cb   : > { %3769 = vmatmul.mubr.bf16.gmra.mrb[232].mxu0 %v9638_v25  ;;  %6084 = vmatprep.subr.bf16.mxu1 %v7053_v21  ;;  %v7066_v21 = vld [vmem:[#allocation9 + $0x238] sm:$0xff]  }
 0x2cc   : > { %3776 = vmatprep.mubr.bf16.mxu0 %v9639_v0 }
 0x2ce   : > { %6085 = vmatpush3.bf16.msra.mxu1 %v7054_v44 }
 0x2cf   : > { %6086 = vmatprep.subr.bf16.mxu1 %v7055_v53 }
 0x2d1   : > { %6431 = vmatmul.mubr.bf16.gmra.mrb[108].mxu1 %v8712_v42 }
 0x2d2   : > { %6434 = vmatprep.mubr.bf16.mxu1 %v8739_v5  ;;  %6087 = vmatpush3.bf16.msra.mxu1 %v7056_v12 }
 0x2d3   : > { %3777 = vmatmul.mubr.bf16.gmra.mrb[236].mxu0 %v9640_v50  ;;  %6088 = vmatprep.subr.bf16.mxu1 %v7057_v63 }
 0x2d4   : > { %3784 = vmatprep.mubr.bf16.mxu0 %v9641_v33 }
 0x2d6   : > { %6089 = vmatpush3.bf16.msra.mxu1 %v7058_v55 }
 0x2d7   : > { %6450 = vmatprep.subr.bf16.mxu1 %v7059_v36 }
 0x2d9   : > { %6435 = vmatmul.mubr.bf16.gmra.mrb[112].mxu1 %v8766_v23 }
 0x2da   : > { %6438 = vmatprep.mubr.bf16.mxu1 %v8793_v32 }
 0x2db   : > { %3785 = vmatmul.mubr.bf16.gmra.mrb[240].mxu0 %v9642_v22 }
 0x2dc   : > { %3792 = vmatprep.mubr.bf16.mxu0 %v9643_v45 }
 0x2e1   : > { %6439 = vmatmul.mubr.bf16.gmra.mrb[116].mxu1 %v8820_v47 }
 0x2e2   : > { %6442 = vmatprep.mubr.bf16.mxu1 %v8847_v62 }
 0x2e3   : > { %3793 = vmatmul.mubr.bf16.gmra.mrb[244].mxu0 %v8656_v61 }
 0x2e4   : > { %3800 = vmatprep.mubr.bf16.mxu0 %v8663_v26 }
 0x2e9   : > { %6443 = vmatmul.mubr.bf16.gmra.mrb[120].mxu1 %v8874_v57 }
 0x2ea   : > { %6446 = vmatprep.mubr.bf16.mxu1 %v8903_v20 }
 0x2eb   : > { %3801 = vmatmul.mubr.bf16.gmra.mrb[248].mxu0 %v8683_v9 }
 0x2ec   : > { %3808 = vmatprep.mubr.bf16.mxu0 %v8690_v29 }
 0x2f1   : > { %6447 = vmatmul.mubr.bf16.gmra.mrb[124].mxu1 %v8923_v59 }
 0x2f2   : > { %4319 = vmatprep.mubr.bf16.mxu1 %v9637_v7 }
 0x2f3   : > { %3809 = vmatmul.mubr.bf16.gmra.mrb[252].mxu0 %v8710_v10 }
 0x2f4   : > { %3816 = vmatprep.mubr.bf16.mxu0 %v8717_v18 }
 0x2f9   : > { %4320 = vmatmul.mubr.bf16.vlgmr.msra.gmra.mrb[128].mxu1 %v9638_v25 }
 0x2fa   : > { %4327 = vmatprep.mubr.bf16.mxu1 %v9639_v0  ;;  %6451 = vmatpush3.bf16.msra.mxu1 %v7059_v36 }
 0x2fb   : > { %3817 = vmatmul.mubr.bf16.gmra.mrb[0].mxu0 %v8737_v60  ;;  %6452 = vmatprep.subr.bf16.mxu1 %v7060_v2 }
 0x2fc   : > { %3824 = vmatprep.mubr.bf16.mxu0 %v8744_v41 }
 0x2fe   : > { %6453 = vmatpush3.bf16.msra.mxu1 %v7060_v2 }
 0x2ff   : > { %6454 = vmatprep.subr.bf16.mxu1 %v7061_v27 }
 0x301   : > { %4328 = vmatmul.mubr.bf16.gmra.mrb[132].mxu1 %v9640_v50 }
 0x302   : > { %4335 = vmatprep.mubr.bf16.mxu1 %v9641_v33  ;;  %6455 = vmatpush3.bf16.msra.mxu1 %v7061_v27 }
 0x303   : > { %3825 = vmatmul.mubr.bf16.gmra.mrb[4].mxu0 %v8764_v15  ;;  %6456 = vmatprep.subr.bf16.mxu1 %v7062_v28 }
 0x304   : > { %3832 = vmatprep.mubr.bf16.mxu0 %v8771_v34 }
 0x306   : > { %6457 = vmatpush3.bf16.msra.mxu1 %v7062_v28 }
 0x307   : > { %6458 = vmatprep.subr.bf16.mxu1 %v7063_v11 }
 0x309   : > { %4336 = vmatmul.mubr.bf16.gmra.mrb[136].mxu1 %v9642_v22 }
 0x30a   : > { %4343 = vmatprep.mubr.bf16.mxu1 %v9643_v45  ;;  %6459 = vmatpush3.bf16.msra.mxu1 %v7063_v11 }
 0x30b   : > { %3833 = vmatmul.mubr.bf16.gmra.mrb[8].mxu0 %v8791_v49  ;;  %6460 = vmatprep.subr.bf16.mxu1 %v7064_v8 }
 0x30c   : > { %3840 = vmatprep.mubr.bf16.mxu0 %v8798_v6  ;;  %v5818_v1 = vpop.f32.mrb[160].mxu0 }
 0x30d   : > { %v5819_v24 = vpop.f32.mrb[161].mxu0 }
 0x30e   : > { %v8992_v7 = vadd.f32 %v5819_v24, %v5818_v1  ;;  %v5821_v46 = vpop.f32.mrb[162].mxu0  ;;  %6461 = vmatpush3.bf16.msra.mxu1 %v7064_v8 }
 0x30f   : > { %v5822_v38 = vpop.f32.mrb[163].mxu0  ;;  %6462 = vmatprep.subr.bf16.mxu1 %v7065_v4 }
 0x310   : > { %v8994_v39 = vadd.f32 %v5822_v38, %v5821_v46 }
 0x311   : > { %4344 = vmatmul.mubr.bf16.gmra.mrb[140].mxu1 %v8656_v61 }
 0x312   : > { %4351 = vmatprep.mubr.bf16.mxu1 %v8663_v26  ;;  %6463 = vmatpush3.bf16.msra.mxu1 %v7065_v4 }
 0x313   : > { %3841 = vmatmul.mubr.bf16.gmra.mrb[12].mxu0 %v8818_v16  ;;  %6464 = vmatprep.subr.bf16.mxu1 %v7066_v21 }
 0x314   : > { %3848 = vmatprep.mubr.bf16.mxu0 %v8825_v19 }
 0x315   : > { %v5824_v25 = vpop.f32.mrb[164].mxu0 }
 0x316   : > { %v5825_v0 = vpop.f32.mrb[165].mxu0  ;;  %6465 = vmatpush3.bf16.msra.mxu1 %v7066_v21 }
 0x317   : > { %v9000_v44 = vadd.f32 %v5825_v0, %v5824_v25  ;;  %v5827_v53 = vpop.f32.mrb[166].mxu0 }
 0x318   : > { %v5828_v12 = vpop.f32.mrb[167].mxu0 }
 0x319   : > { %v9002_v63 = vadd.f32 %v5828_v12, %v5827_v53  ;;  %4352 = vmatmul.mubr.bf16.gmra.mrb[144].mxu1 %v8683_v9 }
 0x31a   : > { %4359 = vmatprep.mubr.bf16.mxu1 %v8690_v29 }
 0x31b   : > { %3849 = vmatmul.mubr.bf16.gmra.mrb[16].mxu0 %v8845_v56 }
 0x31c   : > { %3856 = vmatprep.mubr.bf16.mxu0 %v8852_v58 }
 0x31d   : > { %v5830_v61 = vpop.f32.mrb[168].mxu0 }
 0x31e   : > { %v5831_v26 = vpop.f32.mrb[169].mxu0 }
 0x31f   : > { %v9008_v50 = vadd.f32 %v5831_v26, %v5830_v61  ;;  %v5833_v33 = vpop.f32.mrb[170].mxu0 }
 0x320   : > { %v5834_v55 = vpop.f32.mrb[171].mxu0 }
 0x321   : > { %v9010_v36 = vadd.f32 %v5834_v55, %v5833_v33  ;;  %4360 = vmatmul.mubr.bf16.gmra.mrb[148].mxu1 %v8710_v10 }
 0x322   : > { %4367 = vmatprep.mubr.bf16.mxu1 %v8717_v18 }
 0x323   : > { %3857 = vmatmul.mubr.bf16.gmra.mrb[20].mxu0 %v8872_v3 }
 0x324   : > { %3864 = vmatprep.mubr.bf16.mxu0 %v8881_v31 }
 0x326   : > { %v5836_v9 = vpop.f32.mrb[172].mxu0 }
 0x327   : > { %v5837_v29 = vpop.f32.mrb[173].mxu0 }
 0x328   : > { %v9016_v22 = vadd.f32 %v5837_v29, %v5836_v9  ;;  %v5839_v45 = vpop.f32.mrb[174].mxu0 }
 0x329   : > { %v5840_v2 = vpop.f32.mrb[175].mxu0  ;;  %4368 = vmatmul.mubr.bf16.gmra.mrb[152].mxu1 %v8737_v60 }
 0x32a   : > { %v9018_v27 = vadd.f32 %v5840_v2, %v5839_v45  ;;  %4375 = vmatprep.mubr.bf16.mxu1 %v8744_v41 }
 0x32b   : > { %3865 = vmatmul.mubr.bf16.gmra.mrb[24].mxu0 %v8901_v13 }
 0x32c   : > { %3872 = vmatprep.mubr.bf16.mxu0 %v8907_v40 }
 0x32e   : > { %v5842_v10 = vpop.f32.mrb[176].mxu0 }
 0x32f   : > { %v5843_v18 = vpop.f32.mrb[177].mxu0 }
 0x330   : > { %v9024_v28 = vadd.f32 %v5843_v18, %v5842_v10  ;;  %v5845_v11 = vpop.f32.mrb[178].mxu0 }
 0x331   : > { %v5846_v8 = vpop.f32.mrb[179].mxu0  ;;  %4376 = vmatmul.mubr.bf16.gmra.mrb[156].mxu1 %v8764_v15 }
 0x332   : > { %v9026_v1 = vadd.f32 %v5846_v8, %v5845_v11  ;;  %4383 = vmatprep.mubr.bf16.mxu1 %v8771_v34 }
 0x333   : > { %3873 = vmatmul.mubr.bf16.gmra.mrb[28].mxu0 %v8921_v35 }
 0x336   : > { %v5848_v60 = vpop.f32.mrb[180].mxu0 }
 0x337   : > { %v5849_v4 = vpop.f32.mrb[181].mxu0 }
 0x338   : > { %v9031_v24 = vadd.f32 %v5849_v4, %v5848_v60  ;;  %v5851_v41 = vpop.f32.mrb[182].mxu0 }
 0x339   : > { %v5852_v46 = vpop.f32.mrb[183].mxu0  ;;  %4384 = vmatmul.mubr.bf16.gmra.mrb[160].mxu1 %v8791_v49 }
 0x33a   : > { %v9033_v38 = vadd.f32 %v5852_v46, %v5851_v41  ;;  %4391 = vmatprep.mubr.bf16.mxu1 %v8798_v6 }
 0x33e   : > { %v5854_v21 = vpop.f32.mrb[184].mxu0 }
 0x33f   : > { %v5855_v25 = vpop.f32.mrb[185].mxu0 }
 0x340   : > { %v9037_v0 = vadd.f32 %v5855_v25, %v5854_v21  ;;  %v5857_v15 = vpop.f32.mrb[186].mxu0 }
 0x341   : > { %v5858_v53 = vpop.f32.mrb[187].mxu0  ;;  %4392 = vmatmul.mubr.bf16.gmra.mrb[164].mxu1 %v8818_v16 }
 0x342   : > { %v9039_v12 = vadd.f32 %v5858_v53, %v5857_v15  ;;  %4399 = vmatprep.mubr.bf16.mxu1 %v8825_v19 }
 0x346   : > { %v5860_v34 = vpop.f32.mrb[188].mxu0 }
 0x347   : > { %v5861_v61 = vpop.f32.mrb[189].mxu0 }
 0x348   : > { %v9043_v26 = vadd.f32 %v5861_v61, %v5860_v34  ;;  %v5863_v33 = vpop.f32.mrb[190].mxu0 }
 0x349   : > { %v5864_v49 = vpop.f32.mrb[191].mxu0  ;;  %4400 = vmatmul.mubr.bf16.gmra.mrb[168].mxu1 %v8845_v56 }
 0x34a   : > { %v9045_v55 = vadd.f32 %v5864_v49, %v5863_v33  ;;  %4407 = vmatprep.mubr.bf16.mxu1 %v8852_v58 }
 0x34e   : > { %v5866_v6 = vpop.f32.mrb[192].mxu0 }
 0x34f   : > { %v5867_v9 = vpop.f32.mrb[193].mxu0 }
 0x350   : > { %v9049_v29 = vadd.f32 %v5867_v9, %v5866_v6  ;;  %v5869_v45 = vpop.f32.mrb[194].mxu0 }
 0x351   : > { %v5870_v16 = vpop.f32.mrb[195].mxu0  ;;  %4408 = vmatmul.mubr.bf16.gmra.mrb[172].mxu1 %v8872_v3 }
 0x352   : > { %v9051_v2 = vadd.f32 %v5870_v16, %v5869_v45  ;;  %4415 = vmatprep.mubr.bf16.mxu1 %v8881_v31 }
 0x356   : > { %v5872_v19 = vpop.f32.mrb[196].mxu0 }
 0x357   : > { %v5873_v10 = vpop.f32.mrb[197].mxu0 }
 0x358   : > { %v9055_v18 = vadd.f32 %v5873_v10, %v5872_v19  ;;  %v5875_v11 = vpop.f32.mrb[198].mxu0 }
 0x359   : > { %v5876_v56 = vpop.f32.mrb[199].mxu0  ;;  %4416 = vmatmul.mubr.bf16.gmra.mrb[176].mxu1 %v8901_v13 }
 0x35a   : > { %v9057_v8 = vadd.f32 %v5876_v56, %v5875_v11  ;;  %4423 = vmatprep.mubr.bf16.mxu1 %v8907_v40 }
 0x35e   : > { %v5878_v58 = vpop.f32.mrb[200].mxu0 }
 0x35f   : > { %v5879_v60 = vpop.f32.mrb[201].mxu0 }
 0x360   : > { %v9061_v4 = vadd.f32 %v5879_v60, %v5878_v58  ;;  %v5881_v41 = vpop.f32.mrb[202].mxu0 }
 0x361   : > { %v5882_v3 = vpop.f32.mrb[203].mxu0  ;;  %4424 = vmatmul.mubr.bf16.gmra.mrb[180].mxu1 %v8921_v35 }
 0x362   : > { %v9063_v46 = vadd.f32 %v5882_v3, %v5881_v41  ;;  %4431 = vmatprep.mubr.bf16.mxu1 %v8927_v52 }
 0x366   : > { %v5884_v31 = vpop.f32.mrb[204].mxu0 }
 0x367   : > { %v5885_v21 = vpop.f32.mrb[205].mxu0 }
 0x368   : > { %v9067_v25 = vadd.f32 %v5885_v21, %v5884_v31  ;;  %v5887_v15 = vpop.f32.mrb[206].mxu0 }
 0x369   : > { %v5888_v13 = vpop.f32.mrb[207].mxu0  ;;  %4432 = vmatmul.mubr.bf16.gmra.mrb[184].mxu1 %v8940_v51 }
 0x36a   : > { %v9069_v53 = vadd.f32 %v5888_v13, %v5887_v15  ;;  %4439 = vmatprep.mubr.bf16.mxu1 %v9631_v17 }
 0x36e   : > { %v5890_v40 = vpop.f32.mrb[208].mxu0 }
 0x36f   : > { %v5891_v34 = vpop.f32.mrb[209].mxu0 }
 0x370   : > { %v9073_v61 = vadd.f32 %v5891_v34, %v5890_v40  ;;  %v5893_v33 = vpop.f32.mrb[210].mxu0 }
 0x371   : > { %v5894_v35 = vpop.f32.mrb[211].mxu0  ;;  %4440 = vmatmul.mubr.bf16.gmra.mrb[188].mxu1 %v9631_v17 }
 0x372   : > { %v9075_v49 = vadd.f32 %v5894_v35, %v5893_v33  ;;  %6466 = vmatprep.mubr.bf16.mxu1 %v9633_v43 }
 0x376   : > { %v5896_v52 = vpop.f32.mrb[212].mxu0 }
 0x377   : > { %v5897_v6 = vpop.f32.mrb[213].mxu0 }
 0x378   : > { %v9079_v9 = vadd.f32 %v5897_v6, %v5896_v52  ;;  %v5899_v45 = vpop.f32.mrb[214].mxu0 }
 0x379   : > { %v5900_v51 = vpop.f32.mrb[215].mxu0  ;;  %6467 = vmatmul.mubr.bf16.vlgmr.msra.gmra.mrb[96].mxu1 %v9635_v14 }
 0x37a   : > { %v9081_v16 = vadd.f32 %v5900_v51, %v5899_v45  ;;  %6470 = vmatprep.mubr.bf16.mxu1 %v8623_v37 }
 0x37e   : > { %v5902_v19 = vpop.f32.mrb[216].mxu0 }
 0x37f   : > { %v5903_v10 = vpop.f32.mrb[217].mxu0 }
 0x380   : > { %v9085_v11 = vadd.f32 %v5903_v10, %v5902_v19  ;;  %v5905_v56 = vpop.f32.mrb[218].mxu0 }
 0x381   : > { %v5906_v58 = vpop.f32.mrb[219].mxu0  ;;  %6471 = vmatmul.mubr.bf16.gmra.mrb[100].mxu1 %v8658_v48 }
 0x382   : > { %v9087_v60 = vadd.f32 %v5906_v58, %v5905_v56  ;;  %6474 = vmatprep.mubr.bf16.mxu1 %v8685_v54 }
 0x386   : > { %v5908_v43 = vpop.f32.mrb[220].mxu0 }
 0x387   : > { %v5909_v41 = vpop.f32.mrb[221].mxu0 }
 0x388   : > { %v9091_v3 = vadd.f32 %v5909_v41, %v5908_v43  ;;  %v5911_v31 = vpop.f32.mrb[222].mxu0 }
 0x389   : > { %v5912_v14 = vpop.f32.mrb[223].mxu0  ;;  %6475 = vmatmul.mubr.bf16.gmra.mrb[104].mxu1 %v8712_v42 }
 0x38a   : > { %v9093_v21 = vadd.f32 %v5912_v14, %v5911_v31  ;;  %6478 = vmatprep.mubr.bf16.mxu1 %v8739_v5 }
 0x38e   : > { %v5954_v37 = vpop.f32.mrb[224].mxu0 }
 0x38f   : > { %v5955_v15 = vpop.f32.mrb[225].mxu0 }
 0x390   : > { %v5956_v13 = vadd.f32 %v5955_v15, %v5954_v37  ;;  %v5957_v40 = vpop.f32.mrb[226].mxu0 }
 0x391   : > { %v5958_v34 = vpop.f32.mrb[227].mxu0  ;;  %6479 = vmatmul.mubr.bf16.gmra.mrb[108].mxu1 %v8766_v23 }
 0x392   : > { %v9098_v48 = vadd.f32 %v5956_v13, %v8992_v7  ;;  %v5959_v54 = vadd.f32 %v5958_v34, %v5957_v40  ;;  %6482 = vmatprep.mubr.bf16.mxu1 %v8793_v32 }
 0x394   : > { %v9103_v33 = vadd.f32 %v5959_v54, %v8994_v39 }
 0x396   : > { %v5960_v35 = vpop.f32.mrb[228].mxu0 }
 0x397   : > { %v5961_v42 = vpop.f32.mrb[229].mxu0 }
 0x398   : > { %v5962_v52 = vadd.f32 %v5961_v42, %v5960_v35  ;;  %v5963_v5 = vpop.f32.mrb[230].mxu0 }
 0x399   : > { %v5964_v6 = vpop.f32.mrb[231].mxu0  ;;  %6483 = vmatmul.mubr.bf16.gmra.mrb[112].mxu1 %v8820_v47 }
 0x39a   : > { %v9106_v45 = vadd.f32 %v5962_v52, %v9000_v44  ;;  %v5965_v51 = vadd.f32 %v5964_v6, %v5963_v5  ;;  %6486 = vmatprep.mubr.bf16.mxu1 %v8847_v62 }
 0x39c   : > { %v9111_v23 = vadd.f32 %v5965_v51, %v9002_v63 }
 0x39e   : > { %v5966_v32 = vpop.f32.mrb[232].mxu0 }
 0x39f   : > { %v5967_v7 = vpop.f32.mrb[233].mxu0 }
 0x3a0   : > { %v5968_v39 = vadd.f32 %v5967_v7, %v5966_v32  ;;  %v5969_v19 = vpop.f32.mrb[234].mxu0 }
 0x3a1   : > { %v5970_v10 = vpop.f32.mrb[235].mxu0  ;;  %6487 = vmatmul.mubr.bf16.gmra.mrb[116].mxu1 %v8874_v57 }
 0x3a2   : > { %v9114_v56 = vadd.f32 %v5968_v39, %v9008_v50  ;;  %v5971_v58 = vadd.f32 %v5970_v10, %v5969_v19  ;;  %6490 = vmatprep.mubr.bf16.mxu1 %v8903_v20 }
 0x3a4   : > { %v9119_v47 = vadd.f32 %v5971_v58, %v9010_v36 }
 0x3a6   : > { %v5972_v62 = vpop.f32.mrb[236].mxu0 }
 0x3a7   : > { %v5973_v44 = vpop.f32.mrb[237].mxu0 }
 0x3a8   : > { %v5974_v63 = vadd.f32 %v5973_v44, %v5972_v62  ;;  %v5975_v43 = vpop.f32.mrb[238].mxu0 }
 0x3a9   : > { %v5976_v41 = vpop.f32.mrb[239].mxu0  ;;  %6491 = vmatmul.mubr.bf16.gmra.mrb[120].mxu1 %v8923_v59 }
 0x3aa   : > { %v9122_v31 = vadd.f32 %v5974_v63, %v9016_v22  ;;  %v5977_v14 = vadd.f32 %v5976_v41, %v5975_v43  ;;  %6494 = vmatprep.mubr.bf16.mxu1 %v8942_v30 }
 0x3ac   : > { %v9127_v57 = vadd.f32 %v5977_v14, %v9018_v27 }
 0x3ae   : > { %v5978_v20 = vpop.f32.mrb[240].mxu0 }
 0x3af   : > { %v5979_v50 = vpop.f32.mrb[241].mxu0 }
 0x3b0   : > { %v5980_v36 = vadd.f32 %v5979_v50, %v5978_v20  ;;  %v5981_v37 = vpop.f32.mrb[242].mxu0 }
 0x3b1   : > { %v5982_v15 = vpop.f32.mrb[243].mxu0  ;;  %6495 = vmatmul.mubr.bf16.gmra.mrb[124].mxu1 %v9631_v17 }
 0x3b2   : > { %v9130_v13 = vadd.f32 %v5980_v36, %v9024_v28  ;;  %v5983_v40 = vadd.f32 %v5982_v15, %v5981_v37 }
 0x3b4   : > { %v9134_v22 = vadd.f32 %v5983_v40, %v9026_v1 }
 0x3b6   : > { %v5984_v59 = vpop.f32.mrb[244].mxu0 }
 0x3b7   : > { %v5985_v34 = vpop.f32.mrb[245].mxu0 }
 0x3b8   : > { %v5986_v30 = vadd.f32 %v5985_v34, %v5984_v59  ;;  %v5987_v54 = vpop.f32.mrb[246].mxu0 }
 0x3b9   : > { %v5988_v27 = vpop.f32.mrb[247].mxu0 }
 0x3ba   : > { %v9137_v35 = vadd.f32 %v5986_v30, %v9031_v24  ;;  %v5989_v42 = vadd.f32 %v5988_v27, %v5987_v54 }
 0x3bc   : > { %v9140_v52 = vadd.f32 %v5989_v42, %v9033_v38 }
 0x3be   : > { %v5990_v28 = vpop.f32.mrb[248].mxu0 }
 0x3bf   : > { %v5991_v5 = vpop.f32.mrb[249].mxu0 }
 0x3c0   : > { %v5992_v6 = vadd.f32 %v5991_v5, %v5990_v28  ;;  %v5993_v51 = vpop.f32.mrb[250].mxu0 }
 0x3c1   : > { %v5994_v17 = vpop.f32.mrb[251].mxu0 }
 0x3c2   : > { %v9143_v1 = vadd.f32 %v5992_v6, %v9037_v0  ;;  %v5995_v32 = vadd.f32 %v5994_v17, %v5993_v51 }
 0x3c4   : > { %v9146_v7 = vadd.f32 %v5995_v32, %v9039_v12 }
 0x3c6   : > { %v5996_v39 = vpop.f32.mrb[252].mxu0 }
 0x3c7   : > { %v5997_v19 = vpop.f32.mrb[253].mxu0 }
 0x3c8   : > { %v5998_v24 = vadd.f32 %v5997_v19, %v5996_v39  ;;  %v5999_v10 = vpop.f32.mrb[254].mxu0 }
 0x3c9   : > { %v6000_v58 = vpop.f32.mrb[255].mxu0 }
 0x3ca   : > { %v9149_v38 = vadd.f32 %v5998_v24, %v9043_v26  ;;  %v6001_v62 = vadd.f32 %v6000_v58, %v5999_v10 }
 0x3cc   : > { %v9152_v44 = vadd.f32 %v6001_v62, %v9045_v55  ;;  %v6090_v63 = vpop.f32.mrb[128].mxu1 }
 0x3cd   : > { %v6091_v0 = vpop.f32.mrb[129].mxu1 }
 0x3ce   : > { %v6002_v43 = vpop.f32.mrb[0].mxu0  ;;  %v6092_v14 = vadd.f32 %v6091_v0, %v6090_v63  ;;  %v6093_v20 = vpop.f32.mrb[130].mxu1 }
 0x3cf   : > { %v6003_v41 = vpop.f32.mrb[1].mxu0  ;;  %v6094_v36 = vpop.f32.mrb[131].mxu1 }
 0x3d0   : > { %v6004_v12 = vadd.f32 %v6003_v41, %v6002_v43  ;;  %v6005_v50 = vpop.f32.mrb[2].mxu0  ;;  %v6095_v15 = vadd.f32 %v6094_v36, %v6093_v20  ;;  %v9155_v40 = vadd.f32 %v9098_v48, %v6092_v14 }
 0x3d1   : > { %v6006_v37 = vpop.f32.mrb[3].mxu0 }
 0x3d2   : > { %v9158_v26 = vadd.f32 %v6004_v12, %v9049_v29  ;;  %v6007_v59 = vadd.f32 %v6006_v37, %v6005_v50  ;;  %v9161_v55 = vadd.f32 %v9103_v33, %v6095_v15 }
 0x3d4   : > { %v9164_v34 = vadd.f32 %v6007_v59, %v9051_v2  ;;  %v6096_v30 = vpop.f32.mrb[132].mxu1 }
 0x3d5   : > { %v6097_v27 = vpop.f32.mrb[133].mxu1 }
 0x3d6   : > { %v6008_v54 = vpop.f32.mrb[4].mxu0  ;;  %v6098_v28 = vadd.f32 %v6097_v27, %v6096_v30  ;;  %v6099_v5 = vpop.f32.mrb[134].mxu1 }
 0x3d7   : > { %v6009_v42 = vpop.f32.mrb[5].mxu0  ;;  %v6100_v48 = vpop.f32.mrb[135].mxu1 }
 0x3d8   : > { %v6010_v6 = vadd.f32 %v6009_v42, %v6008_v54  ;;  %v6011_v51 = vpop.f32.mrb[6].mxu0  ;;  %v6101_v32 = vadd.f32 %v6100_v48, %v6099_v5  ;;  %v9167_v29 = vadd.f32 %v9106_v45, %v6098_v28 }
 0x3d9   : > { %v6012_v17 = vpop.f32.mrb[7].mxu0 }
 0x3da   : > { %v9170_v33 = vadd.f32 %v6010_v6, %v9055_v18  ;;  %v6013_v39 = vadd.f32 %v6012_v17, %v6011_v51  ;;  %v9173_v2 = vadd.f32 %v9111_v23, %v6101_v32 }
 0x3dc   : > { %v9176_v19 = vadd.f32 %v6013_v39, %v9057_v8  ;;  %v6102_v24 = vpop.f32.mrb[136].mxu1 }
 0x3dd   : > { %v6103_v58 = vpop.f32.mrb[137].mxu1 }
 0x3de   : > { %v6014_v10 = vpop.f32.mrb[8].mxu0  ;;  %v6104_v63 = vadd.f32 %v6103_v58, %v6102_v24  ;;  %v6105_v43 = vpop.f32.mrb[138].mxu1 }
 0x3df   : > { %v6015_v62 = vpop.f32.mrb[9].mxu0  ;;  %v6106_v45 = vpop.f32.mrb[139].mxu1 }
 0x3e0   : > { %v6016_v0 = vadd.f32 %v6015_v62, %v6014_v10  ;;  %v6017_v41 = vpop.f32.mrb[10].mxu0  ;;  %v6107_v20 = vadd.f32 %v6106_v45, %v6105_v43  ;;  %v9179_v18 = vadd.f32 %v9114_v56, %v6104_v63 }
 0x3e1   : > { %v6018_v14 = vpop.f32.mrb[11].mxu0 }
 0x3e2   : > { %v9182_v23 = vadd.f32 %v6016_v0, %v9061_v4  ;;  %v6019_v12 = vadd.f32 %v6018_v14, %v6017_v41  ;;  %v9185_v8 = vadd.f32 %v9119_v47, %v6107_v20 }
 0x3e4   : > { %v9188_v50 = vadd.f32 %v6019_v12, %v9063_v46  ;;  %v6108_v36 = vpop.f32.mrb[140].mxu1 }
 0x3e5   : > { %v6109_v15 = vpop.f32.mrb[141].mxu1 }
 0x3e6   : > { %v6020_v37 = vpop.f32.mrb[12].mxu0  ;;  %v6110_v30 = vadd.f32 %v6109_v15, %v6108_v36  ;;  %v6111_v54 = vpop.f32.mrb[142].mxu1 }
 0x3e7   : > { %v6021_v59 = vpop.f32.mrb[13].mxu0  ;;  %v6112_v56 = vpop.f32.mrb[143].mxu1 }
 0x3e8   : > { %v6022_v27 = vadd.f32 %v6021_v59, %v6020_v37  ;;  %v6023_v42 = vpop.f32.mrb[14].mxu0  ;;  %v6113_v5 = vadd.f32 %v6112_v56, %v6111_v54  ;;  %v9191_v4 = vadd.f32 %v9122_v31, %v6110_v30 }
 0x3e9   : > { %v6024_v28 = vpop.f32.mrb[15].mxu0 }
 0x3ea   : > { %v9194_v47 = vadd.f32 %v6022_v27, %v9067_v25  ;;  %v6025_v6 = vadd.f32 %v6024_v28, %v6023_v42  ;;  %v9197_v46 = vadd.f32 %v9127_v57, %v6113_v5 }
 0x3ec   : > { %v9200_v51 = vadd.f32 %v6025_v6, %v9069_v53  ;;  %v6114_v48 = vpop.f32.mrb[144].mxu1 }
 0x3ed   : > { %v6115_v32 = vpop.f32.mrb[145].mxu1 }
 0x3ee   : > { %v6026_v17 = vpop.f32.mrb[16].mxu0  ;;  %v6116_v24 = vadd.f32 %v6115_v32, %v6114_v48  ;;  %v6117_v10 = vpop.f32.mrb[146].mxu1 }
 0x3ef   : > { %v6027_v39 = vpop.f32.mrb[17].mxu0  ;;  %v6118_v31 = vpop.f32.mrb[147].mxu1 }
 0x3f0   : > { %v6028_v58 = vadd.f32 %v6027_v39, %v6026_v17  ;;  %v6029_v62 = vpop.f32.mrb[18].mxu0  ;;  %v6119_v43 = vadd.f32 %v6118_v31, %v6117_v10  ;;  %v9203_v25 = vadd.f32 %v9130_v13, %v6116_v24 }
 0x3f1   : > { %v6030_v63 = vpop.f32.mrb[19].mxu0 }
 0x3f2   : > { %v9206_v57 = vadd.f32 %v6028_v58, %v9073_v61  ;;  %v6031_v0 = vadd.f32 %v6030_v63, %v6029_v62  ;;  %v9209_v53 = vadd.f32 %v9134_v22, %v6119_v43 }
 0x3f4   : > { %v9212_v41 = vadd.f32 %v6031_v0, %v9075_v49  ;;  %v6120_v45 = vpop.f32.mrb[148].mxu1 }
 0x3f5   : > { %v6121_v20 = vpop.f32.mrb[149].mxu1 }
 0x3f6   : > { %v6032_v14 = vpop.f32.mrb[20].mxu0  ;;  %v6122_v36 = vadd.f32 %v6121_v20, %v6120_v45  ;;  %v6123_v37 = vpop.f32.mrb[150].mxu1 }
 0x3f7   : > { %v6033_v12 = vpop.f32.mrb[21].mxu0  ;;  %v6124_v13 = vpop.f32.mrb[151].mxu1 }
 0x3f8   : > { %v6034_v15 = vadd.f32 %v6033_v12, %v6032_v14  ;;  %v6035_v59 = vpop.f32.mrb[22].mxu0  ;;  %v6125_v54 = vadd.f32 %v6124_v13, %v6123_v37  ;;  %v9215_v61 = vadd.f32 %v9137_v35, %v6122_v36 }
 0x3f9   : > { %v6036_v30 = vpop.f32.mrb[23].mxu0 }
 0x3fa   : > { %v9218_v22 = vadd.f32 %v6034_v15, %v9079_v9  ;;  %v6037_v27 = vadd.f32 %v6036_v30, %v6035_v59  ;;  %v9221_v49 = vadd.f32 %v9140_v52, %v6125_v54 }
 0x3fc   : > { %v9224_v42 = vadd.f32 %v6037_v27, %v9081_v16  ;;  %v6126_v56 = vpop.f32.mrb[152].mxu1 }
 0x3fd   : > { %v6127_v5 = vpop.f32.mrb[153].mxu1 }
 0x3fe   : > { %v6038_v28 = vpop.f32.mrb[24].mxu0  ;;  %v6128_v48 = vadd.f32 %v6127_v5, %v6126_v56  ;;  %v6129_v17 = vpop.f32.mrb[154].mxu1 }
 0x3ff   : > { %v6039_v6 = vpop.f32.mrb[25].mxu0  ;;  %v6130_v35 = vpop.f32.mrb[155].mxu1 }
 0x400   : > { %v6040_v32 = vadd.f32 %v6039_v6, %v6038_v28  ;;  %v6041_v39 = vpop.f32.mrb[26].mxu0  ;;  %v6131_v10 = vadd.f32 %v6130_v35, %v6129_v17  ;;  %v9227_v9 = vadd.f32 %v9143_v1, %v6128_v48 }
 0x401   : > { %v6042_v24 = vpop.f32.mrb[27].mxu0 }
 0x402   : > { %v9230_v52 = vadd.f32 %v6040_v32, %v9085_v11  ;;  %v6043_v58 = vadd.f32 %v6042_v24, %v6041_v39  ;;  %v9233_v16 = vadd.f32 %v9146_v7, %v6131_v10 }
 0x404   : > { %v9236_v62 = vadd.f32 %v6043_v58, %v9087_v60  ;;  %v6132_v31 = vpop.f32.mrb[156].mxu1 }
 0x405   : > { %v6133_v43 = vpop.f32.mrb[157].mxu1 }
 0x406   : > { %v6044_v63 = vpop.f32.mrb[28].mxu0  ;;  %v6134_v45 = vadd.f32 %v6133_v43, %v6132_v31  ;;  %v6135_v14 = vpop.f32.mrb[158].mxu1 }
 0x407   : > { %v6045_v0 = vpop.f32.mrb[29].mxu0  ;;  %v6136_v1 = vpop.f32.mrb[159].mxu1 }
 0x408   : > { %v6046_v20 = vadd.f32 %v6045_v0, %v6044_v63  ;;  %v6047_v12 = vpop.f32.mrb[30].mxu0  ;;  %v6137_v37 = vadd.f32 %v6136_v1, %v6135_v14  ;;  %v9239_v11 = vadd.f32 %v9149_v38, %v6134_v45 }
 0x409   : > { %v6048_v36 = vpop.f32.mrb[31].mxu0 }
 0x40a   : > { %v9242_v7 = vadd.f32 %v6046_v20, %v9091_v3  ;;  %v6049_v15 = vadd.f32 %v6048_v36, %v6047_v12  ;;  %v9245_v60 = vadd.f32 %v9152_v44, %v6137_v37 }
 0x40c   : > { %v9248_v59 = vadd.f32 %v6049_v15, %v9093_v21  ;;  %v6138_v13 = vpop.f32.mrb[160].mxu1 }
 0x40d   : > { %v6139_v30 = vpop.f32.mrb[161].mxu1 }
 0x40e   : > { %v6140_v54 = vadd.f32 %v6139_v30, %v6138_v13  ;;  %v6141_v27 = vpop.f32.mrb[162].mxu1 }
 0x40f   : > { %v6142_v56 = vpop.f32.mrb[163].mxu1 }
 0x410   : > { %v6143_v28 = vadd.f32 %v6142_v56, %v6141_v27  ;;  %v9251_v5 = vadd.f32 %v9158_v26, %v6140_v54 }
 0x412   : > { %v9254_v38 = vadd.f32 %v9164_v34, %v6143_v28 }
 0x414   : > { %v6144_v3 = vpop.f32.mrb[164].mxu1 }
 0x415   : > { %v6145_v6 = vpop.f32.mrb[165].mxu1 }
 0x416   : > { %v6146_v48 = vadd.f32 %v6145_v6, %v6144_v3  ;;  %v6147_v44 = vpop.f32.mrb[166].mxu1 }
 0x417   : > { %v6148_v17 = vpop.f32.mrb[167].mxu1 }
 0x418   : > { %v6149_v32 = vadd.f32 %v6148_v17, %v6147_v44  ;;  %v9257_v21 = vadd.f32 %v9170_v33, %v6146_v48 }
 0x41a   : > { %v9260_v39 = vadd.f32 %v9176_v19, %v6149_v32 }
 0x41c   : > { %v6150_v35 = vpop.f32.mrb[168].mxu1 }
 0x41d   : > { %v6151_v24 = vpop.f32.mrb[169].mxu1 }
 0x41e   : > { %v6152_v10 = vadd.f32 %v6151_v24, %v6150_v35  ;;  %v6153_v26 = vpop.f32.mrb[170].mxu1 }
 0x41f   : > { %v6154_v58 = vpop.f32.mrb[171].mxu1 }
 0x420   : > { %v6155_v31 = vadd.f32 %v6154_v58, %v6153_v26  ;;  %v9263_v34 = vadd.f32 %v9182_v23, %v6152_v10 }
 0x422   : > { %v9266_v63 = vadd.f32 %v9188_v50, %v6155_v31 }
 0x424   : > { %v6156_v43 = vpop.f32.mrb[172].mxu1 }
 0x425   : > { %v6157_v0 = vpop.f32.mrb[173].mxu1 }
 0x426   : > { %v6158_v45 = vadd.f32 %v6157_v0, %v6156_v43  ;;  %v6159_v33 = vpop.f32.mrb[174].mxu1 }
 0x427   : > { %v6160_v14 = vpop.f32.mrb[175].mxu1 }
 0x428   : > { %v6161_v20 = vadd.f32 %v6160_v14, %v6159_v33  ;;  %v9269_v19 = vadd.f32 %v9194_v47, %v6158_v45  ;;  %v9307_v14 = vld [vmem:[%s9484_s4 + $0x1] ss:$0 sm:$0xff] }
 0x42a   : > { %v9272_v12 = vadd.f32 %v9200_v51, %v6161_v20 }
 0x42c   : > { %v6162_v1 = vpop.f32.mrb[176].mxu1 }
 0x42d   : > { %v6163_v36 = vpop.f32.mrb[177].mxu1 }
 0x42e   : > { %v6164_v37 = vadd.f32 %v6163_v36, %v6162_v1  ;;  %v6165_v23 = vpop.f32.mrb[178].mxu1 }
 0x42f   : > { %v6166_v15 = vpop.f32.mrb[179].mxu1 }
 0x430   : > { %v6167_v13 = vadd.f32 %v6166_v15, %v6165_v23  ;;  %v9275_v50 = vadd.f32 %v9206_v57, %v6164_v37 }
 0x432   : > { %v9278_v30 = vadd.f32 %v9212_v41, %v6167_v13 }
 0x434   : > { %v6168_v54 = vpop.f32.mrb[180].mxu1 }
 0x435   : > { %v6169_v27 = vpop.f32.mrb[181].mxu1 }
 0x436   : > { %v6170_v56 = vadd.f32 %v6169_v27, %v6168_v54  ;;  %v6171_v47 = vpop.f32.mrb[182].mxu1 }
 0x437   : > { %v6172_v28 = vpop.f32.mrb[183].mxu1 }
 0x438   : > { %v6173_v3 = vadd.f32 %v6172_v28, %v6171_v47  ;;  %v9281_v51 = vadd.f32 %v9218_v22, %v6170_v56 }
 0x43a   : > { %v9284_v6 = vadd.f32 %v9224_v42, %v6173_v3 }
 0x43c   : > { %v6174_v48 = vpop.f32.mrb[184].mxu1 }
 0x43d   : > { %v6175_v44 = vpop.f32.mrb[185].mxu1 }
 0x43e   : > { %v6176_v17 = vadd.f32 %v6175_v44, %v6174_v48  ;;  %v6177_v57 = vpop.f32.mrb[186].mxu1 }
 0x43f   : > { %v6178_v32 = vpop.f32.mrb[187].mxu1 }
 0x440   : > { %v6179_v35 = vadd.f32 %v6178_v32, %v6177_v57  ;;  %v9287_v41 = vadd.f32 %v9230_v52, %v6176_v17  ;;  %v9301_v52 = vld [vmem:[%s9484_s4] ss:$0 sm:$0xff] }
 0x442   : > { %v9290_v24 = vadd.f32 %v9236_v62, %v6179_v35 }
 0x444   : > { %v6180_v10 = vpop.f32.mrb[188].mxu1 }
 0x445   : > { %v6181_v26 = vpop.f32.mrb[189].mxu1 }
 0x446   : > { %v6182_v58 = vadd.f32 %v6181_v26, %v6180_v10  ;;  %v6183_v22 = vpop.f32.mrb[190].mxu1 }
 0x447   : > { %v6184_v31 = vpop.f32.mrb[191].mxu1 }
 0x448   : > { %v6185_v43 = vadd.f32 %v6184_v31, %v6183_v22  ;;  %v9293_v42 = vadd.f32 %v9242_v7, %v6182_v58 }
 0x44a   : > { %v9296_v0 = vadd.f32 %v9248_v59, %v6185_v43 }
 0x44c   : > { %v6468_v45 = vpop.f32.mrb[96].mxu1 }
 0x44d   : > { %v6628_v62 = vadd.f32 %v9167_v29, %v6468_v45  ;;  %v4482_v33 = vpop.f32.mrb[97].mxu1 }
 0x44e   : > { %v6631_v7 = vadd.f32 %v9155_v40, %v4482_v33  ;;  %v6469_v20 = vpop.f32.mrb[98].mxu1 }
 0x44f   : > { %v4647_v59 = vmul.f32 %v6628_v62, %v9301_v52  ;;  %v6634_v1 = vadd.f32 %v9173_v2, %v6469_v20  ;;  %v4485_v36 = vpop.f32.mrb[99].mxu1 }
 0x450   : > { %v4645_v37 = vmul.f32 %v6631_v7, %v9301_v52  ;;  %v6637_v23 = vadd.f32 %v9161_v55, %v4485_v36 }
 0x451   : > { %v4683_v29 = vadd.f32 %v9307_v14, %v4647_v59  ;;  %v4648_v15 = vmul.f32 %v6634_v1, %v9301_v52 }
 0x452   : > { %v4681_v13 = vadd.f32 %v9307_v14, %v4645_v37  ;;  %v4646_v54 = vmul.f32 %v6637_v23, %v9301_v52 }
 0x453   : > { %v4684_v40 = vadd.f32 %v9307_v14, %v4648_v15  ;;  %v4715_v2 = vmax.f32 %v4683_v29, 0.0 }
 0x454   : > { %v4682_v27 = vadd.f32 %v9307_v14, %v4646_v54  ;;  %v6472_v56 = vpop.f32.mrb[100].mxu1  ;;  %v4713_v55 = vmax.f32 %v4681_v13, 0.0 }
 0x455   : > { %v4716_v47 = vmax.f32 %v4684_v40, 0.0  ;;  %v6640_v28 = vadd.f32 %v9191_v4, %v6472_v56  ;;  %v4498_v3 = vpop.f32.mrb[101].mxu1 }
 0x456   : > { %v4714_v48 = vmax.f32 %v4682_v27, 0.0  ;;  %v6643_v44 = vadd.f32 %v9179_v18, %v4498_v3  ;;  %v6473_v17 = vpop.f32.mrb[102].mxu1 }
 0x457   : > { %v5307_v57 = vpack.c.bf16 %v4716_v47, %v4715_v2  ;;  %v4651_v32 = vmul.f32 %v6640_v28, %v9301_v52  ;;  %v6646_v35 = vadd.f32 %v9197_v46, %v6473_v17  ;;  %v4501_v10 = vpop.f32.mrb[103].mxu1 }
 0x458   : > { %v5302_v26 = vpack.c.bf16 %v4714_v48, %v4713_v55  ;;  %v4649_v58 = vmul.f32 %v6643_v44, %v9301_v52  ;;  %v6649_v22 = vadd.f32 %v9185_v8, %v4501_v10 }
 0x459   : > { %5379 = vst [vmem:[%s9328_s25 + $0x8] sm:$0xff] %v5307_v57   ;;  %v4687_v18 = vadd.f32 %v9307_v14, %v4651_v32  ;;  %v4652_v4 = vmul.f32 %v6646_v35, %v9301_v52 }
 0x45a   : > { %5303 = vst [vmem:[%s9328_s25] sm:$0xff] %v5302_v26   ;;  %v4685_v31 = vadd.f32 %v9307_v14, %v4649_v58  ;;  %v4650_v46 = vmul.f32 %v6649_v22, %v9301_v52 }
 0x45b   : > { %v4688_v43 = vadd.f32 %v9307_v14, %v4652_v4  ;;  %v4719_v62 = vmax.f32 %v4687_v18, 0.0 }
 0x45c   : > { %v4686_v45 = vadd.f32 %v9307_v14, %v4650_v46  ;;  %v6476_v8 = vpop.f32.mrb[104].mxu1  ;;  %v4717_v59 = vmax.f32 %v4685_v31, 0.0 }
 0x45d   : > { %v4720_v33 = vmax.f32 %v4688_v43, 0.0  ;;  %v6652_v7 = vadd.f32 %v9215_v61, %v6476_v8  ;;  %v4514_v20 = vpop.f32.mrb[105].mxu1 }
 0x45e   : > { %v4718_v1 = vmax.f32 %v4686_v45, 0.0  ;;  %v6655_v36 = vadd.f32 %v9203_v25, %v4514_v20  ;;  %v6477_v37 = vpop.f32.mrb[106].mxu1 }
 0x45f   : > { %v5317_v23 = vpack.c.bf16 %v4720_v33, %v4719_v62  ;;  %v4655_v29 = vmul.f32 %v6652_v7, %v9301_v52  ;;  %v6658_v15 = vadd.f32 %v9221_v49, %v6477_v37  ;;  %v4517_v13 = vpop.f32.mrb[107].mxu1 }
 0x460   : > { %v5312_v54 = vpack.c.bf16 %v4718_v1, %v4717_v59  ;;  %v4653_v40 = vmul.f32 %v6655_v36, %v9301_v52  ;;  %v6661_v27 = vadd.f32 %v9209_v53, %v4517_v13 }
 0x461   : > { %5381 = vst [vmem:[%s9328_s25 + $0x18] sm:$0xff] %v5317_v23   ;;  %v4691_v61 = vadd.f32 %v9307_v14, %v4655_v29  ;;  %v4656_v56 = vmul.f32 %v6658_v15, %v9301_v52 }
 0x462   : > { %5380 = vst [vmem:[%s9328_s25 + $0x10] sm:$0xff] %v5312_v54   ;;  %v4689_v25 = vadd.f32 %v9307_v14, %v4653_v40  ;;  %v4654_v2 = vmul.f32 %v6661_v27, %v9301_v52 }
 0x463   : > { %v4692_v47 = vadd.f32 %v9307_v14, %v4656_v56  ;;  %v4723_v3 = vmax.f32 %v4691_v61, 0.0 }
 0x464   : > { %v4690_v49 = vadd.f32 %v9307_v14, %v4654_v2  ;;  %v6480_v28 = vpop.f32.mrb[108].mxu1  ;;  %v4721_v44 = vmax.f32 %v4689_v25, 0.0 }
 0x465   : > { %v4724_v55 = vmax.f32 %v4692_v47, 0.0  ;;  %v6664_v53 = vadd.f32 %v9239_v11, %v6480_v28  ;;  %v4530_v48 = vpop.f32.mrb[109].mxu1 }
 0x466   : > { %v4722_v17 = vmax.f32 %v4690_v49, 0.0  ;;  %v6667_v57 = vadd.f32 %v9227_v9, %v4530_v48  ;;  %v6481_v32 = vpop.f32.mrb[110].mxu1 }
 0x467   : > { %v5327_v35 = vpack.c.bf16 %v4724_v55, %v4723_v3  ;;  %v4659_v10 = vmul.f32 %v6664_v53, %v9301_v52  ;;  %v6670_v26 = vadd.f32 %v9245_v60, %v6481_v32  ;;  %v4533_v58 = vpop.f32.mrb[111].mxu1 }
 0x468   : > { %v5322_v22 = vpack.c.bf16 %v4722_v17, %v4721_v44  ;;  %v4657_v18 = vmul.f32 %v6667_v57, %v9301_v52  ;;  %v6673_v4 = vadd.f32 %v9233_v16, %v4533_v58 }
 0x469   : > { %5383 = vst [vmem:[%s9328_s25 + $0x28] sm:$0xff] %v5327_v35   ;;  %v4695_v11 = vadd.f32 %v9307_v14, %v4659_v10  ;;  %v4660_v31 = vmul.f32 %v6670_v26, %v9301_v52 }
 0x46a   : > { %5382 = vst [vmem:[%s9328_s25 + $0x20] sm:$0xff] %v5322_v22   ;;  %v4693_v9 = vadd.f32 %v9307_v14, %v4657_v18  ;;  %v4658_v46 = vmul.f32 %v6673_v4, %v9301_v52 }
 0x46b   : > { %v4696_v43 = vadd.f32 %v9307_v14, %v4660_v31  ;;  %v4727_v8 = vmax.f32 %v4695_v11, 0.0 }
 0x46c   : > { %v4694_v60 = vadd.f32 %v9307_v14, %v4658_v46  ;;  %v6484_v45 = vpop.f32.mrb[112].mxu1  ;;  %v4725_v7 = vmax.f32 %v4693_v9, 0.0 }
 0x46d   : > { %v4728_v62 = vmax.f32 %v4696_v43, 0.0  ;;  %v6676_v16 = vadd.f32 %v9257_v21, %v6484_v45  ;;  %v4546_v33 = vpop.f32.mrb[113].mxu1 }
 0x46e   : > { %v4726_v20 = vmax.f32 %v4694_v60, 0.0  ;;  %v6679_v59 = vadd.f32 %v9251_v5, %v4546_v33  ;;  %v6485_v1 = vpop.f32.mrb[114].mxu1 }
 0x46f   : > { %v5337_v36 = vpack.c.bf16 %v4728_v62, %v4727_v8  ;;  %v4663_v37 = vmul.f32 %v6676_v16, %v9301_v52  ;;  %v6682_v23 = vadd.f32 %v9260_v39, %v6485_v1  ;;  %v4549_v29 = vpop.f32.mrb[115].mxu1 }
 0x470   : > { %v5332_v15 = vpack.c.bf16 %v4726_v20, %v4725_v7  ;;  %v4661_v13 = vmul.f32 %v6679_v59, %v9301_v52  ;;  %v6685_v54 = vadd.f32 %v9254_v38, %v4549_v29 }
 0x471   : > { %5385 = vst [vmem:[%s9328_s25 + $0x38] sm:$0xff] %v5337_v36   ;;  %v4699_v21 = vadd.f32 %v9307_v14, %v4663_v37  ;;  %v4664_v40 = vmul.f32 %v6682_v23, %v9301_v52 }
 0x472   : > { %5384 = vst [vmem:[%s9328_s25 + $0x30] sm:$0xff] %v5332_v15   ;;  %v4697_v5 = vadd.f32 %v9307_v14, %v4661_v13  ;;  %v4662_v27 = vmul.f32 %v6685_v54, %v9301_v52 }
 0x473   : > { %v4700_v61 = vadd.f32 %v9307_v14, %v4664_v40  ;;  %v4731_v25 = vmax.f32 %v4699_v21, 0.0 }
 0x474   : > { %v4698_v39 = vadd.f32 %v9307_v14, %v4662_v27  ;;  %v6488_v56 = vpop.f32.mrb[116].mxu1  ;;  %v4729_v49 = vmax.f32 %v4697_v5, 0.0 }
 0x475   : > { %v4732_v2 = vmax.f32 %v4700_v61, 0.0  ;;  %v6688_v38 = vadd.f32 %v9269_v19, %v6488_v56  ;;  %v4562_v47 = vpop.f32.mrb[117].mxu1 }
 0x476   : > { %v4730_v28 = vmax.f32 %v4698_v39, 0.0  ;;  %v6691_v3 = vadd.f32 %v9263_v34, %v4562_v47  ;;  %v6489_v55 = vpop.f32.mrb[118].mxu1 }
 0x477   : > { %v5347_v53 = vpack.c.bf16 %v4732_v2, %v4731_v25  ;;  %v4667_v48 = vmul.f32 %v6688_v38, %v9301_v52  ;;  %v6694_v44 = vadd.f32 %v9272_v12, %v6489_v55  ;;  %v4565_v17 = vpop.f32.mrb[119].mxu1 }
 0x478   : > { %v5342_v57 = vpack.c.bf16 %v4730_v28, %v4729_v49  ;;  %v4665_v32 = vmul.f32 %v6691_v3, %v9301_v52  ;;  %v6697_v35 = vadd.f32 %v9266_v63, %v4565_v17 }
 0x479   : > { %5387 = vst [vmem:[%s9328_s25 + $0x48] sm:$0xff] %v5347_v53   ;;  %v4703_v19 = vadd.f32 %v9307_v14, %v4667_v48  ;;  %v4668_v10 = vmul.f32 %v6694_v44, %v9301_v52 }
 0x47a   : > { %5386 = vst [vmem:[%s9328_s25 + $0x40] sm:$0xff] %v5342_v57   ;;  %v4701_v34 = vadd.f32 %v9307_v14, %v4665_v32  ;;  %v4666_v26 = vmul.f32 %v6697_v35, %v9301_v52 }
 0x47b   : > { %v4704_v58 = vadd.f32 %v9307_v14, %v4668_v10  ;;  %v4735_v18 = vmax.f32 %v4703_v19, 0.0 }
 0x47c   : > { %v4702_v12 = vadd.f32 %v9307_v14, %v4666_v26  ;;  %v6492_v22 = vpop.f32.mrb[120].mxu1  ;;  %v4733_v31 = vmax.f32 %v4701_v34, 0.0 }
 0x47d   : > { %v4736_v4 = vmax.f32 %v4704_v58, 0.0  ;;  %v6700_v63 = vadd.f32 %v9281_v51, %v6492_v22  ;;  %v4578_v11 = vpop.f32.mrb[121].mxu1 }
 0x47e   : > { %v4734_v9 = vmax.f32 %v4702_v12, 0.0  ;;  %v6703_v46 = vadd.f32 %v9275_v50, %v4578_v11  ;;  %v6493_v43 = vpop.f32.mrb[122].mxu1 }
 0x47f   : > { %v5357_v60 = vpack.c.bf16 %v4736_v4, %v4735_v18  ;;  %v4671_v45 = vmul.f32 %v6700_v63, %v9301_v52  ;;  %v6706_v8 = vadd.f32 %v9284_v6, %v6493_v43  ;;  %v4581_v62 = vpop.f32.mrb[123].mxu1 }
 0x480   : > { %v5352_v16 = vpack.c.bf16 %v4734_v9, %v4733_v31  ;;  %v4669_v33 = vmul.f32 %v6703_v46, %v9301_v52  ;;  %v6709_v7 = vadd.f32 %v9278_v30, %v4581_v62 }
 0x481   : > { %5389 = vst [vmem:[%s9328_s25 + $0x58] sm:$0xff] %v5357_v60   ;;  %v4707_v51 = vadd.f32 %v9307_v14, %v4671_v45  ;;  %v4672_v20 = vmul.f32 %v6706_v8, %v9301_v52 }
 0x482   : > { %5388 = vst [vmem:[%s9328_s25 + $0x50] sm:$0xff] %v5352_v16   ;;  %v4705_v50 = vadd.f32 %v9307_v14, %v4669_v33  ;;  %v4670_v59 = vmul.f32 %v6709_v7, %v9301_v52 }
 0x483   : > { %v4708_v1 = vadd.f32 %v9307_v14, %v4672_v20  ;;  %v4739_v37 = vmax.f32 %v4707_v51, 0.0 }
 0x484   : > { %v4706_v6 = vadd.f32 %v9307_v14, %v4670_v59  ;;  %v6496_v36 = vpop.f32.mrb[124].mxu1  ;;  %v4737_v15 = vmax.f32 %v4705_v50, 0.0 }
 0x485   : > { %v4740_v23 = vmax.f32 %v4708_v1, 0.0  ;;  %v6712_v30 = vadd.f32 %v9293_v42, %v6496_v36  ;;  %v4594_v29 = vpop.f32.mrb[125].mxu1 }
 0x486   : > { %v4738_v13 = vmax.f32 %v4706_v6, 0.0  ;;  %v6715_v54 = vadd.f32 %v9287_v41, %v4594_v29  ;;  %v6497_v21 = vpop.f32.mrb[126].mxu1 }
 0x487   : > { %v5367_v40 = vpack.c.bf16 %v4740_v23, %v4739_v37  ;;  %v4675_v5 = vmul.f32 %v6712_v30, %v9301_v52  ;;  %v6718_v27 = vadd.f32 %v9296_v0, %v6497_v21  ;;  %v4597_v61 = vpop.f32.mrb[127].mxu1 }
 0x488   : > { %v5362_v39 = vpack.c.bf16 %v4738_v13, %v4737_v15  ;;  %v4673_v56 = vmul.f32 %v6715_v54, %v9301_v52  ;;  %v6721_v42 = vadd.f32 %v9290_v24, %v4597_v61 }
 0x489   : > { %5391 = vst [vmem:[%s9328_s25 + $0x68] sm:$0xff] %v5367_v40   ;;  %v4711_v25 = vadd.f32 %v9307_v14, %v4675_v5  ;;  %v4676_v2 = vmul.f32 %v6718_v27, %v9301_v52 }
 0x48a   : > { %5390 = vst [vmem:[%s9328_s25 + $0x60] sm:$0xff] %v5362_v39   ;;  %v4709_v41 = vadd.f32 %v9307_v14, %v4673_v56  ;;  %v4674_v38 = vmul.f32 %v6721_v42, %v9301_v52 }
 0x48b   : > { %v4712_v0 = vadd.f32 %v9307_v14, %v4676_v2  ;;  %v4743_v24 = vmax.f32 %v4711_v25, 0.0 }
 0x48c   : > { %v4710_v47 = vadd.f32 %v9307_v14, %v4674_v38  ;;  %v4741_v28 = vmax.f32 %v4709_v41, 0.0 }
 0x48d   : > { %v4744_v49 = vmax.f32 %v4712_v0, 0.0 }
 0x48e   : > { %v4742_v3 = vmax.f32 %v4710_v47, 0.0 }
 0x48f   : > { %v5377_v55 = vpack.c.bf16 %v4744_v49, %v4743_v24 }
 0x490   : > { %v5372_v52 = vpack.c.bf16 %v4742_v3, %v4741_v28 }
 0x491   : > { %5393 = vst [vmem:[%s9328_s25 + $0x78] sm:$0xff] %v5377_v55  }
 0x492   : > { %5392 = vst [vmem:[%s9328_s25 + $0x70] sm:$0xff] %v5372_v52  }
 0x493   : > { %7184 = shalt.err (!%p7181_p11)
}
 0x494   : > { %s7185_s16 = scalar_lea.hbm %s9427_s6, 2048  ;;  %s7189_s15 = scalar_lea.hbm %s9485_s5, 4096 }
 0x495   : > { %p7186_p0 = scmp.ne.s32.totalorder %s9427_s6, %s7185_s16  ;;  %p7190_p6 = scmp.lt.u32.totalorder %s9427_s6, %s9485_s5 }
 0x496   : > { %p7191_p7 = scmp.lt.u32.totalorder %s7189_s15, %s7185_s16  ;;  %p7193_p8 = scmp.lt.u32.totalorder %s7185_s16, %s9427_s6 }
 0x497   : > { %p7187_p4 = pnand %p7186_p0, %p9644_p12 }
 0x498   : > { %p7192_p2 = por %p7191_p7, %p7190_p6 }
 0x499   : > { %p7188_p13 = pneg %p7187_p4 }
 0x49a   : > { %p7194_p1 = por %p7193_p8, %p7192_p2 }
 0x49c   : > { %p7195_p10 = pnand %p7194_p1, %p7188_p13 }
 0x49e   : > { %7198 = shalt.err (!%p7195_p10)
}
 0x49f   : > { %s7267_s28 = smov 64   ;;  %s7268_s30 = smov 4  }
 0x4a0   : > { %6828 = dma.vmem_to_hbm [thread:$0]  (%p9644_p12), %s9429_s26, 2048, %s9427_s6, %s4909_s21, %s7267_s28, %s7267_s28, %s7268_s30  }
 0x4a1 PF: > { %s4938_s9 = sand.u32 1, %s7237_s18   ;;  %p9645_p3 = scmp.ne.s32.totalorder %s9536_s29, 0 }
 0x4a2   : > { %p9646_p5 = scmp.ge.s32.totalorder %s7257_s23, 2  ;;  %s4939_s11 = scalar_lea.sflag [#allocation6], %s4938_s9 }
 0x4a4   : > { %p6842_p9 = pnand %p9646_p5, %p9645_p3 }
 0x4a6   : > { %7232 = dma.done.wait (!%p6842_p9), %s4939_s11, 2048  }
 0x4a7   : > { %7234 = vsyncadd (!%p6842_p9), %s4939_s11, 4294965248  ;;  %s22_s23 = sadd.s32 1, %s7257_s23   ;;  %s9647_s18 = smov %s7241_s19 }
 0x4a8   : > { %p19_p11 = scmp.ge.s32.totalorder %s22_s23, 4   ;;  %s9648_s19 = smov %s7245_s20 }
 0x4a9   : > { %s9649_s20 = smov %s7447_s17  ;;  %s9650_s21 = smov %s7253_s22 }
 0x4aa   : > { %s9651_s22 = smov %s9653_s8  ;;  %21 = sbr.rel (!%p19_p11) target bundleno = 7 (0x7), region = 116 }
 0x4b1   :  { %4944 = vsyncpa [#allocation5], 1 }
 0x4b2   :  { %4946 = vsyncpa [#allocation5 + $0x1], 1 }
 0x4b3   :  { %4947 = vsyncpa [#allocation8], 1 }
 0x4b4   :  { %4948 = vsyncpa [#allocation6], 1 }
 0x4b5   :  { %4950 = vsyncpa [#allocation6 + $0x1], 1 }

</bundles_post_ra>
